<compile_context>
chip_gen: v7x
topology: tpu7x:2x2x1
jax: 0.10.0
libtpu: 0.0.40
codegen_flags: <defaults>
</compile_context>

<pallas_src>
import jax
import jax.numpy as jnp
from jax.experimental import pallas as pl
from jax.experimental.pallas import tpu as pltpu

# ------------------------- small config (structure-preserving) -------------------------
B = 2            # batch
L = 8            # max_line (sequence length over code lines)
T = 8            # max_token per line
E = 16           # embed_dim
V = 40           # vocab_size
S = 32           # sent_dim == GRU hidden size == top attention hidden (divisible by 4)
C = 16           # DFMcnn channel_size (divisible by 2)
O = 32           # DFMcnn out_channel
NCLASS = 2
GRU_IN = T * E   # GRU input_size (analogue of 1500 = 30 * 50 in the original module)
N_DFM = 3


def _bdot(a, b):
    """MXU matmul: bf16 operands, f32 accumulation (casts are no-ops when already bf16)."""
    return jnp.dot(a.astype(jnp.bfloat16), b.astype(jnp.bfloat16),
                   preferred_element_type=jnp.float32)


# ======================= single fused kernel: BiGRU + fc + attention + DFMcnn =======================

def _combined_kernel(x_ref, pdg_ref,
                     wih_ref, bih_ref, whh_ref, bhh_ref, fcw_ref, fcb_ref,
                     wv_ref, bv_ref, wft_ref, cst_ref,
                     w3_ref, b3_ref, wvd_ref, bvd_ref, wfd_ref, cstd_ref,
                     wt_ref, bt_ref, o_ref):
    # x_ref   : (1, L, GRU_IN) bf16 masked embeddings for this batch element
    # pdg_ref : (1, 4L, L)     bf16 pdg, channel-major rows (row = i*L + l)
    # o_ref   : (1, L, O)      f32
    H = whh_ref.shape[2] // 3            # GRU hidden (== S)
    Ll = x_ref.shape[1]

    # ---- BiGRU: input projection hoisted out of the recurrence (1 well-shaped matmul) ----
    xg = (jnp.dot(x_ref[0], wih_ref[...], preferred_element_type=jnp.float32)
          + bih_ref[...])                # (L, 6H): cols [:3H] fwd gates, [3H:] bwd gates

    whh_f, whh_b = whh_ref[0], whh_ref[1]
    bhh_f, bhh_b = bhh_ref[0], bhh_ref[1]

    def cell(xg_row, h, whh, bhh):
        hg = _bdot(h, whh) + bhh         # (1, 3H) f32
        r = jax.nn.sigmoid(xg_row[:, 0:H] + hg[:, 0:H])
        z = jax.nn.sigmoid(xg_row[:, H:2 * H] + hg[:, H:2 * H])
        n = jnp.tanh(xg_row[:, 2 * H:3 * H] + r * hg[:, 2 * H:3 * H])
        return (1.0 - z) * n + z * h

    h_f = jnp.zeros((1, H), jnp.float32)
    h_b = jnp.zeros((1, H), jnp.float32)
    hs_f = [None] * Ll
    hs_b = [None] * Ll
    # Both directions interleaved in one fully-unrolled loop; only the tiny h @ W_hh
    # matmuls sit on the serial dependency chain.
    for t in range(Ll):
        tb = Ll - 1 - t
        h_f = cell(xg[t:t + 1, 0:3 * H], h_f, whh_f, bhh_f)
        h_b = cell(xg[tb:tb + 1, 3 * H:6 * H], h_b, whh_b, bhh_b)
        hs_f[t] = h_f
        hs_b[tb] = h_b

    # TODO(synk): nn.Dropout(0.5) on the BiGRU output is treated as inference-mode identity.
    hf = jnp.concatenate(hs_f, axis=0)   # (L, H)
    hb = jnp.concatenate(hs_b, axis=0)
    enc = _bdot(hf, fcw_ref[0]) + _bdot(hb, fcw_ref[1]) + fcb_ref[...]   # (L, S) f32, stays in VMEM

    pdg = pdg_ref[0]                     # (4L, L) bf16

    # ---- top 4-channel multi-attention; W_o folded into the (1,S) `single` conv ----
    v = _bdot(enc, wv_ref[...]) + bv_ref[...]            # shared W_v, computed once  (L, S)
    av = _bdot(pdg, v)                                   # all 4 channels in one matmul (4L, S)
    acc = None
    for i in range(4):
        c = _bdot(av[i * Ll:(i + 1) * Ll], wft_ref[i])   # aligned 8-row sublane slices
        acc = c if acc is None else acc + c
    x = jnp.maximum(acc + cst_ref[...], 0.0)             # single conv + ReLU -> (L, C)

    n_dfm = b3_ref.shape[0]
    row = jax.lax.broadcasted_iota(jnp.int32, (Ll, x.shape[1]), 0)

    # ---- 3 DFM blocks ----
    for d in range(n_dfm):
        r = x
        # (3,1) conv as ONE matmul on [x_{l-1} | x_l | x_{l+1}] built with XLU rolls
        xm1 = jnp.where(row == 0, 0.0, pltpu.roll(x, shift=1, axis=0))
        xp1 = jnp.where(row == Ll - 1, 0.0, pltpu.roll(x, shift=Ll - 1, axis=0))
        x3 = jnp.concatenate([xm1, x, xp1], axis=1)      # (L, 3C)
        x2 = jnp.maximum(_bdot(x3, w3_ref[d]) + b3_ref[d], 0.0)

        # DFM multi-attention (shared W_v / W_o, 4 pdg channels), W_o folded into conv4
        v2 = _bdot(x2, wvd_ref[d]) + bvd_ref[d]          # (L, C)
        av2 = _bdot(pdg, v2)                             # (4L, C) one matmul
        acc = None
        for i in range(4):
            c = _bdot(av2[i * Ll:(i + 1) * Ll], wfd_ref[4 * d + i])
            acc = c if acc is None else acc + c
        x = jnp.maximum(acc + cstd_ref[d] + r, 0.0)      # conv4 + residual + ReLU

    # ---- tail 1x1 conv ----
    o_ref[0] = _bdot(x, wt_ref[...]) + bt_ref[...]       # (L, O)


def combined_pallas(x_emb, pdg_cm, weights):
    """x_emb: (B, L, GRU_IN) bf16, pdg_cm: (B, 4L, L) bf16 -> (B, L, O) f32 in ONE pallas_call."""
    def batch_spec(shape):
        nd = len(shape)
        return pl.BlockSpec((1,) + tuple(shape[1:]), lambda b, _n=nd: (b,) + (0,) * (_n - 1))

    def full_spec(shape):
        nd = len(shape)
        return pl.BlockSpec(tuple(shape), lambda b, _n=nd: (0,) * _n)

    in_specs = ([batch_spec(x_emb.shape), batch_spec(pdg_cm.shape)]
                + [full_spec(w.shape) for w in weights])
    return pl.pallas_call(
        _combined_kernel,
        out_shape=jax.ShapeDtypeStruct((x_emb.shape[0], L, O), jnp.float32),
        grid=(x_emb.shape[0],),
        in_specs=in_specs,
        out_specs=pl.BlockSpec((1, L, O), lambda b: (b, 0, 0)),
        compiler_params=pltpu.CompilerParams(dimension_semantics=("parallel",)),
    )(x_emb, pdg_cm, *weights)


# ======================= host-side weight packing (part of the jitted forward) =======================

def prep_weights(params):
    bf16 = jnp.bfloat16
    gf, gb = params["gru"]["fwd"], params["gru"]["bwd"]
    wih = jnp.concatenate([gf["w_ih"].T, gb["w_ih"].T], axis=1).astype(bf16)   # (GRU_IN, 6S)
    bih = jnp.concatenate([gf["b_ih"], gb["b_ih"]])[None, :]                   # (1, 6S)
    whh = jnp.stack([gf["w_hh"].T, gb["w_hh"].T]).astype(bf16)                 # (2, S, 3S)
    bhh = jnp.stack([gf["b_hh"], gb["b_hh"]])[:, None, :]                      # (2, 1, 3S)
    fcw_t = params["enc_fc_w"].T                                               # (2S, S)
    fcw = jnp.stack([fcw_t[:S], fcw_t[S:]]).astype(bf16)                       # (2, S, S) split fwd/bwd
    fcb = params["enc_fc_b"][None, :]

    tma = params["top_ma"]
    wv_top = tma["wv_t"].astype(bf16)
    bv_top = tma["bv"][None, :]
    # Conv2d(4, C, (1, S)) split per input channel, with the shared W_o folded in:
    #   contrib_i = (pdg_i @ v) @ (W_o^T @ wsing_i) + b_o @ wsing_i
    wsing = jnp.transpose(params["single_w"][:, :, 0, :], (1, 2, 0))           # (4, S, C)
    wfold_top = jnp.einsum("sh,ihc->isc", tma["wo_t"], wsing).astype(bf16)     # (4, S, C)
    cst_top = (jnp.einsum("h,ihc->c", tma["bo"], wsing) + params["single_b"])[None, :]

    dfms = params["dfms"]
    # (3,1) conv taps stacked into a single (3C, C) weight per DFM block
    w3 = jnp.stack([jnp.concatenate([dp["conv2_w"][:, :, k, 0].T for k in range(3)], axis=0)
                    for dp in dfms]).astype(bf16)                              # (N_DFM, 3C, C)
    b3 = jnp.stack([dp["conv2_b"] for dp in dfms])[:, None, :]
    wv_d = jnp.stack([dp["ma"]["wv_t"] for dp in dfms]).astype(bf16)           # (N_DFM, C, C)
    bv_d = jnp.stack([dp["ma"]["bv"] for dp in dfms])[:, None, :]
    # 1x1 conv4 per input-channel block with the DFM attention's W_o folded in
    w4 = [[dp["conv4_w"][:, i * C:(i + 1) * C, 0, 0].T for i in range(4)] for dp in dfms]
    wfold_d = jnp.stack([dfms[d]["ma"]["wo_t"] @ w4[d][i]
                         for d in range(len(dfms)) for i in range(4)]).astype(bf16)  # (4*N_DFM, C, C)
    cst_d = jnp.stack([sum(dfms[d]["ma"]["bo"] @ w4[d][i] for i in range(4)) + dfms[d]["conv4_b"]
                       for d in range(len(dfms))])[:, None, :]                 # (N_DFM, 1, C)
    wtail = params["tail_w"][:, :, 0, 0].T.astype(bf16)                        # (C, O)
    btail = params["tail_b"][None, :]
    return [wih, bih, whh, bhh, fcw, fcb,
            wv_top, bv_top, wfold_top, cst_top,
            w3, b3, wv_d, bv_d, wfold_d, cst_d, wtail, btail]


# ======================= forward (JAX glue around the fused kernel) =======================

def combined_forward(params, tokens, pdg, train=True, drop_key=None):
    mask = tokens != 0                                       # computed BEFORE the token drop
    if train:
        drop = jax.random.uniform(drop_key, tokens.shape) > 0.5
        tokens = tokens * drop.astype(tokens.dtype)          # matches torch: input * (rand > 0.5)

    # TransformerEncoder: embedding gather + mask stay in plain JAX glue.
    emb = jnp.take(params["emb"], tokens.reshape(B, -1), axis=0).reshape(B, L, T, E)
    emb = jnp.where(mask[..., None], emb, 0.0)               # masked_fill(mask == False, 0)
    x_emb = emb.reshape(B, L, T * E).astype(jnp.bfloat16)    # bf16 MXU operand (half the DMA bytes)
    pdg_cm = pdg.astype(jnp.bfloat16).reshape(B, 4 * L, L)   # channel-major pdg rows per batch

    out = combined_pallas(x_emb, pdg_cm, prep_weights(params))   # (B, L, O)

    # TODO(synk): DFMcnn's pooled classifier head (AdaptiveMaxPool2d -> Dropout -> fc -> print(r))
    # never feeds the returned tensor; the dead matmul and its print side effect are omitted.
    return jnp.transpose(out, (0, 2, 1))[..., None]          # back to torch NCHW (B, O, L, 1)


# ======================= deterministic parameter init =======================

def init_params(key):
    keys = iter(jax.random.split(key, 64))

    def nrm(shape, scale=0.1):
        return scale * jax.random.normal(next(keys), shape, dtype=jnp.float32)

    def init_ma(hidden, num_head):
        dim = hidden // num_head
        wv = jnp.concatenate([nrm((dim, hidden)) for _ in range(num_head)], axis=0)
        bv = jnp.concatenate([nrm((dim,)) for _ in range(num_head)], axis=0)
        wo, bo = nrm((hidden, hidden)), nrm((hidden,))
        return dict(wv_t=wv.T, bv=bv, wo_t=wo.T, bo=bo)

    p = {}
    p["emb"] = nrm((V, E), 1.0)
    p["gru"] = {d: dict(w_ih=nrm((3 * S, GRU_IN)), w_hh=nrm((3 * S, S)),
                        b_ih=nrm((3 * S,)), b_hh=nrm((3 * S,)))
                for d in ("fwd", "bwd")}
    p["enc_fc_w"], p["enc_fc_b"] = nrm((S, 2 * S)), nrm((S,))
    p["top_ma"] = init_ma(S, 4)                              # CombinedModel.multi_attention (4 heads)
    p["single_w"], p["single_b"] = nrm((C, 4, 1, S)), nrm((C,))
    p["dfms"] = [dict(conv2_w=nrm((C, C, 3, 1)), conv2_b=nrm((C,)),
                      conv4_w=nrm((C, 4 * C, 1, 1)), conv4_b=nrm((C,)),
                      ma=init_ma(C, 2))                      # DFM.multi_attention (2 heads)
                 for _ in range(N_DFM)]
    p["tail_w"], p["tail_b"] = nrm((O, C, 1, 1)), nrm((O,))
    # classifier-head params kept for structural parity (dead in the returned graph)
    p["head_fc_w"], p["head_fc_b"] = nrm((NCLASS, O)), nrm((NCLASS,))
    return p


# ======================= main =======================

if __name__ == "__main__":
    key = jax.random.PRNGKey(0)
    k_tok, k_pdg, k_drop, k_param = jax.random.split(key, 4)

    tokens = jax.random.randint(k_tok, (B, L, T), 0, V, dtype=jnp.int32)   # `input`
    pdg = jax.random.normal(k_pdg, (B, 4, L, L), dtype=jnp.float32)        # `pdg`
    params = init_params(k_param)

    fwd = jax.jit(combined_forward, static_argnames=("train",))
    out = fwd(params, tokens, pdg, train=True, drop_key=k_drop)
    out = jax.block_until_ready(out)
    assert out.shape == (B, O, L, 1) and out.dtype == jnp.float32
    assert bool(jnp.all(jnp.isfinite(out)))
    print("KERNEL_OK")
</pallas_src>

<mosaic_0001>
module attributes {stable_mosaic.version = 11 : i64} {
  func.func @_combined_kernel(%arg0: i32, %arg1: memref<1x8x128xbf16, #tpu.memory_space<vmem>>, %arg2: memref<1x32x8xbf16, #tpu.memory_space<vmem>>, %arg3: memref<128x192xbf16, #tpu.memory_space<vmem>>, %arg4: memref<1x192xf32, #tpu.memory_space<vmem>>, %arg5: memref<2x32x96xbf16, #tpu.memory_space<vmem>>, %arg6: memref<2x1x96xf32, #tpu.memory_space<vmem>>, %arg7: memref<2x32x32xbf16, #tpu.memory_space<vmem>>, %arg8: memref<1x32xf32, #tpu.memory_space<vmem>>, %arg9: memref<32x32xbf16, #tpu.memory_space<vmem>>, %arg10: memref<1x32xf32, #tpu.memory_space<vmem>>, %arg11: memref<4x32x16xbf16, #tpu.memory_space<vmem>>, %arg12: memref<1x16xf32, #tpu.memory_space<vmem>>, %arg13: memref<3x48x16xbf16, #tpu.memory_space<vmem>>, %arg14: memref<3x1x16xf32, #tpu.memory_space<vmem>>, %arg15: memref<3x16x16xbf16, #tpu.memory_space<vmem>>, %arg16: memref<3x1x16xf32, #tpu.memory_space<vmem>>, %arg17: memref<12x16x16xbf16, #tpu.memory_space<vmem>>, %arg18: memref<3x1x16xf32, #tpu.memory_space<vmem>>, %arg19: memref<16x32xbf16, #tpu.memory_space<vmem>>, %arg20: memref<1x32xf32, #tpu.memory_space<vmem>>, %arg21: memref<1x8x32xf32, #tpu.memory_space<vmem>>) attributes {dimension_semantics = [#tpu.dimension_semantics<parallel>], iteration_bounds = array<i64: 2>, scalar_prefetch = 0 : i64, scratch_operands = 0 : i64, tpu.core_type = #tpu.core_type<tc>, window_params = [{transform_indices = @transform_0, window_bounds = array<i64: 1, 8, 128>}, {transform_indices = @transform_1, window_bounds = array<i64: 1, 32, 8>}, {pipeline_mode = #tpu.pipeline_mode<synchronous>, transform_indices = @transform_2, window_bounds = array<i64: 128, 192>}, {pipeline_mode = #tpu.pipeline_mode<synchronous>, transform_indices = @transform_3, window_bounds = array<i64: 1, 192>}, {pipeline_mode = #tpu.pipeline_mode<synchronous>, transform_indices = @transform_4, window_bounds = array<i64: 2, 32, 96>}, {pipeline_mode = #tpu.pipeline_mode<synchronous>, transform_indices = @transform_5, window_bounds = array<i64: 2, 1, 96>}, {pipeline_mode = #tpu.pipeline_mode<synchronous>, transform_indices = @transform_6, window_bounds = array<i64: 2, 32, 32>}, {pipeline_mode = #tpu.pipeline_mode<synchronous>, transform_indices = @transform_7, window_bounds = array<i64: 1, 32>}, {pipeline_mode = #tpu.pipeline_mode<synchronous>, transform_indices = @transform_8, window_bounds = array<i64: 32, 32>}, {pipeline_mode = #tpu.pipeline_mode<synchronous>, transform_indices = @transform_9, window_bounds = array<i64: 1, 32>}, {pipeline_mode = #tpu.pipeline_mode<synchronous>, transform_indices = @transform_10, window_bounds = array<i64: 4, 32, 16>}, {pipeline_mode = #tpu.pipeline_mode<synchronous>, transform_indices = @transform_11, window_bounds = array<i64: 1, 16>}, {pipeline_mode = #tpu.pipeline_mode<synchronous>, transform_indices = @transform_12, window_bounds = array<i64: 3, 48, 16>}, {pipeline_mode = #tpu.pipeline_mode<synchronous>, transform_indices = @transform_13, window_bounds = array<i64: 3, 1, 16>}, {pipeline_mode = #tpu.pipeline_mode<synchronous>, transform_indices = @transform_14, window_bounds = array<i64: 3, 16, 16>}, {pipeline_mode = #tpu.pipeline_mode<synchronous>, transform_indices = @transform_15, window_bounds = array<i64: 3, 1, 16>}, {pipeline_mode = #tpu.pipeline_mode<synchronous>, transform_indices = @transform_16, window_bounds = array<i64: 12, 16, 16>}, {pipeline_mode = #tpu.pipeline_mode<synchronous>, transform_indices = @transform_17, window_bounds = array<i64: 3, 1, 16>}, {pipeline_mode = #tpu.pipeline_mode<synchronous>, transform_indices = @transform_18, window_bounds = array<i64: 16, 32>}, {pipeline_mode = #tpu.pipeline_mode<synchronous>, transform_indices = @transform_19, window_bounds = array<i64: 1, 32>}, {transform_indices = @transform_20, window_bounds = array<i64: 1, 8, 32>}]} {
    %c0 = arith.constant 0 : index
    %c0_0 = arith.constant 0 : index
    %c0_1 = arith.constant 0 : index
    %0 = vector.load %arg1[%c0, %c0_0, %c0_1] : memref<1x8x128xbf16, #tpu.memory_space<vmem>>, vector<1x8x128xbf16>
    %1 = vector.shape_cast %0 : vector<1x8x128xbf16> to vector<8x128xbf16>
    %c0_2 = arith.constant 0 : index
    %c0_3 = arith.constant 0 : index
    %2 = vector.load %arg3[%c0_2, %c0_3] : memref<128x192xbf16, #tpu.memory_space<vmem>>, vector<128x192xbf16>
    %cst = arith.constant dense<0.000000e+00> : vector<8x192xf32>
    %3 = tpu.matmul %1, %2, %cst {dimension_numbers = #tpu.dot_dimension_numbers<[1], [0], [0], [1], [0, 0, 1, 1], [], []>} : vector<8x128xbf16>, vector<128x192xbf16>, vector<8x192xf32> -> vector<8x192xf32>
    %c0_4 = arith.constant 0 : index
    %c0_5 = arith.constant 0 : index
    %4 = vector.load %arg4[%c0_4, %c0_5] : memref<1x192xf32, #tpu.memory_space<vmem>>, vector<1x192xf32>
    %5 = vector.broadcast %4 : vector<1x192xf32> to vector<8x192xf32>
    %6 = arith.addf %3, %5 : vector<8x192xf32>
    %c0_6 = arith.constant 0 : index
    %c0_7 = arith.constant 0 : index
    %c0_8 = arith.constant 0 : index
    %7 = vector.load %arg5[%c0_6, %c0_7, %c0_8] : memref<2x32x96xbf16, #tpu.memory_space<vmem>>, vector<1x32x96xbf16>
    %8 = vector.shape_cast %7 : vector<1x32x96xbf16> to vector<32x96xbf16>
    %c1 = arith.constant 1 : index
    %c0_9 = arith.constant 0 : index
    %c0_10 = arith.constant 0 : index
    %9 = vector.load %arg5[%c1, %c0_9, %c0_10] : memref<2x32x96xbf16, #tpu.memory_space<vmem>>, vector<1x32x96xbf16>
    %10 = vector.shape_cast %9 : vector<1x32x96xbf16> to vector<32x96xbf16>
    %c0_11 = arith.constant 0 : index
    %c0_12 = arith.constant 0 : index
    %c0_13 = arith.constant 0 : index
    %11 = vector.load %arg6[%c0_11, %c0_12, %c0_13] : memref<2x1x96xf32, #tpu.memory_space<vmem>>, vector<1x1x96xf32>
    %12 = vector.shape_cast %11 : vector<1x1x96xf32> to vector<1x96xf32>
    %c1_14 = arith.constant 1 : index
    %c0_15 = arith.constant 0 : index
    %c0_16 = arith.constant 0 : index
    %13 = vector.load %arg6[%c1_14, %c0_15, %c0_16] : memref<2x1x96xf32, #tpu.memory_space<vmem>>, vector<1x1x96xf32>
    %14 = vector.shape_cast %13 : vector<1x1x96xf32> to vector<1x96xf32>
    %cst_17 = arith.constant 0.000000e+00 : f32
    %15 = vector.broadcast %cst_17 : f32 to vector<1x32xf32>
    %cst_18 = arith.constant 0.000000e+00 : f32
    %16 = vector.broadcast %cst_18 : f32 to vector<1x32xf32>
    %17 = vector.extract_strided_slice %6 {offsets = [0, 0], sizes = [1, 96], strides = [1, 1]} : vector<8x192xf32> to vector<1x96xf32>
    %18 = arith.truncf %15 : vector<1x32xf32> to vector<1x32xbf16>
    %cst_19 = arith.constant dense<0.000000e+00> : vector<1x96xf32>
    %19 = tpu.matmul %18, %8, %cst_19 {dimension_numbers = #tpu.dot_dimension_numbers<[1], [0], [0], [1], [0, 0, 1, 1], [], []>} : vector<1x32xbf16>, vector<32x96xbf16>, vector<1x96xf32> -> vector<1x96xf32>
    %20 = arith.addf %19, %12 : vector<1x96xf32>
    %21 = vector.extract_strided_slice %17 {offsets = [0, 0], sizes = [1, 32], strides = [1, 1]} : vector<1x96xf32> to vector<1x32xf32>
    %22 = vector.extract_strided_slice %20 {offsets = [0, 0], sizes = [1, 32], strides = [1, 1]} : vector<1x96xf32> to vector<1x32xf32>
    %23 = arith.addf %21, %22 : vector<1x32xf32>
    %24 = arith.negf %23 : vector<1x32xf32>
    %25 = math.exp %24 : vector<1x32xf32>
    %cst_20 = arith.constant 1.000000e+00 : f32
    %26 = vector.broadcast %cst_20 : f32 to vector<1x32xf32>
    %27 = arith.addf %26, %25 : vector<1x32xf32>
    %28 = arith.divf %26, %27 : vector<1x32xf32>
    %29 = vector.extract_strided_slice %17 {offsets = [0, 32], sizes = [1, 32], strides = [1, 1]} : vector<1x96xf32> to vector<1x32xf32>
    %30 = vector.extract_strided_slice %20 {offsets = [0, 32], sizes = [1, 32], strides = [1, 1]} : vector<1x96xf32> to vector<1x32xf32>
    %31 = arith.addf %29, %30 : vector<1x32xf32>
    %32 = arith.negf %31 : vector<1x32xf32>
    %33 = math.exp %32 : vector<1x32xf32>
    %cst_21 = arith.constant 1.000000e+00 : f32
    %34 = vector.broadcast %cst_21 : f32 to vector<1x32xf32>
    %35 = arith.addf %34, %33 : vector<1x32xf32>
    %36 = arith.divf %34, %35 : vector<1x32xf32>
    %37 = vector.extract_strided_slice %17 {offsets = [0, 64], sizes = [1, 32], strides = [1, 1]} : vector<1x96xf32> to vector<1x32xf32>
    %38 = vector.extract_strided_slice %20 {offsets = [0, 64], sizes = [1, 32], strides = [1, 1]} : vector<1x96xf32> to vector<1x32xf32>
    %39 = arith.mulf %28, %38 : vector<1x32xf32>
    %40 = arith.addf %37, %39 : vector<1x32xf32>
    %41 = math.tanh %40 : vector<1x32xf32>
    %cst_22 = arith.constant 1.000000e+00 : f32
    %42 = vector.broadcast %cst_22 : f32 to vector<1x32xf32>
    %43 = arith.subf %42, %36 : vector<1x32xf32>
    %44 = arith.mulf %43, %41 : vector<1x32xf32>
    %45 = arith.mulf %36, %15 : vector<1x32xf32>
    %46 = arith.addf %44, %45 : vector<1x32xf32>
    %47 = vector.extract_strided_slice %6 {offsets = [7, 96], sizes = [1, 96], strides = [1, 1]} : vector<8x192xf32> to vector<1x96xf32>
    %48 = arith.truncf %16 : vector<1x32xf32> to vector<1x32xbf16>
    %cst_23 = arith.constant dense<0.000000e+00> : vector<1x96xf32>
    %49 = tpu.matmul %48, %10, %cst_23 {dimension_numbers = #tpu.dot_dimension_numbers<[1], [0], [0], [1], [0, 0, 1, 1], [], []>} : vector<1x32xbf16>, vector<32x96xbf16>, vector<1x96xf32> -> vector<1x96xf32>
    %50 = arith.addf %49, %14 : vector<1x96xf32>
    %51 = vector.extract_strided_slice %47 {offsets = [0, 0], sizes = [1, 32], strides = [1, 1]} : vector<1x96xf32> to vector<1x32xf32>
    %52 = vector.extract_strided_slice %50 {offsets = [0, 0], sizes = [1, 32], strides = [1, 1]} : vector<1x96xf32> to vector<1x32xf32>
    %53 = arith.addf %51, %52 : vector<1x32xf32>
    %54 = arith.negf %53 : vector<1x32xf32>
    %55 = math.exp %54 : vector<1x32xf32>
    %cst_24 = arith.constant 1.000000e+00 : f32
    %56 = vector.broadcast %cst_24 : f32 to vector<1x32xf32>
    %57 = arith.addf %56, %55 : vector<1x32xf32>
    %58 = arith.divf %56, %57 : vector<1x32xf32>
    %59 = vector.extract_strided_slice %47 {offsets = [0, 32], sizes = [1, 32], strides = [1, 1]} : vector<1x96xf32> to vector<1x32xf32>
    %60 = vector.extract_strided_slice %50 {offsets = [0, 32], sizes = [1, 32], strides = [1, 1]} : vector<1x96xf32> to vector<1x32xf32>
    %61 = arith.addf %59, %60 : vector<1x32xf32>
    %62 = arith.negf %61 : vector<1x32xf32>
    %63 = math.exp %62 : vector<1x32xf32>
    %cst_25 = arith.constant 1.000000e+00 : f32
    %64 = vector.broadcast %cst_25 : f32 to vector<1x32xf32>
    %65 = arith.addf %64, %63 : vector<1x32xf32>
    %66 = arith.divf %64, %65 : vector<1x32xf32>
    %67 = vector.extract_strided_slice %47 {offsets = [0, 64], sizes = [1, 32], strides = [1, 1]} : vector<1x96xf32> to vector<1x32xf32>
    %68 = vector.extract_strided_slice %50 {offsets = [0, 64], sizes = [1, 32], strides = [1, 1]} : vector<1x96xf32> to vector<1x32xf32>
    %69 = arith.mulf %58, %68 : vector<1x32xf32>
    %70 = arith.addf %67, %69 : vector<1x32xf32>
    %71 = math.tanh %70 : vector<1x32xf32>
    %cst_26 = arith.constant 1.000000e+00 : f32
    %72 = vector.broadcast %cst_26 : f32 to vector<1x32xf32>
    %73 = arith.subf %72, %66 : vector<1x32xf32>
    %74 = arith.mulf %73, %71 : vector<1x32xf32>
    %75 = arith.mulf %66, %16 : vector<1x32xf32>
    %76 = arith.addf %74, %75 : vector<1x32xf32>
    %77 = vector.extract_strided_slice %6 {offsets = [1, 0], sizes = [1, 96], strides = [1, 1]} : vector<8x192xf32> to vector<1x96xf32>
    %78 = arith.truncf %46 : vector<1x32xf32> to vector<1x32xbf16>
    %cst_27 = arith.constant dense<0.000000e+00> : vector<1x96xf32>
    %79 = tpu.matmul %78, %8, %cst_27 {dimension_numbers = #tpu.dot_dimension_numbers<[1], [0], [0], [1], [0, 0, 1, 1], [], []>} : vector<1x32xbf16>, vector<32x96xbf16>, vector<1x96xf32> -> vector<1x96xf32>
    %80 = arith.addf %79, %12 : vector<1x96xf32>
    %81 = vector.extract_strided_slice %77 {offsets = [0, 0], sizes = [1, 32], strides = [1, 1]} : vector<1x96xf32> to vector<1x32xf32>
    %82 = vector.extract_strided_slice %80 {offsets = [0, 0], sizes = [1, 32], strides = [1, 1]} : vector<1x96xf32> to vector<1x32xf32>
    %83 = arith.addf %81, %82 : vector<1x32xf32>
    %84 = arith.negf %83 : vector<1x32xf32>
    %85 = math.exp %84 : vector<1x32xf32>
    %cst_28 = arith.constant 1.000000e+00 : f32
    %86 = vector.broadcast %cst_28 : f32 to vector<1x32xf32>
    %87 = arith.addf %86, %85 : vector<1x32xf32>
    %88 = arith.divf %86, %87 : vector<1x32xf32>
    %89 = vector.extract_strided_slice %77 {offsets = [0, 32], sizes = [1, 32], strides = [1, 1]} : vector<1x96xf32> to vector<1x32xf32>
    %90 = vector.extract_strided_slice %80 {offsets = [0, 32], sizes = [1, 32], strides = [1, 1]} : vector<1x96xf32> to vector<1x32xf32>
    %91 = arith.addf %89, %90 : vector<1x32xf32>
    %92 = arith.negf %91 : vector<1x32xf32>
    %93 = math.exp %92 : vector<1x32xf32>
    %cst_29 = arith.constant 1.000000e+00 : f32
    %94 = vector.broadcast %cst_29 : f32 to vector<1x32xf32>
    %95 = arith.addf %94, %93 : vector<1x32xf32>
    %96 = arith.divf %94, %95 : vector<1x32xf32>
    %97 = vector.extract_strided_slice %77 {offsets = [0, 64], sizes = [1, 32], strides = [1, 1]} : vector<1x96xf32> to vector<1x32xf32>
    %98 = vector.extract_strided_slice %80 {offsets = [0, 64], sizes = [1, 32], strides = [1, 1]} : vector<1x96xf32> to vector<1x32xf32>
    %99 = arith.mulf %88, %98 : vector<1x32xf32>
    %100 = arith.addf %97, %99 : vector<1x32xf32>
    %101 = math.tanh %100 : vector<1x32xf32>
    %cst_30 = arith.constant 1.000000e+00 : f32
    %102 = vector.broadcast %cst_30 : f32 to vector<1x32xf32>
    %103 = arith.subf %102, %96 : vector<1x32xf32>
    %104 = arith.mulf %103, %101 : vector<1x32xf32>
    %105 = arith.mulf %96, %46 : vector<1x32xf32>
    %106 = arith.addf %104, %105 : vector<1x32xf32>
    %107 = vector.extract_strided_slice %6 {offsets = [6, 96], sizes = [1, 96], strides = [1, 1]} : vector<8x192xf32> to vector<1x96xf32>
    %108 = arith.truncf %76 : vector<1x32xf32> to vector<1x32xbf16>
    %cst_31 = arith.constant dense<0.000000e+00> : vector<1x96xf32>
    %109 = tpu.matmul %108, %10, %cst_31 {dimension_numbers = #tpu.dot_dimension_numbers<[1], [0], [0], [1], [0, 0, 1, 1], [], []>} : vector<1x32xbf16>, vector<32x96xbf16>, vector<1x96xf32> -> vector<1x96xf32>
    %110 = arith.addf %109, %14 : vector<1x96xf32>
    %111 = vector.extract_strided_slice %107 {offsets = [0, 0], sizes = [1, 32], strides = [1, 1]} : vector<1x96xf32> to vector<1x32xf32>
    %112 = vector.extract_strided_slice %110 {offsets = [0, 0], sizes = [1, 32], strides = [1, 1]} : vector<1x96xf32> to vector<1x32xf32>
    %113 = arith.addf %111, %112 : vector<1x32xf32>
    %114 = arith.negf %113 : vector<1x32xf32>
    %115 = math.exp %114 : vector<1x32xf32>
    %cst_32 = arith.constant 1.000000e+00 : f32
    %116 = vector.broadcast %cst_32 : f32 to vector<1x32xf32>
    %117 = arith.addf %116, %115 : vector<1x32xf32>
    %118 = arith.divf %116, %117 : vector<1x32xf32>
    %119 = vector.extract_strided_slice %107 {offsets = [0, 32], sizes = [1, 32], strides = [1, 1]} : vector<1x96xf32> to vector<1x32xf32>
    %120 = vector.extract_strided_slice %110 {offsets = [0, 32], sizes = [1, 32], strides = [1, 1]} : vector<1x96xf32> to vector<1x32xf32>
    %121 = arith.addf %119, %120 : vector<1x32xf32>
    %122 = arith.negf %121 : vector<1x32xf32>
    %123 = math.exp %122 : vector<1x32xf32>
    %cst_33 = arith.constant 1.000000e+00 : f32
    %124 = vector.broadcast %cst_33 : f32 to vector<1x32xf32>
    %125 = arith.addf %124, %123 : vector<1x32xf32>
    %126 = arith.divf %124, %125 : vector<1x32xf32>
    %127 = vector.extract_strided_slice %107 {offsets = [0, 64], sizes = [1, 32], strides = [1, 1]} : vector<1x96xf32> to vector<1x32xf32>
    %128 = vector.extract_strided_slice %110 {offsets = [0, 64], sizes = [1, 32], strides = [1, 1]} : vector<1x96xf32> to vector<1x32xf32>
    %129 = arith.mulf %118, %128 : vector<1x32xf32>
    %130 = arith.addf %127, %129 : vector<1x32xf32>
    %131 = math.tanh %130 : vector<1x32xf32>
    %cst_34 = arith.constant 1.000000e+00 : f32
    %132 = vector.broadcast %cst_34 : f32 to vector<1x32xf32>
    %133 = arith.subf %132, %126 : vector<1x32xf32>
    %134 = arith.mulf %133, %131 : vector<1x32xf32>
    %135 = arith.mulf %126, %76 : vector<1x32xf32>
    %136 = arith.addf %134, %135 : vector<1x32xf32>
    %137 = vector.extract_strided_slice %6 {offsets = [2, 0], sizes = [1, 96], strides = [1, 1]} : vector<8x192xf32> to vector<1x96xf32>
    %138 = arith.truncf %106 : vector<1x32xf32> to vector<1x32xbf16>
    %cst_35 = arith.constant dense<0.000000e+00> : vector<1x96xf32>
    %139 = tpu.matmul %138, %8, %cst_35 {dimension_numbers = #tpu.dot_dimension_numbers<[1], [0], [0], [1], [0, 0, 1, 1], [], []>} : vector<1x32xbf16>, vector<32x96xbf16>, vector<1x96xf32> -> vector<1x96xf32>
    %140 = arith.addf %139, %12 : vector<1x96xf32>
    %141 = vector.extract_strided_slice %137 {offsets = [0, 0], sizes = [1, 32], strides = [1, 1]} : vector<1x96xf32> to vector<1x32xf32>
    %142 = vector.extract_strided_slice %140 {offsets = [0, 0], sizes = [1, 32], strides = [1, 1]} : vector<1x96xf32> to vector<1x32xf32>
    %143 = arith.addf %141, %142 : vector<1x32xf32>
    %144 = arith.negf %143 : vector<1x32xf32>
    %145 = math.exp %144 : vector<1x32xf32>
    %cst_36 = arith.constant 1.000000e+00 : f32
    %146 = vector.broadcast %cst_36 : f32 to vector<1x32xf32>
    %147 = arith.addf %146, %145 : vector<1x32xf32>
    %148 = arith.divf %146, %147 : vector<1x32xf32>
    %149 = vector.extract_strided_slice %137 {offsets = [0, 32], sizes = [1, 32], strides = [1, 1]} : vector<1x96xf32> to vector<1x32xf32>
    %150 = vector.extract_strided_slice %140 {offsets = [0, 32], sizes = [1, 32], strides = [1, 1]} : vector<1x96xf32> to vector<1x32xf32>
    %151 = arith.addf %149, %150 : vector<1x32xf32>
    %152 = arith.negf %151 : vector<1x32xf32>
    %153 = math.exp %152 : vector<1x32xf32>
    %cst_37 = arith.constant 1.000000e+00 : f32
    %154 = vector.broadcast %cst_37 : f32 to vector<1x32xf32>
    %155 = arith.addf %154, %153 : vector<1x32xf32>
    %156 = arith.divf %154, %155 : vector<1x32xf32>
    %157 = vector.extract_strided_slice %137 {offsets = [0, 64], sizes = [1, 32], strides = [1, 1]} : vector<1x96xf32> to vector<1x32xf32>
    %158 = vector.extract_strided_slice %140 {offsets = [0, 64], sizes = [1, 32], strides = [1, 1]} : vector<1x96xf32> to vector<1x32xf32>
    %159 = arith.mulf %148, %158 : vector<1x32xf32>
    %160 = arith.addf %157, %159 : vector<1x32xf32>
    %161 = math.tanh %160 : vector<1x32xf32>
    %cst_38 = arith.constant 1.000000e+00 : f32
    %162 = vector.broadcast %cst_38 : f32 to vector<1x32xf32>
    %163 = arith.subf %162, %156 : vector<1x32xf32>
    %164 = arith.mulf %163, %161 : vector<1x32xf32>
    %165 = arith.mulf %156, %106 : vector<1x32xf32>
    %166 = arith.addf %164, %165 : vector<1x32xf32>
    %167 = vector.extract_strided_slice %6 {offsets = [5, 96], sizes = [1, 96], strides = [1, 1]} : vector<8x192xf32> to vector<1x96xf32>
    %168 = arith.truncf %136 : vector<1x32xf32> to vector<1x32xbf16>
    %cst_39 = arith.constant dense<0.000000e+00> : vector<1x96xf32>
    %169 = tpu.matmul %168, %10, %cst_39 {dimension_numbers = #tpu.dot_dimension_numbers<[1], [0], [0], [1], [0, 0, 1, 1], [], []>} : vector<1x32xbf16>, vector<32x96xbf16>, vector<1x96xf32> -> vector<1x96xf32>
    %170 = arith.addf %169, %14 : vector<1x96xf32>
    %171 = vector.extract_strided_slice %167 {offsets = [0, 0], sizes = [1, 32], strides = [1, 1]} : vector<1x96xf32> to vector<1x32xf32>
    %172 = vector.extract_strided_slice %170 {offsets = [0, 0], sizes = [1, 32], strides = [1, 1]} : vector<1x96xf32> to vector<1x32xf32>
    %173 = arith.addf %171, %172 : vector<1x32xf32>
    %174 = arith.negf %173 : vector<1x32xf32>
    %175 = math.exp %174 : vector<1x32xf32>
    %cst_40 = arith.constant 1.000000e+00 : f32
    %176 = vector.broadcast %cst_40 : f32 to vector<1x32xf32>
    %177 = arith.addf %176, %175 : vector<1x32xf32>
    %178 = arith.divf %176, %177 : vector<1x32xf32>
    %179 = vector.extract_strided_slice %167 {offsets = [0, 32], sizes = [1, 32], strides = [1, 1]} : vector<1x96xf32> to vector<1x32xf32>
    %180 = vector.extract_strided_slice %170 {offsets = [0, 32], sizes = [1, 32], strides = [1, 1]} : vector<1x96xf32> to vector<1x32xf32>
    %181 = arith.addf %179, %180 : vector<1x32xf32>
    %182 = arith.negf %181 : vector<1x32xf32>
    %183 = math.exp %182 : vector<1x32xf32>
    %cst_41 = arith.constant 1.000000e+00 : f32
    %184 = vector.broadcast %cst_41 : f32 to vector<1x32xf32>
    %185 = arith.addf %184, %183 : vector<1x32xf32>
    %186 = arith.divf %184, %185 : vector<1x32xf32>
    %187 = vector.extract_strided_slice %167 {offsets = [0, 64], sizes = [1, 32], strides = [1, 1]} : vector<1x96xf32> to vector<1x32xf32>
    %188 = vector.extract_strided_slice %170 {offsets = [0, 64], sizes = [1, 32], strides = [1, 1]} : vector<1x96xf32> to vector<1x32xf32>
    %189 = arith.mulf %178, %188 : vector<1x32xf32>
    %190 = arith.addf %187, %189 : vector<1x32xf32>
    %191 = math.tanh %190 : vector<1x32xf32>
    %cst_42 = arith.constant 1.000000e+00 : f32
    %192 = vector.broadcast %cst_42 : f32 to vector<1x32xf32>
    %193 = arith.subf %192, %186 : vector<1x32xf32>
    %194 = arith.mulf %193, %191 : vector<1x32xf32>
    %195 = arith.mulf %186, %136 : vector<1x32xf32>
    %196 = arith.addf %194, %195 : vector<1x32xf32>
    %197 = vector.extract_strided_slice %6 {offsets = [3, 0], sizes = [1, 96], strides = [1, 1]} : vector<8x192xf32> to vector<1x96xf32>
    %198 = arith.truncf %166 : vector<1x32xf32> to vector<1x32xbf16>
    %cst_43 = arith.constant dense<0.000000e+00> : vector<1x96xf32>
    %199 = tpu.matmul %198, %8, %cst_43 {dimension_numbers = #tpu.dot_dimension_numbers<[1], [0], [0], [1], [0, 0, 1, 1], [], []>} : vector<1x32xbf16>, vector<32x96xbf16>, vector<1x96xf32> -> vector<1x96xf32>
    %200 = arith.addf %199, %12 : vector<1x96xf32>
    %201 = vector.extract_strided_slice %197 {offsets = [0, 0], sizes = [1, 32], strides = [1, 1]} : vector<1x96xf32> to vector<1x32xf32>
    %202 = vector.extract_strided_slice %200 {offsets = [0, 0], sizes = [1, 32], strides = [1, 1]} : vector<1x96xf32> to vector<1x32xf32>
    %203 = arith.addf %201, %202 : vector<1x32xf32>
    %204 = arith.negf %203 : vector<1x32xf32>
    %205 = math.exp %204 : vector<1x32xf32>
    %cst_44 = arith.constant 1.000000e+00 : f32
    %206 = vector.broadcast %cst_44 : f32 to vector<1x32xf32>
    %207 = arith.addf %206, %205 : vector<1x32xf32>
    %208 = arith.divf %206, %207 : vector<1x32xf32>
    %209 = vector.extract_strided_slice %197 {offsets = [0, 32], sizes = [1, 32], strides = [1, 1]} : vector<1x96xf32> to vector<1x32xf32>
    %210 = vector.extract_strided_slice %200 {offsets = [0, 32], sizes = [1, 32], strides = [1, 1]} : vector<1x96xf32> to vector<1x32xf32>
    %211 = arith.addf %209, %210 : vector<1x32xf32>
    %212 = arith.negf %211 : vector<1x32xf32>
    %213 = math.exp %212 : vector<1x32xf32>
    %cst_45 = arith.constant 1.000000e+00 : f32
    %214 = vector.broadcast %cst_45 : f32 to vector<1x32xf32>
    %215 = arith.addf %214, %213 : vector<1x32xf32>
    %216 = arith.divf %214, %215 : vector<1x32xf32>
    %217 = vector.extract_strided_slice %197 {offsets = [0, 64], sizes = [1, 32], strides = [1, 1]} : vector<1x96xf32> to vector<1x32xf32>
    %218 = vector.extract_strided_slice %200 {offsets = [0, 64], sizes = [1, 32], strides = [1, 1]} : vector<1x96xf32> to vector<1x32xf32>
    %219 = arith.mulf %208, %218 : vector<1x32xf32>
    %220 = arith.addf %217, %219 : vector<1x32xf32>
    %221 = math.tanh %220 : vector<1x32xf32>
    %cst_46 = arith.constant 1.000000e+00 : f32
    %222 = vector.broadcast %cst_46 : f32 to vector<1x32xf32>
    %223 = arith.subf %222, %216 : vector<1x32xf32>
    %224 = arith.mulf %223, %221 : vector<1x32xf32>
    %225 = arith.mulf %216, %166 : vector<1x32xf32>
    %226 = arith.addf %224, %225 : vector<1x32xf32>
    %227 = vector.extract_strided_slice %6 {offsets = [4, 96], sizes = [1, 96], strides = [1, 1]} : vector<8x192xf32> to vector<1x96xf32>
    %228 = arith.truncf %196 : vector<1x32xf32> to vector<1x32xbf16>
    %cst_47 = arith.constant dense<0.000000e+00> : vector<1x96xf32>
    %229 = tpu.matmul %228, %10, %cst_47 {dimension_numbers = #tpu.dot_dimension_numbers<[1], [0], [0], [1], [0, 0, 1, 1], [], []>} : vector<1x32xbf16>, vector<32x96xbf16>, vector<1x96xf32> -> vector<1x96xf32>
    %230 = arith.addf %229, %14 : vector<1x96xf32>
    %231 = vector.extract_strided_slice %227 {offsets = [0, 0], sizes = [1, 32], strides = [1, 1]} : vector<1x96xf32> to vector<1x32xf32>
    %232 = vector.extract_strided_slice %230 {offsets = [0, 0], sizes = [1, 32], strides = [1, 1]} : vector<1x96xf32> to vector<1x32xf32>
    %233 = arith.addf %231, %232 : vector<1x32xf32>
    %234 = arith.negf %233 : vector<1x32xf32>
    %235 = math.exp %234 : vector<1x32xf32>
    %cst_48 = arith.constant 1.000000e+00 : f32
    %236 = vector.broadcast %cst_48 : f32 to vector<1x32xf32>
    %237 = arith.addf %236, %235 : vector<1x32xf32>
    %238 = arith.divf %236, %237 : vector<1x32xf32>
    %239 = vector.extract_strided_slice %227 {offsets = [0, 32], sizes = [1, 32], strides = [1, 1]} : vector<1x96xf32> to vector<1x32xf32>
    %240 = vector.extract_strided_slice %230 {offsets = [0, 32], sizes = [1, 32], strides = [1, 1]} : vector<1x96xf32> to vector<1x32xf32>
    %241 = arith.addf %239, %240 : vector<1x32xf32>
    %242 = arith.negf %241 : vector<1x32xf32>
    %243 = math.exp %242 : vector<1x32xf32>
    %cst_49 = arith.constant 1.000000e+00 : f32
    %244 = vector.broadcast %cst_49 : f32 to vector<1x32xf32>
    %245 = arith.addf %244, %243 : vector<1x32xf32>
    %246 = arith.divf %244, %245 : vector<1x32xf32>
    %247 = vector.extract_strided_slice %227 {offsets = [0, 64], sizes = [1, 32], strides = [1, 1]} : vector<1x96xf32> to vector<1x32xf32>
    %248 = vector.extract_strided_slice %230 {offsets = [0, 64], sizes = [1, 32], strides = [1, 1]} : vector<1x96xf32> to vector<1x32xf32>
    %249 = arith.mulf %238, %248 : vector<1x32xf32>
    %250 = arith.addf %247, %249 : vector<1x32xf32>
    %251 = math.tanh %250 : vector<1x32xf32>
    %cst_50 = arith.constant 1.000000e+00 : f32
    %252 = vector.broadcast %cst_50 : f32 to vector<1x32xf32>
    %253 = arith.subf %252, %246 : vector<1x32xf32>
    %254 = arith.mulf %253, %251 : vector<1x32xf32>
    %255 = arith.mulf %246, %196 : vector<1x32xf32>
    %256 = arith.addf %254, %255 : vector<1x32xf32>
    %257 = vector.extract_strided_slice %6 {offsets = [4, 0], sizes = [1, 96], strides = [1, 1]} : vector<8x192xf32> to vector<1x96xf32>
    %258 = arith.truncf %226 : vector<1x32xf32> to vector<1x32xbf16>
    %cst_51 = arith.constant dense<0.000000e+00> : vector<1x96xf32>
    %259 = tpu.matmul %258, %8, %cst_51 {dimension_numbers = #tpu.dot_dimension_numbers<[1], [0], [0], [1], [0, 0, 1, 1], [], []>} : vector<1x32xbf16>, vector<32x96xbf16>, vector<1x96xf32> -> vector<1x96xf32>
    %260 = arith.addf %259, %12 : vector<1x96xf32>
    %261 = vector.extract_strided_slice %257 {offsets = [0, 0], sizes = [1, 32], strides = [1, 1]} : vector<1x96xf32> to vector<1x32xf32>
    %262 = vector.extract_strided_slice %260 {offsets = [0, 0], sizes = [1, 32], strides = [1, 1]} : vector<1x96xf32> to vector<1x32xf32>
    %263 = arith.addf %261, %262 : vector<1x32xf32>
    %264 = arith.negf %263 : vector<1x32xf32>
    %265 = math.exp %264 : vector<1x32xf32>
    %cst_52 = arith.constant 1.000000e+00 : f32
    %266 = vector.broadcast %cst_52 : f32 to vector<1x32xf32>
    %267 = arith.addf %266, %265 : vector<1x32xf32>
    %268 = arith.divf %266, %267 : vector<1x32xf32>
    %269 = vector.extract_strided_slice %257 {offsets = [0, 32], sizes = [1, 32], strides = [1, 1]} : vector<1x96xf32> to vector<1x32xf32>
    %270 = vector.extract_strided_slice %260 {offsets = [0, 32], sizes = [1, 32], strides = [1, 1]} : vector<1x96xf32> to vector<1x32xf32>
    %271 = arith.addf %269, %270 : vector<1x32xf32>
    %272 = arith.negf %271 : vector<1x32xf32>
    %273 = math.exp %272 : vector<1x32xf32>
    %cst_53 = arith.constant 1.000000e+00 : f32
    %274 = vector.broadcast %cst_53 : f32 to vector<1x32xf32>
    %275 = arith.addf %274, %273 : vector<1x32xf32>
    %276 = arith.divf %274, %275 : vector<1x32xf32>
    %277 = vector.extract_strided_slice %257 {offsets = [0, 64], sizes = [1, 32], strides = [1, 1]} : vector<1x96xf32> to vector<1x32xf32>
    %278 = vector.extract_strided_slice %260 {offsets = [0, 64], sizes = [1, 32], strides = [1, 1]} : vector<1x96xf32> to vector<1x32xf32>
    %279 = arith.mulf %268, %278 : vector<1x32xf32>
    %280 = arith.addf %277, %279 : vector<1x32xf32>
    %281 = math.tanh %280 : vector<1x32xf32>
    %cst_54 = arith.constant 1.000000e+00 : f32
    %282 = vector.broadcast %cst_54 : f32 to vector<1x32xf32>
    %283 = arith.subf %282, %276 : vector<1x32xf32>
    %284 = arith.mulf %283, %281 : vector<1x32xf32>
    %285 = arith.mulf %276, %226 : vector<1x32xf32>
    %286 = arith.addf %284, %285 : vector<1x32xf32>
    %287 = vector.extract_strided_slice %6 {offsets = [3, 96], sizes = [1, 96], strides = [1, 1]} : vector<8x192xf32> to vector<1x96xf32>
    %288 = arith.truncf %256 : vector<1x32xf32> to vector<1x32xbf16>
    %cst_55 = arith.constant dense<0.000000e+00> : vector<1x96xf32>
    %289 = tpu.matmul %288, %10, %cst_55 {dimension_numbers = #tpu.dot_dimension_numbers<[1], [0], [0], [1], [0, 0, 1, 1], [], []>} : vector<1x32xbf16>, vector<32x96xbf16>, vector<1x96xf32> -> vector<1x96xf32>
    %290 = arith.addf %289, %14 : vector<1x96xf32>
    %291 = vector.extract_strided_slice %287 {offsets = [0, 0], sizes = [1, 32], strides = [1, 1]} : vector<1x96xf32> to vector<1x32xf32>
    %292 = vector.extract_strided_slice %290 {offsets = [0, 0], sizes = [1, 32], strides = [1, 1]} : vector<1x96xf32> to vector<1x32xf32>
    %293 = arith.addf %291, %292 : vector<1x32xf32>
    %294 = arith.negf %293 : vector<1x32xf32>
    %295 = math.exp %294 : vector<1x32xf32>
    %cst_56 = arith.constant 1.000000e+00 : f32
    %296 = vector.broadcast %cst_56 : f32 to vector<1x32xf32>
    %297 = arith.addf %296, %295 : vector<1x32xf32>
    %298 = arith.divf %296, %297 : vector<1x32xf32>
    %299 = vector.extract_strided_slice %287 {offsets = [0, 32], sizes = [1, 32], strides = [1, 1]} : vector<1x96xf32> to vector<1x32xf32>
    %300 = vector.extract_strided_slice %290 {offsets = [0, 32], sizes = [1, 32], strides = [1, 1]} : vector<1x96xf32> to vector<1x32xf32>
    %301 = arith.addf %299, %300 : vector<1x32xf32>
    %302 = arith.negf %301 : vector<1x32xf32>
    %303 = math.exp %302 : vector<1x32xf32>
    %cst_57 = arith.constant 1.000000e+00 : f32
    %304 = vector.broadcast %cst_57 : f32 to vector<1x32xf32>
    %305 = arith.addf %304, %303 : vector<1x32xf32>
    %306 = arith.divf %304, %305 : vector<1x32xf32>
    %307 = vector.extract_strided_slice %287 {offsets = [0, 64], sizes = [1, 32], strides = [1, 1]} : vector<1x96xf32> to vector<1x32xf32>
    %308 = vector.extract_strided_slice %290 {offsets = [0, 64], sizes = [1, 32], strides = [1, 1]} : vector<1x96xf32> to vector<1x32xf32>
    %309 = arith.mulf %298, %308 : vector<1x32xf32>
    %310 = arith.addf %307, %309 : vector<1x32xf32>
    %311 = math.tanh %310 : vector<1x32xf32>
    %cst_58 = arith.constant 1.000000e+00 : f32
    %312 = vector.broadcast %cst_58 : f32 to vector<1x32xf32>
    %313 = arith.subf %312, %306 : vector<1x32xf32>
    %314 = arith.mulf %313, %311 : vector<1x32xf32>
    %315 = arith.mulf %306, %256 : vector<1x32xf32>
    %316 = arith.addf %314, %315 : vector<1x32xf32>
    %317 = vector.extract_strided_slice %6 {offsets = [5, 0], sizes = [1, 96], strides = [1, 1]} : vector<8x192xf32> to vector<1x96xf32>
    %318 = arith.truncf %286 : vector<1x32xf32> to vector<1x32xbf16>
    %cst_59 = arith.constant dense<0.000000e+00> : vector<1x96xf32>
    %319 = tpu.matmul %318, %8, %cst_59 {dimension_numbers = #tpu.dot_dimension_numbers<[1], [0], [0], [1], [0, 0, 1, 1], [], []>} : vector<1x32xbf16>, vector<32x96xbf16>, vector<1x96xf32> -> vector<1x96xf32>
    %320 = arith.addf %319, %12 : vector<1x96xf32>
    %321 = vector.extract_strided_slice %317 {offsets = [0, 0], sizes = [1, 32], strides = [1, 1]} : vector<1x96xf32> to vector<1x32xf32>
    %322 = vector.extract_strided_slice %320 {offsets = [0, 0], sizes = [1, 32], strides = [1, 1]} : vector<1x96xf32> to vector<1x32xf32>
    %323 = arith.addf %321, %322 : vector<1x32xf32>
    %324 = arith.negf %323 : vector<1x32xf32>
    %325 = math.exp %324 : vector<1x32xf32>
    %cst_60 = arith.constant 1.000000e+00 : f32
    %326 = vector.broadcast %cst_60 : f32 to vector<1x32xf32>
    %327 = arith.addf %326, %325 : vector<1x32xf32>
    %328 = arith.divf %326, %327 : vector<1x32xf32>
    %329 = vector.extract_strided_slice %317 {offsets = [0, 32], sizes = [1, 32], strides = [1, 1]} : vector<1x96xf32> to vector<1x32xf32>
    %330 = vector.extract_strided_slice %320 {offsets = [0, 32], sizes = [1, 32], strides = [1, 1]} : vector<1x96xf32> to vector<1x32xf32>
    %331 = arith.addf %329, %330 : vector<1x32xf32>
    %332 = arith.negf %331 : vector<1x32xf32>
    %333 = math.exp %332 : vector<1x32xf32>
    %cst_61 = arith.constant 1.000000e+00 : f32
    %334 = vector.broadcast %cst_61 : f32 to vector<1x32xf32>
    %335 = arith.addf %334, %333 : vector<1x32xf32>
    %336 = arith.divf %334, %335 : vector<1x32xf32>
    %337 = vector.extract_strided_slice %317 {offsets = [0, 64], sizes = [1, 32], strides = [1, 1]} : vector<1x96xf32> to vector<1x32xf32>
    %338 = vector.extract_strided_slice %320 {offsets = [0, 64], sizes = [1, 32], strides = [1, 1]} : vector<1x96xf32> to vector<1x32xf32>
    %339 = arith.mulf %328, %338 : vector<1x32xf32>
    %340 = arith.addf %337, %339 : vector<1x32xf32>
    %341 = math.tanh %340 : vector<1x32xf32>
    %cst_62 = arith.constant 1.000000e+00 : f32
    %342 = vector.broadcast %cst_62 : f32 to vector<1x32xf32>
    %343 = arith.subf %342, %336 : vector<1x32xf32>
    %344 = arith.mulf %343, %341 : vector<1x32xf32>
    %345 = arith.mulf %336, %286 : vector<1x32xf32>
    %346 = arith.addf %344, %345 : vector<1x32xf32>
    %347 = vector.extract_strided_slice %6 {offsets = [2, 96], sizes = [1, 96], strides = [1, 1]} : vector<8x192xf32> to vector<1x96xf32>
    %348 = arith.truncf %316 : vector<1x32xf32> to vector<1x32xbf16>
    %cst_63 = arith.constant dense<0.000000e+00> : vector<1x96xf32>
    %349 = tpu.matmul %348, %10, %cst_63 {dimension_numbers = #tpu.dot_dimension_numbers<[1], [0], [0], [1], [0, 0, 1, 1], [], []>} : vector<1x32xbf16>, vector<32x96xbf16>, vector<1x96xf32> -> vector<1x96xf32>
    %350 = arith.addf %349, %14 : vector<1x96xf32>
    %351 = vector.extract_strided_slice %347 {offsets = [0, 0], sizes = [1, 32], strides = [1, 1]} : vector<1x96xf32> to vector<1x32xf32>
    %352 = vector.extract_strided_slice %350 {offsets = [0, 0], sizes = [1, 32], strides = [1, 1]} : vector<1x96xf32> to vector<1x32xf32>
    %353 = arith.addf %351, %352 : vector<1x32xf32>
    %354 = arith.negf %353 : vector<1x32xf32>
    %355 = math.exp %354 : vector<1x32xf32>
    %cst_64 = arith.constant 1.000000e+00 : f32
    %356 = vector.broadcast %cst_64 : f32 to vector<1x32xf32>
    %357 = arith.addf %356, %355 : vector<1x32xf32>
    %358 = arith.divf %356, %357 : vector<1x32xf32>
    %359 = vector.extract_strided_slice %347 {offsets = [0, 32], sizes = [1, 32], strides = [1, 1]} : vector<1x96xf32> to vector<1x32xf32>
    %360 = vector.extract_strided_slice %350 {offsets = [0, 32], sizes = [1, 32], strides = [1, 1]} : vector<1x96xf32> to vector<1x32xf32>
    %361 = arith.addf %359, %360 : vector<1x32xf32>
    %362 = arith.negf %361 : vector<1x32xf32>
    %363 = math.exp %362 : vector<1x32xf32>
    %cst_65 = arith.constant 1.000000e+00 : f32
    %364 = vector.broadcast %cst_65 : f32 to vector<1x32xf32>
    %365 = arith.addf %364, %363 : vector<1x32xf32>
    %366 = arith.divf %364, %365 : vector<1x32xf32>
    %367 = vector.extract_strided_slice %347 {offsets = [0, 64], sizes = [1, 32], strides = [1, 1]} : vector<1x96xf32> to vector<1x32xf32>
    %368 = vector.extract_strided_slice %350 {offsets = [0, 64], sizes = [1, 32], strides = [1, 1]} : vector<1x96xf32> to vector<1x32xf32>
    %369 = arith.mulf %358, %368 : vector<1x32xf32>
    %370 = arith.addf %367, %369 : vector<1x32xf32>
    %371 = math.tanh %370 : vector<1x32xf32>
    %cst_66 = arith.constant 1.000000e+00 : f32
    %372 = vector.broadcast %cst_66 : f32 to vector<1x32xf32>
    %373 = arith.subf %372, %366 : vector<1x32xf32>
    %374 = arith.mulf %373, %371 : vector<1x32xf32>
    %375 = arith.mulf %366, %316 : vector<1x32xf32>
    %376 = arith.addf %374, %375 : vector<1x32xf32>
    %377 = vector.extract_strided_slice %6 {offsets = [6, 0], sizes = [1, 96], strides = [1, 1]} : vector<8x192xf32> to vector<1x96xf32>
    %378 = arith.truncf %346 : vector<1x32xf32> to vector<1x32xbf16>
    %cst_67 = arith.constant dense<0.000000e+00> : vector<1x96xf32>
    %379 = tpu.matmul %378, %8, %cst_67 {dimension_numbers = #tpu.dot_dimension_numbers<[1], [0], [0], [1], [0, 0, 1, 1], [], []>} : vector<1x32xbf16>, vector<32x96xbf16>, vector<1x96xf32> -> vector<1x96xf32>
    %380 = arith.addf %379, %12 : vector<1x96xf32>
    %381 = vector.extract_strided_slice %377 {offsets = [0, 0], sizes = [1, 32], strides = [1, 1]} : vector<1x96xf32> to vector<1x32xf32>
    %382 = vector.extract_strided_slice %380 {offsets = [0, 0], sizes = [1, 32], strides = [1, 1]} : vector<1x96xf32> to vector<1x32xf32>
    %383 = arith.addf %381, %382 : vector<1x32xf32>
    %384 = arith.negf %383 : vector<1x32xf32>
    %385 = math.exp %384 : vector<1x32xf32>
    %cst_68 = arith.constant 1.000000e+00 : f32
    %386 = vector.broadcast %cst_68 : f32 to vector<1x32xf32>
    %387 = arith.addf %386, %385 : vector<1x32xf32>
    %388 = arith.divf %386, %387 : vector<1x32xf32>
    %389 = vector.extract_strided_slice %377 {offsets = [0, 32], sizes = [1, 32], strides = [1, 1]} : vector<1x96xf32> to vector<1x32xf32>
    %390 = vector.extract_strided_slice %380 {offsets = [0, 32], sizes = [1, 32], strides = [1, 1]} : vector<1x96xf32> to vector<1x32xf32>
    %391 = arith.addf %389, %390 : vector<1x32xf32>
    %392 = arith.negf %391 : vector<1x32xf32>
    %393 = math.exp %392 : vector<1x32xf32>
    %cst_69 = arith.constant 1.000000e+00 : f32
    %394 = vector.broadcast %cst_69 : f32 to vector<1x32xf32>
    %395 = arith.addf %394, %393 : vector<1x32xf32>
    %396 = arith.divf %394, %395 : vector<1x32xf32>
    %397 = vector.extract_strided_slice %377 {offsets = [0, 64], sizes = [1, 32], strides = [1, 1]} : vector<1x96xf32> to vector<1x32xf32>
    %398 = vector.extract_strided_slice %380 {offsets = [0, 64], sizes = [1, 32], strides = [1, 1]} : vector<1x96xf32> to vector<1x32xf32>
    %399 = arith.mulf %388, %398 : vector<1x32xf32>
    %400 = arith.addf %397, %399 : vector<1x32xf32>
    %401 = math.tanh %400 : vector<1x32xf32>
    %cst_70 = arith.constant 1.000000e+00 : f32
    %402 = vector.broadcast %cst_70 : f32 to vector<1x32xf32>
    %403 = arith.subf %402, %396 : vector<1x32xf32>
    %404 = arith.mulf %403, %401 : vector<1x32xf32>
    %405 = arith.mulf %396, %346 : vector<1x32xf32>
    %406 = arith.addf %404, %405 : vector<1x32xf32>
    %407 = vector.extract_strided_slice %6 {offsets = [1, 96], sizes = [1, 96], strides = [1, 1]} : vector<8x192xf32> to vector<1x96xf32>
    %408 = arith.truncf %376 : vector<1x32xf32> to vector<1x32xbf16>
    %cst_71 = arith.constant dense<0.000000e+00> : vector<1x96xf32>
    %409 = tpu.matmul %408, %10, %cst_71 {dimension_numbers = #tpu.dot_dimension_numbers<[1], [0], [0], [1], [0, 0, 1, 1], [], []>} : vector<1x32xbf16>, vector<32x96xbf16>, vector<1x96xf32> -> vector<1x96xf32>
    %410 = arith.addf %409, %14 : vector<1x96xf32>
    %411 = vector.extract_strided_slice %407 {offsets = [0, 0], sizes = [1, 32], strides = [1, 1]} : vector<1x96xf32> to vector<1x32xf32>
    %412 = vector.extract_strided_slice %410 {offsets = [0, 0], sizes = [1, 32], strides = [1, 1]} : vector<1x96xf32> to vector<1x32xf32>
    %413 = arith.addf %411, %412 : vector<1x32xf32>
    %414 = arith.negf %413 : vector<1x32xf32>
    %415 = math.exp %414 : vector<1x32xf32>
    %cst_72 = arith.constant 1.000000e+00 : f32
    %416 = vector.broadcast %cst_72 : f32 to vector<1x32xf32>
    %417 = arith.addf %416, %415 : vector<1x32xf32>
    %418 = arith.divf %416, %417 : vector<1x32xf32>
    %419 = vector.extract_strided_slice %407 {offsets = [0, 32], sizes = [1, 32], strides = [1, 1]} : vector<1x96xf32> to vector<1x32xf32>
    %420 = vector.extract_strided_slice %410 {offsets = [0, 32], sizes = [1, 32], strides = [1, 1]} : vector<1x96xf32> to vector<1x32xf32>
    %421 = arith.addf %419, %420 : vector<1x32xf32>
    %422 = arith.negf %421 : vector<1x32xf32>
    %423 = math.exp %422 : vector<1x32xf32>
    %cst_73 = arith.constant 1.000000e+00 : f32
    %424 = vector.broadcast %cst_73 : f32 to vector<1x32xf32>
    %425 = arith.addf %424, %423 : vector<1x32xf32>
    %426 = arith.divf %424, %425 : vector<1x32xf32>
    %427 = vector.extract_strided_slice %407 {offsets = [0, 64], sizes = [1, 32], strides = [1, 1]} : vector<1x96xf32> to vector<1x32xf32>
    %428 = vector.extract_strided_slice %410 {offsets = [0, 64], sizes = [1, 32], strides = [1, 1]} : vector<1x96xf32> to vector<1x32xf32>
    %429 = arith.mulf %418, %428 : vector<1x32xf32>
    %430 = arith.addf %427, %429 : vector<1x32xf32>
    %431 = math.tanh %430 : vector<1x32xf32>
    %cst_74 = arith.constant 1.000000e+00 : f32
    %432 = vector.broadcast %cst_74 : f32 to vector<1x32xf32>
    %433 = arith.subf %432, %426 : vector<1x32xf32>
    %434 = arith.mulf %433, %431 : vector<1x32xf32>
    %435 = arith.mulf %426, %376 : vector<1x32xf32>
    %436 = arith.addf %434, %435 : vector<1x32xf32>
    %437 = vector.extract_strided_slice %6 {offsets = [7, 0], sizes = [1, 96], strides = [1, 1]} : vector<8x192xf32> to vector<1x96xf32>
    %438 = arith.truncf %406 : vector<1x32xf32> to vector<1x32xbf16>
    %cst_75 = arith.constant dense<0.000000e+00> : vector<1x96xf32>
    %439 = tpu.matmul %438, %8, %cst_75 {dimension_numbers = #tpu.dot_dimension_numbers<[1], [0], [0], [1], [0, 0, 1, 1], [], []>} : vector<1x32xbf16>, vector<32x96xbf16>, vector<1x96xf32> -> vector<1x96xf32>
    %440 = arith.addf %439, %12 : vector<1x96xf32>
    %441 = vector.extract_strided_slice %437 {offsets = [0, 0], sizes = [1, 32], strides = [1, 1]} : vector<1x96xf32> to vector<1x32xf32>
    %442 = vector.extract_strided_slice %440 {offsets = [0, 0], sizes = [1, 32], strides = [1, 1]} : vector<1x96xf32> to vector<1x32xf32>
    %443 = arith.addf %441, %442 : vector<1x32xf32>
    %444 = arith.negf %443 : vector<1x32xf32>
    %445 = math.exp %444 : vector<1x32xf32>
    %cst_76 = arith.constant 1.000000e+00 : f32
    %446 = vector.broadcast %cst_76 : f32 to vector<1x32xf32>
    %447 = arith.addf %446, %445 : vector<1x32xf32>
    %448 = arith.divf %446, %447 : vector<1x32xf32>
    %449 = vector.extract_strided_slice %437 {offsets = [0, 32], sizes = [1, 32], strides = [1, 1]} : vector<1x96xf32> to vector<1x32xf32>
    %450 = vector.extract_strided_slice %440 {offsets = [0, 32], sizes = [1, 32], strides = [1, 1]} : vector<1x96xf32> to vector<1x32xf32>
    %451 = arith.addf %449, %450 : vector<1x32xf32>
    %452 = arith.negf %451 : vector<1x32xf32>
    %453 = math.exp %452 : vector<1x32xf32>
    %cst_77 = arith.constant 1.000000e+00 : f32
    %454 = vector.broadcast %cst_77 : f32 to vector<1x32xf32>
    %455 = arith.addf %454, %453 : vector<1x32xf32>
    %456 = arith.divf %454, %455 : vector<1x32xf32>
    %457 = vector.extract_strided_slice %437 {offsets = [0, 64], sizes = [1, 32], strides = [1, 1]} : vector<1x96xf32> to vector<1x32xf32>
    %458 = vector.extract_strided_slice %440 {offsets = [0, 64], sizes = [1, 32], strides = [1, 1]} : vector<1x96xf32> to vector<1x32xf32>
    %459 = arith.mulf %448, %458 : vector<1x32xf32>
    %460 = arith.addf %457, %459 : vector<1x32xf32>
    %461 = math.tanh %460 : vector<1x32xf32>
    %cst_78 = arith.constant 1.000000e+00 : f32
    %462 = vector.broadcast %cst_78 : f32 to vector<1x32xf32>
    %463 = arith.subf %462, %456 : vector<1x32xf32>
    %464 = arith.mulf %463, %461 : vector<1x32xf32>
    %465 = arith.mulf %456, %406 : vector<1x32xf32>
    %466 = arith.addf %464, %465 : vector<1x32xf32>
    %467 = vector.extract_strided_slice %6 {offsets = [0, 96], sizes = [1, 96], strides = [1, 1]} : vector<8x192xf32> to vector<1x96xf32>
    %468 = arith.truncf %436 : vector<1x32xf32> to vector<1x32xbf16>
    %cst_79 = arith.constant dense<0.000000e+00> : vector<1x96xf32>
    %469 = tpu.matmul %468, %10, %cst_79 {dimension_numbers = #tpu.dot_dimension_numbers<[1], [0], [0], [1], [0, 0, 1, 1], [], []>} : vector<1x32xbf16>, vector<32x96xbf16>, vector<1x96xf32> -> vector<1x96xf32>
    %470 = arith.addf %469, %14 : vector<1x96xf32>
    %471 = vector.extract_strided_slice %467 {offsets = [0, 0], sizes = [1, 32], strides = [1, 1]} : vector<1x96xf32> to vector<1x32xf32>
    %472 = vector.extract_strided_slice %470 {offsets = [0, 0], sizes = [1, 32], strides = [1, 1]} : vector<1x96xf32> to vector<1x32xf32>
    %473 = arith.addf %471, %472 : vector<1x32xf32>
    %474 = arith.negf %473 : vector<1x32xf32>
    %475 = math.exp %474 : vector<1x32xf32>
    %cst_80 = arith.constant 1.000000e+00 : f32
    %476 = vector.broadcast %cst_80 : f32 to vector<1x32xf32>
    %477 = arith.addf %476, %475 : vector<1x32xf32>
    %478 = arith.divf %476, %477 : vector<1x32xf32>
    %479 = vector.extract_strided_slice %467 {offsets = [0, 32], sizes = [1, 32], strides = [1, 1]} : vector<1x96xf32> to vector<1x32xf32>
    %480 = vector.extract_strided_slice %470 {offsets = [0, 32], sizes = [1, 32], strides = [1, 1]} : vector<1x96xf32> to vector<1x32xf32>
    %481 = arith.addf %479, %480 : vector<1x32xf32>
    %482 = arith.negf %481 : vector<1x32xf32>
    %483 = math.exp %482 : vector<1x32xf32>
    %cst_81 = arith.constant 1.000000e+00 : f32
    %484 = vector.broadcast %cst_81 : f32 to vector<1x32xf32>
    %485 = arith.addf %484, %483 : vector<1x32xf32>
    %486 = arith.divf %484, %485 : vector<1x32xf32>
    %487 = vector.extract_strided_slice %467 {offsets = [0, 64], sizes = [1, 32], strides = [1, 1]} : vector<1x96xf32> to vector<1x32xf32>
    %488 = vector.extract_strided_slice %470 {offsets = [0, 64], sizes = [1, 32], strides = [1, 1]} : vector<1x96xf32> to vector<1x32xf32>
    %489 = arith.mulf %478, %488 : vector<1x32xf32>
    %490 = arith.addf %487, %489 : vector<1x32xf32>
    %491 = math.tanh %490 : vector<1x32xf32>
    %cst_82 = arith.constant 1.000000e+00 : f32
    %492 = vector.broadcast %cst_82 : f32 to vector<1x32xf32>
    %493 = arith.subf %492, %486 : vector<1x32xf32>
    %494 = arith.mulf %493, %491 : vector<1x32xf32>
    %495 = arith.mulf %486, %436 : vector<1x32xf32>
    %496 = arith.addf %494, %495 : vector<1x32xf32>
    %497 = tpu.concatenate %46, %106, %166, %226, %286, %346, %406, %466 in 0 : vector<1x32xf32>, vector<1x32xf32>, vector<1x32xf32>, vector<1x32xf32>, vector<1x32xf32>, vector<1x32xf32>, vector<1x32xf32>, vector<1x32xf32> -> vector<8x32xf32>
    %498 = tpu.concatenate %496, %436, %376, %316, %256, %196, %136, %76 in 0 : vector<1x32xf32>, vector<1x32xf32>, vector<1x32xf32>, vector<1x32xf32>, vector<1x32xf32>, vector<1x32xf32>, vector<1x32xf32>, vector<1x32xf32> -> vector<8x32xf32>
    %c0_83 = arith.constant 0 : index
    %c0_84 = arith.constant 0 : index
    %c0_85 = arith.constant 0 : index
    %499 = vector.load %arg7[%c0_83, %c0_84, %c0_85] : memref<2x32x32xbf16, #tpu.memory_space<vmem>>, vector<1x32x32xbf16>
    %500 = vector.shape_cast %499 : vector<1x32x32xbf16> to vector<32x32xbf16>
    %501 = arith.truncf %497 : vector<8x32xf32> to vector<8x32xbf16>
    %cst_86 = arith.constant dense<0.000000e+00> : vector<8x32xf32>
    %502 = tpu.matmul %501, %500, %cst_86 {dimension_numbers = #tpu.dot_dimension_numbers<[1], [0], [0], [1], [0, 0, 1, 1], [], []>} : vector<8x32xbf16>, vector<32x32xbf16>, vector<8x32xf32> -> vector<8x32xf32>
    %c1_87 = arith.constant 1 : index
    %c0_88 = arith.constant 0 : index
    %c0_89 = arith.constant 0 : index
    %503 = vector.load %arg7[%c1_87, %c0_88, %c0_89] : memref<2x32x32xbf16, #tpu.memory_space<vmem>>, vector<1x32x32xbf16>
    %504 = vector.shape_cast %503 : vector<1x32x32xbf16> to vector<32x32xbf16>
    %505 = arith.truncf %498 : vector<8x32xf32> to vector<8x32xbf16>
    %cst_90 = arith.constant dense<0.000000e+00> : vector<8x32xf32>
    %506 = tpu.matmul %505, %504, %cst_90 {dimension_numbers = #tpu.dot_dimension_numbers<[1], [0], [0], [1], [0, 0, 1, 1], [], []>} : vector<8x32xbf16>, vector<32x32xbf16>, vector<8x32xf32> -> vector<8x32xf32>
    %507 = arith.addf %502, %506 : vector<8x32xf32>
    %c0_91 = arith.constant 0 : index
    %c0_92 = arith.constant 0 : index
    %508 = vector.load %arg8[%c0_91, %c0_92] : memref<1x32xf32, #tpu.memory_space<vmem>>, vector<1x32xf32>
    %509 = vector.broadcast %508 : vector<1x32xf32> to vector<8x32xf32>
    %510 = arith.addf %507, %509 : vector<8x32xf32>
    %c0_93 = arith.constant 0 : index
    %c0_94 = arith.constant 0 : index
    %c0_95 = arith.constant 0 : index
    %511 = vector.load %arg2[%c0_93, %c0_94, %c0_95] : memref<1x32x8xbf16, #tpu.memory_space<vmem>>, vector<1x32x8xbf16>
    %512 = vector.shape_cast %511 : vector<1x32x8xbf16> to vector<32x8xbf16>
    %c0_96 = arith.constant 0 : index
    %c0_97 = arith.constant 0 : index
    %513 = vector.load %arg9[%c0_96, %c0_97] : memref<32x32xbf16, #tpu.memory_space<vmem>>, vector<32x32xbf16>
    %514 = arith.truncf %510 : vector<8x32xf32> to vector<8x32xbf16>
    %cst_98 = arith.constant dense<0.000000e+00> : vector<8x32xf32>
    %515 = tpu.matmul %514, %513, %cst_98 {dimension_numbers = #tpu.dot_dimension_numbers<[1], [0], [0], [1], [0, 0, 1, 1], [], []>} : vector<8x32xbf16>, vector<32x32xbf16>, vector<8x32xf32> -> vector<8x32xf32>
    %c0_99 = arith.constant 0 : index
    %c0_100 = arith.constant 0 : index
    %516 = vector.load %arg10[%c0_99, %c0_100] : memref<1x32xf32, #tpu.memory_space<vmem>>, vector<1x32xf32>
    %517 = vector.broadcast %516 : vector<1x32xf32> to vector<8x32xf32>
    %518 = arith.addf %515, %517 : vector<8x32xf32>
    %519 = arith.truncf %518 : vector<8x32xf32> to vector<8x32xbf16>
    %cst_101 = arith.constant dense<0.000000e+00> : vector<32x32xf32>
    %520 = tpu.matmul %512, %519, %cst_101 {dimension_numbers = #tpu.dot_dimension_numbers<[1], [0], [0], [1], [0, 0, 1, 1], [], []>} : vector<32x8xbf16>, vector<8x32xbf16>, vector<32x32xf32> -> vector<32x32xf32>
    %521 = vector.extract_strided_slice %520 {offsets = [0, 0], sizes = [8, 32], strides = [1, 1]} : vector<32x32xf32> to vector<8x32xf32>
    %c0_102 = arith.constant 0 : index
    %c0_103 = arith.constant 0 : index
    %c0_104 = arith.constant 0 : index
    %522 = vector.load %arg11[%c0_102, %c0_103, %c0_104] : memref<4x32x16xbf16, #tpu.memory_space<vmem>>, vector<1x32x16xbf16>
    %523 = vector.shape_cast %522 : vector<1x32x16xbf16> to vector<32x16xbf16>
    %524 = arith.truncf %521 : vector<8x32xf32> to vector<8x32xbf16>
    %cst_105 = arith.constant dense<0.000000e+00> : vector<8x16xf32>
    %525 = tpu.matmul %524, %523, %cst_105 {dimension_numbers = #tpu.dot_dimension_numbers<[1], [0], [0], [1], [0, 0, 1, 1], [], []>} : vector<8x32xbf16>, vector<32x16xbf16>, vector<8x16xf32> -> vector<8x16xf32>
    %526 = vector.extract_strided_slice %520 {offsets = [8, 0], sizes = [8, 32], strides = [1, 1]} : vector<32x32xf32> to vector<8x32xf32>
    %c1_106 = arith.constant 1 : index
    %c0_107 = arith.constant 0 : index
    %c0_108 = arith.constant 0 : index
    %527 = vector.load %arg11[%c1_106, %c0_107, %c0_108] : memref<4x32x16xbf16, #tpu.memory_space<vmem>>, vector<1x32x16xbf16>
    %528 = vector.shape_cast %527 : vector<1x32x16xbf16> to vector<32x16xbf16>
    %529 = arith.truncf %526 : vector<8x32xf32> to vector<8x32xbf16>
    %cst_109 = arith.constant dense<0.000000e+00> : vector<8x16xf32>
    %530 = tpu.matmul %529, %528, %cst_109 {dimension_numbers = #tpu.dot_dimension_numbers<[1], [0], [0], [1], [0, 0, 1, 1], [], []>} : vector<8x32xbf16>, vector<32x16xbf16>, vector<8x16xf32> -> vector<8x16xf32>
    %531 = arith.addf %525, %530 : vector<8x16xf32>
    %532 = vector.extract_strided_slice %520 {offsets = [16, 0], sizes = [8, 32], strides = [1, 1]} : vector<32x32xf32> to vector<8x32xf32>
    %c2 = arith.constant 2 : index
    %c0_110 = arith.constant 0 : index
    %c0_111 = arith.constant 0 : index
    %533 = vector.load %arg11[%c2, %c0_110, %c0_111] : memref<4x32x16xbf16, #tpu.memory_space<vmem>>, vector<1x32x16xbf16>
    %534 = vector.shape_cast %533 : vector<1x32x16xbf16> to vector<32x16xbf16>
    %535 = arith.truncf %532 : vector<8x32xf32> to vector<8x32xbf16>
    %cst_112 = arith.constant dense<0.000000e+00> : vector<8x16xf32>
    %536 = tpu.matmul %535, %534, %cst_112 {dimension_numbers = #tpu.dot_dimension_numbers<[1], [0], [0], [1], [0, 0, 1, 1], [], []>} : vector<8x32xbf16>, vector<32x16xbf16>, vector<8x16xf32> -> vector<8x16xf32>
    %537 = arith.addf %531, %536 : vector<8x16xf32>
    %538 = vector.extract_strided_slice %520 {offsets = [24, 0], sizes = [8, 32], strides = [1, 1]} : vector<32x32xf32> to vector<8x32xf32>
    %c3 = arith.constant 3 : index
    %c0_113 = arith.constant 0 : index
    %c0_114 = arith.constant 0 : index
    %539 = vector.load %arg11[%c3, %c0_113, %c0_114] : memref<4x32x16xbf16, #tpu.memory_space<vmem>>, vector<1x32x16xbf16>
    %540 = vector.shape_cast %539 : vector<1x32x16xbf16> to vector<32x16xbf16>
    %541 = arith.truncf %538 : vector<8x32xf32> to vector<8x32xbf16>
    %cst_115 = arith.constant dense<0.000000e+00> : vector<8x16xf32>
    %542 = tpu.matmul %541, %540, %cst_115 {dimension_numbers = #tpu.dot_dimension_numbers<[1], [0], [0], [1], [0, 0, 1, 1], [], []>} : vector<8x32xbf16>, vector<32x16xbf16>, vector<8x16xf32> -> vector<8x16xf32>
    %543 = arith.addf %537, %542 : vector<8x16xf32>
    %c0_116 = arith.constant 0 : index
    %c0_117 = arith.constant 0 : index
    %544 = vector.load %arg12[%c0_116, %c0_117] : memref<1x16xf32, #tpu.memory_space<vmem>>, vector<1x16xf32>
    %545 = vector.broadcast %544 : vector<1x16xf32> to vector<8x16xf32>
    %546 = arith.addf %543, %545 : vector<8x16xf32>
    %cst_118 = arith.constant 0.000000e+00 : f32
    %547 = vector.broadcast %cst_118 : f32 to vector<8x16xf32>
    %548 = arith.maximumf %546, %547 : vector<8x16xf32>
    %549 = tpu.iota {dimensions = array<i32: 0>} : vector<8x16xi32>
    %c0_i32 = arith.constant 0 : i32
    %550 = vector.broadcast %c0_i32 : i32 to vector<8x16xi32>
    %551 = arith.cmpi eq, %549, %550 : vector<8x16xi32>
    %c1_i32 = arith.constant 1 : i32
    %552 = tpu.dynamic_rotate %548 by %c1_i32 dim 0 : vector<8x16xf32>, i32 -> vector<8x16xf32>
    %cst_119 = arith.constant 0.000000e+00 : f32
    %553 = vector.broadcast %cst_119 : f32 to vector<8x16xf32>
    %554 = arith.select %551, %553, %552 : vector<8x16xi1>, vector<8x16xf32>
    %c7_i32 = arith.constant 7 : i32
    %555 = vector.broadcast %c7_i32 : i32 to vector<8x16xi32>
    %556 = arith.cmpi eq, %549, %555 : vector<8x16xi32>
    %c7_i32_120 = arith.constant 7 : i32
    %557 = tpu.dynamic_rotate %548 by %c7_i32_120 dim 0 : vector<8x16xf32>, i32 -> vector<8x16xf32>
    %cst_121 = arith.constant 0.000000e+00 : f32
    %558 = vector.broadcast %cst_121 : f32 to vector<8x16xf32>
    %559 = arith.select %556, %558, %557 : vector<8x16xi1>, vector<8x16xf32>
    %560 = tpu.concatenate %554, %548, %559 in 1 : vector<8x16xf32>, vector<8x16xf32>, vector<8x16xf32> -> vector<8x48xf32>
    %c0_122 = arith.constant 0 : index
    %c0_123 = arith.constant 0 : index
    %c0_124 = arith.constant 0 : index
    %561 = vector.load %arg13[%c0_122, %c0_123, %c0_124] : memref<3x48x16xbf16, #tpu.memory_space<vmem>>, vector<1x48x16xbf16>
    %562 = vector.shape_cast %561 : vector<1x48x16xbf16> to vector<48x16xbf16>
    %563 = arith.truncf %560 : vector<8x48xf32> to vector<8x48xbf16>
    %cst_125 = arith.constant dense<0.000000e+00> : vector<8x16xf32>
    %564 = tpu.matmul %563, %562, %cst_125 {dimension_numbers = #tpu.dot_dimension_numbers<[1], [0], [0], [1], [0, 0, 1, 1], [], []>} : vector<8x48xbf16>, vector<48x16xbf16>, vector<8x16xf32> -> vector<8x16xf32>
    %c0_126 = arith.constant 0 : index
    %c0_127 = arith.constant 0 : index
    %c0_128 = arith.constant 0 : index
    %565 = vector.load %arg14[%c0_126, %c0_127, %c0_128] : memref<3x1x16xf32, #tpu.memory_space<vmem>>, vector<1x1x16xf32>
    %566 = vector.shape_cast %565 : vector<1x1x16xf32> to vector<1x16xf32>
    %567 = vector.broadcast %566 : vector<1x16xf32> to vector<8x16xf32>
    %568 = arith.addf %564, %567 : vector<8x16xf32>
    %cst_129 = arith.constant 0.000000e+00 : f32
    %569 = vector.broadcast %cst_129 : f32 to vector<8x16xf32>
    %570 = arith.maximumf %568, %569 : vector<8x16xf32>
    %c0_130 = arith.constant 0 : index
    %c0_131 = arith.constant 0 : index
    %c0_132 = arith.constant 0 : index
    %571 = vector.load %arg15[%c0_130, %c0_131, %c0_132] : memref<3x16x16xbf16, #tpu.memory_space<vmem>>, vector<1x16x16xbf16>
    %572 = vector.shape_cast %571 : vector<1x16x16xbf16> to vector<16x16xbf16>
    %573 = arith.truncf %570 : vector<8x16xf32> to vector<8x16xbf16>
    %cst_133 = arith.constant dense<0.000000e+00> : vector<8x16xf32>
    %574 = tpu.matmul %573, %572, %cst_133 {dimension_numbers = #tpu.dot_dimension_numbers<[1], [0], [0], [1], [0, 0, 1, 1], [], []>} : vector<8x16xbf16>, vector<16x16xbf16>, vector<8x16xf32> -> vector<8x16xf32>
    %c0_134 = arith.constant 0 : index
    %c0_135 = arith.constant 0 : index
    %c0_136 = arith.constant 0 : index
    %575 = vector.load %arg16[%c0_134, %c0_135, %c0_136] : memref<3x1x16xf32, #tpu.memory_space<vmem>>, vector<1x1x16xf32>
    %576 = vector.shape_cast %575 : vector<1x1x16xf32> to vector<1x16xf32>
    %577 = vector.broadcast %576 : vector<1x16xf32> to vector<8x16xf32>
    %578 = arith.addf %574, %577 : vector<8x16xf32>
    %579 = arith.truncf %578 : vector<8x16xf32> to vector<8x16xbf16>
    %cst_137 = arith.constant dense<0.000000e+00> : vector<32x16xf32>
    %580 = tpu.matmul %512, %579, %cst_137 {dimension_numbers = #tpu.dot_dimension_numbers<[1], [0], [0], [1], [0, 0, 1, 1], [], []>} : vector<32x8xbf16>, vector<8x16xbf16>, vector<32x16xf32> -> vector<32x16xf32>
    %581 = vector.extract_strided_slice %580 {offsets = [0, 0], sizes = [8, 16], strides = [1, 1]} : vector<32x16xf32> to vector<8x16xf32>
    %c0_138 = arith.constant 0 : index
    %c0_139 = arith.constant 0 : index
    %c0_140 = arith.constant 0 : index
    %582 = vector.load %arg17[%c0_138, %c0_139, %c0_140] : memref<12x16x16xbf16, #tpu.memory_space<vmem>>, vector<1x16x16xbf16>
    %583 = vector.shape_cast %582 : vector<1x16x16xbf16> to vector<16x16xbf16>
    %584 = arith.truncf %581 : vector<8x16xf32> to vector<8x16xbf16>
    %cst_141 = arith.constant dense<0.000000e+00> : vector<8x16xf32>
    %585 = tpu.matmul %584, %583, %cst_141 {dimension_numbers = #tpu.dot_dimension_numbers<[1], [0], [0], [1], [0, 0, 1, 1], [], []>} : vector<8x16xbf16>, vector<16x16xbf16>, vector<8x16xf32> -> vector<8x16xf32>
    %586 = vector.extract_strided_slice %580 {offsets = [8, 0], sizes = [8, 16], strides = [1, 1]} : vector<32x16xf32> to vector<8x16xf32>
    %c1_142 = arith.constant 1 : index
    %c0_143 = arith.constant 0 : index
    %c0_144 = arith.constant 0 : index
    %587 = vector.load %arg17[%c1_142, %c0_143, %c0_144] : memref<12x16x16xbf16, #tpu.memory_space<vmem>>, vector<1x16x16xbf16>
    %588 = vector.shape_cast %587 : vector<1x16x16xbf16> to vector<16x16xbf16>
    %589 = arith.truncf %586 : vector<8x16xf32> to vector<8x16xbf16>
    %cst_145 = arith.constant dense<0.000000e+00> : vector<8x16xf32>
    %590 = tpu.matmul %589, %588, %cst_145 {dimension_numbers = #tpu.dot_dimension_numbers<[1], [0], [0], [1], [0, 0, 1, 1], [], []>} : vector<8x16xbf16>, vector<16x16xbf16>, vector<8x16xf32> -> vector<8x16xf32>
    %591 = arith.addf %585, %590 : vector<8x16xf32>
    %592 = vector.extract_strided_slice %580 {offsets = [16, 0], sizes = [8, 16], strides = [1, 1]} : vector<32x16xf32> to vector<8x16xf32>
    %c2_146 = arith.constant 2 : index
    %c0_147 = arith.constant 0 : index
    %c0_148 = arith.constant 0 : index
    %593 = vector.load %arg17[%c2_146, %c0_147, %c0_148] : memref<12x16x16xbf16, #tpu.memory_space<vmem>>, vector<1x16x16xbf16>
    %594 = vector.shape_cast %593 : vector<1x16x16xbf16> to vector<16x16xbf16>
    %595 = arith.truncf %592 : vector<8x16xf32> to vector<8x16xbf16>
    %cst_149 = arith.constant dense<0.000000e+00> : vector<8x16xf32>
    %596 = tpu.matmul %595, %594, %cst_149 {dimension_numbers = #tpu.dot_dimension_numbers<[1], [0], [0], [1], [0, 0, 1, 1], [], []>} : vector<8x16xbf16>, vector<16x16xbf16>, vector<8x16xf32> -> vector<8x16xf32>
    %597 = arith.addf %591, %596 : vector<8x16xf32>
    %598 = vector.extract_strided_slice %580 {offsets = [24, 0], sizes = [8, 16], strides = [1, 1]} : vector<32x16xf32> to vector<8x16xf32>
    %c3_150 = arith.constant 3 : index
    %c0_151 = arith.constant 0 : index
    %c0_152 = arith.constant 0 : index
    %599 = vector.load %arg17[%c3_150, %c0_151, %c0_152] : memref<12x16x16xbf16, #tpu.memory_space<vmem>>, vector<1x16x16xbf16>
    %600 = vector.shape_cast %599 : vector<1x16x16xbf16> to vector<16x16xbf16>
    %601 = arith.truncf %598 : vector<8x16xf32> to vector<8x16xbf16>
    %cst_153 = arith.constant dense<0.000000e+00> : vector<8x16xf32>
    %602 = tpu.matmul %601, %600, %cst_153 {dimension_numbers = #tpu.dot_dimension_numbers<[1], [0], [0], [1], [0, 0, 1, 1], [], []>} : vector<8x16xbf16>, vector<16x16xbf16>, vector<8x16xf32> -> vector<8x16xf32>
    %603 = arith.addf %597, %602 : vector<8x16xf32>
    %c0_154 = arith.constant 0 : index
    %c0_155 = arith.constant 0 : index
    %c0_156 = arith.constant 0 : index
    %604 = vector.load %arg18[%c0_154, %c0_155, %c0_156] : memref<3x1x16xf32, #tpu.memory_space<vmem>>, vector<1x1x16xf32>
    %605 = vector.shape_cast %604 : vector<1x1x16xf32> to vector<1x16xf32>
    %606 = vector.broadcast %605 : vector<1x16xf32> to vector<8x16xf32>
    %607 = arith.addf %603, %606 : vector<8x16xf32>
    %608 = arith.addf %607, %548 : vector<8x16xf32>
    %cst_157 = arith.constant 0.000000e+00 : f32
    %609 = vector.broadcast %cst_157 : f32 to vector<8x16xf32>
    %610 = arith.maximumf %608, %609 : vector<8x16xf32>
    %c0_i32_158 = arith.constant 0 : i32
    %611 = vector.broadcast %c0_i32_158 : i32 to vector<8x16xi32>
    %612 = arith.cmpi eq, %549, %611 : vector<8x16xi32>
    %c1_i32_159 = arith.constant 1 : i32
    %613 = tpu.dynamic_rotate %610 by %c1_i32_159 dim 0 : vector<8x16xf32>, i32 -> vector<8x16xf32>
    %cst_160 = arith.constant 0.000000e+00 : f32
    %614 = vector.broadcast %cst_160 : f32 to vector<8x16xf32>
    %615 = arith.select %612, %614, %613 : vector<8x16xi1>, vector<8x16xf32>
    %c7_i32_161 = arith.constant 7 : i32
    %616 = vector.broadcast %c7_i32_161 : i32 to vector<8x16xi32>
    %617 = arith.cmpi eq, %549, %616 : vector<8x16xi32>
    %c7_i32_162 = arith.constant 7 : i32
    %618 = tpu.dynamic_rotate %610 by %c7_i32_162 dim 0 : vector<8x16xf32>, i32 -> vector<8x16xf32>
    %cst_163 = arith.constant 0.000000e+00 : f32
    %619 = vector.broadcast %cst_163 : f32 to vector<8x16xf32>
    %620 = arith.select %617, %619, %618 : vector<8x16xi1>, vector<8x16xf32>
    %621 = tpu.concatenate %615, %610, %620 in 1 : vector<8x16xf32>, vector<8x16xf32>, vector<8x16xf32> -> vector<8x48xf32>
    %c1_164 = arith.constant 1 : index
    %c0_165 = arith.constant 0 : index
    %c0_166 = arith.constant 0 : index
    %622 = vector.load %arg13[%c1_164, %c0_165, %c0_166] : memref<3x48x16xbf16, #tpu.memory_space<vmem>>, vector<1x48x16xbf16>
    %623 = vector.shape_cast %622 : vector<1x48x16xbf16> to vector<48x16xbf16>
    %624 = arith.truncf %621 : vector<8x48xf32> to vector<8x48xbf16>
    %cst_167 = arith.constant dense<0.000000e+00> : vector<8x16xf32>
    %625 = tpu.matmul %624, %623, %cst_167 {dimension_numbers = #tpu.dot_dimension_numbers<[1], [0], [0], [1], [0, 0, 1, 1], [], []>} : vector<8x48xbf16>, vector<48x16xbf16>, vector<8x16xf32> -> vector<8x16xf32>
    %c1_168 = arith.constant 1 : index
    %c0_169 = arith.constant 0 : index
    %c0_170 = arith.constant 0 : index
    %626 = vector.load %arg14[%c1_168, %c0_169, %c0_170] : memref<3x1x16xf32, #tpu.memory_space<vmem>>, vector<1x1x16xf32>
    %627 = vector.shape_cast %626 : vector<1x1x16xf32> to vector<1x16xf32>
    %628 = vector.broadcast %627 : vector<1x16xf32> to vector<8x16xf32>
    %629 = arith.addf %625, %628 : vector<8x16xf32>
    %cst_171 = arith.constant 0.000000e+00 : f32
    %630 = vector.broadcast %cst_171 : f32 to vector<8x16xf32>
    %631 = arith.maximumf %629, %630 : vector<8x16xf32>
    %c1_172 = arith.constant 1 : index
    %c0_173 = arith.constant 0 : index
    %c0_174 = arith.constant 0 : index
    %632 = vector.load %arg15[%c1_172, %c0_173, %c0_174] : memref<3x16x16xbf16, #tpu.memory_space<vmem>>, vector<1x16x16xbf16>
    %633 = vector.shape_cast %632 : vector<1x16x16xbf16> to vector<16x16xbf16>
    %634 = arith.truncf %631 : vector<8x16xf32> to vector<8x16xbf16>
    %cst_175 = arith.constant dense<0.000000e+00> : vector<8x16xf32>
    %635 = tpu.matmul %634, %633, %cst_175 {dimension_numbers = #tpu.dot_dimension_numbers<[1], [0], [0], [1], [0, 0, 1, 1], [], []>} : vector<8x16xbf16>, vector<16x16xbf16>, vector<8x16xf32> -> vector<8x16xf32>
    %c1_176 = arith.constant 1 : index
    %c0_177 = arith.constant 0 : index
    %c0_178 = arith.constant 0 : index
    %636 = vector.load %arg16[%c1_176, %c0_177, %c0_178] : memref<3x1x16xf32, #tpu.memory_space<vmem>>, vector<1x1x16xf32>
    %637 = vector.shape_cast %636 : vector<1x1x16xf32> to vector<1x16xf32>
    %638 = vector.broadcast %637 : vector<1x16xf32> to vector<8x16xf32>
    %639 = arith.addf %635, %638 : vector<8x16xf32>
    %640 = arith.truncf %639 : vector<8x16xf32> to vector<8x16xbf16>
    %cst_179 = arith.constant dense<0.000000e+00> : vector<32x16xf32>
    %641 = tpu.matmul %512, %640, %cst_179 {dimension_numbers = #tpu.dot_dimension_numbers<[1], [0], [0], [1], [0, 0, 1, 1], [], []>} : vector<32x8xbf16>, vector<8x16xbf16>, vector<32x16xf32> -> vector<32x16xf32>
    %642 = vector.extract_strided_slice %641 {offsets = [0, 0], sizes = [8, 16], strides = [1, 1]} : vector<32x16xf32> to vector<8x16xf32>
    %c4 = arith.constant 4 : index
    %c0_180 = arith.constant 0 : index
    %c0_181 = arith.constant 0 : index
    %643 = vector.load %arg17[%c4, %c0_180, %c0_181] : memref<12x16x16xbf16, #tpu.memory_space<vmem>>, vector<1x16x16xbf16>
    %644 = vector.shape_cast %643 : vector<1x16x16xbf16> to vector<16x16xbf16>
    %645 = arith.truncf %642 : vector<8x16xf32> to vector<8x16xbf16>
    %cst_182 = arith.constant dense<0.000000e+00> : vector<8x16xf32>
    %646 = tpu.matmul %645, %644, %cst_182 {dimension_numbers = #tpu.dot_dimension_numbers<[1], [0], [0], [1], [0, 0, 1, 1], [], []>} : vector<8x16xbf16>, vector<16x16xbf16>, vector<8x16xf32> -> vector<8x16xf32>
    %647 = vector.extract_strided_slice %641 {offsets = [8, 0], sizes = [8, 16], strides = [1, 1]} : vector<32x16xf32> to vector<8x16xf32>
    %c5 = arith.constant 5 : index
    %c0_183 = arith.constant 0 : index
    %c0_184 = arith.constant 0 : index
    %648 = vector.load %arg17[%c5, %c0_183, %c0_184] : memref<12x16x16xbf16, #tpu.memory_space<vmem>>, vector<1x16x16xbf16>
    %649 = vector.shape_cast %648 : vector<1x16x16xbf16> to vector<16x16xbf16>
    %650 = arith.truncf %647 : vector<8x16xf32> to vector<8x16xbf16>
    %cst_185 = arith.constant dense<0.000000e+00> : vector<8x16xf32>
    %651 = tpu.matmul %650, %649, %cst_185 {dimension_numbers = #tpu.dot_dimension_numbers<[1], [0], [0], [1], [0, 0, 1, 1], [], []>} : vector<8x16xbf16>, vector<16x16xbf16>, vector<8x16xf32> -> vector<8x16xf32>
    %652 = arith.addf %646, %651 : vector<8x16xf32>
    %653 = vector.extract_strided_slice %641 {offsets = [16, 0], sizes = [8, 16], strides = [1, 1]} : vector<32x16xf32> to vector<8x16xf32>
    %c6 = arith.constant 6 : index
    %c0_186 = arith.constant 0 : index
    %c0_187 = arith.constant 0 : index
    %654 = vector.load %arg17[%c6, %c0_186, %c0_187] : memref<12x16x16xbf16, #tpu.memory_space<vmem>>, vector<1x16x16xbf16>
    %655 = vector.shape_cast %654 : vector<1x16x16xbf16> to vector<16x16xbf16>
    %656 = arith.truncf %653 : vector<8x16xf32> to vector<8x16xbf16>
    %cst_188 = arith.constant dense<0.000000e+00> : vector<8x16xf32>
    %657 = tpu.matmul %656, %655, %cst_188 {dimension_numbers = #tpu.dot_dimension_numbers<[1], [0], [0], [1], [0, 0, 1, 1], [], []>} : vector<8x16xbf16>, vector<16x16xbf16>, vector<8x16xf32> -> vector<8x16xf32>
    %658 = arith.addf %652, %657 : vector<8x16xf32>
    %659 = vector.extract_strided_slice %641 {offsets = [24, 0], sizes = [8, 16], strides = [1, 1]} : vector<32x16xf32> to vector<8x16xf32>
    %c7 = arith.constant 7 : index
    %c0_189 = arith.constant 0 : index
    %c0_190 = arith.constant 0 : index
    %660 = vector.load %arg17[%c7, %c0_189, %c0_190] : memref<12x16x16xbf16, #tpu.memory_space<vmem>>, vector<1x16x16xbf16>
    %661 = vector.shape_cast %660 : vector<1x16x16xbf16> to vector<16x16xbf16>
    %662 = arith.truncf %659 : vector<8x16xf32> to vector<8x16xbf16>
    %cst_191 = arith.constant dense<0.000000e+00> : vector<8x16xf32>
    %663 = tpu.matmul %662, %661, %cst_191 {dimension_numbers = #tpu.dot_dimension_numbers<[1], [0], [0], [1], [0, 0, 1, 1], [], []>} : vector<8x16xbf16>, vector<16x16xbf16>, vector<8x16xf32> -> vector<8x16xf32>
    %664 = arith.addf %658, %663 : vector<8x16xf32>
    %c1_192 = arith.constant 1 : index
    %c0_193 = arith.constant 0 : index
    %c0_194 = arith.constant 0 : index
    %665 = vector.load %arg18[%c1_192, %c0_193, %c0_194] : memref<3x1x16xf32, #tpu.memory_space<vmem>>, vector<1x1x16xf32>
    %666 = vector.shape_cast %665 : vector<1x1x16xf32> to vector<1x16xf32>
    %667 = vector.broadcast %666 : vector<1x16xf32> to vector<8x16xf32>
    %668 = arith.addf %664, %667 : vector<8x16xf32>
    %669 = arith.addf %668, %610 : vector<8x16xf32>
    %cst_195 = arith.constant 0.000000e+00 : f32
    %670 = vector.broadcast %cst_195 : f32 to vector<8x16xf32>
    %671 = arith.maximumf %669, %670 : vector<8x16xf32>
    %c0_i32_196 = arith.constant 0 : i32
    %672 = vector.broadcast %c0_i32_196 : i32 to vector<8x16xi32>
    %673 = arith.cmpi eq, %549, %672 : vector<8x16xi32>
    %c1_i32_197 = arith.constant 1 : i32
    %674 = tpu.dynamic_rotate %671 by %c1_i32_197 dim 0 : vector<8x16xf32>, i32 -> vector<8x16xf32>
    %cst_198 = arith.constant 0.000000e+00 : f32
    %675 = vector.broadcast %cst_198 : f32 to vector<8x16xf32>
    %676 = arith.select %673, %675, %674 : vector<8x16xi1>, vector<8x16xf32>
    %c7_i32_199 = arith.constant 7 : i32
    %677 = vector.broadcast %c7_i32_199 : i32 to vector<8x16xi32>
    %678 = arith.cmpi eq, %549, %677 : vector<8x16xi32>
    %c7_i32_200 = arith.constant 7 : i32
    %679 = tpu.dynamic_rotate %671 by %c7_i32_200 dim 0 : vector<8x16xf32>, i32 -> vector<8x16xf32>
    %cst_201 = arith.constant 0.000000e+00 : f32
    %680 = vector.broadcast %cst_201 : f32 to vector<8x16xf32>
    %681 = arith.select %678, %680, %679 : vector<8x16xi1>, vector<8x16xf32>
    %682 = tpu.concatenate %676, %671, %681 in 1 : vector<8x16xf32>, vector<8x16xf32>, vector<8x16xf32> -> vector<8x48xf32>
    %c2_202 = arith.constant 2 : index
    %c0_203 = arith.constant 0 : index
    %c0_204 = arith.constant 0 : index
    %683 = vector.load %arg13[%c2_202, %c0_203, %c0_204] : memref<3x48x16xbf16, #tpu.memory_space<vmem>>, vector<1x48x16xbf16>
    %684 = vector.shape_cast %683 : vector<1x48x16xbf16> to vector<48x16xbf16>
    %685 = arith.truncf %682 : vector<8x48xf32> to vector<8x48xbf16>
    %cst_205 = arith.constant dense<0.000000e+00> : vector<8x16xf32>
    %686 = tpu.matmul %685, %684, %cst_205 {dimension_numbers = #tpu.dot_dimension_numbers<[1], [0], [0], [1], [0, 0, 1, 1], [], []>} : vector<8x48xbf16>, vector<48x16xbf16>, vector<8x16xf32> -> vector<8x16xf32>
    %c2_206 = arith.constant 2 : index
    %c0_207 = arith.constant 0 : index
    %c0_208 = arith.constant 0 : index
    %687 = vector.load %arg14[%c2_206, %c0_207, %c0_208] : memref<3x1x16xf32, #tpu.memory_space<vmem>>, vector<1x1x16xf32>
    %688 = vector.shape_cast %687 : vector<1x1x16xf32> to vector<1x16xf32>
    %689 = vector.broadcast %688 : vector<1x16xf32> to vector<8x16xf32>
    %690 = arith.addf %686, %689 : vector<8x16xf32>
    %cst_209 = arith.constant 0.000000e+00 : f32
    %691 = vector.broadcast %cst_209 : f32 to vector<8x16xf32>
    %692 = arith.maximumf %690, %691 : vector<8x16xf32>
    %c2_210 = arith.constant 2 : index
    %c0_211 = arith.constant 0 : index
    %c0_212 = arith.constant 0 : index
    %693 = vector.load %arg15[%c2_210, %c0_211, %c0_212] : memref<3x16x16xbf16, #tpu.memory_space<vmem>>, vector<1x16x16xbf16>
    %694 = vector.shape_cast %693 : vector<1x16x16xbf16> to vector<16x16xbf16>
    %695 = arith.truncf %692 : vector<8x16xf32> to vector<8x16xbf16>
    %cst_213 = arith.constant dense<0.000000e+00> : vector<8x16xf32>
    %696 = tpu.matmul %695, %694, %cst_213 {dimension_numbers = #tpu.dot_dimension_numbers<[1], [0], [0], [1], [0, 0, 1, 1], [], []>} : vector<8x16xbf16>, vector<16x16xbf16>, vector<8x16xf32> -> vector<8x16xf32>
    %c2_214 = arith.constant 2 : index
    %c0_215 = arith.constant 0 : index
    %c0_216 = arith.constant 0 : index
    %697 = vector.load %arg16[%c2_214, %c0_215, %c0_216] : memref<3x1x16xf32, #tpu.memory_space<vmem>>, vector<1x1x16xf32>
    %698 = vector.shape_cast %697 : vector<1x1x16xf32> to vector<1x16xf32>
    %699 = vector.broadcast %698 : vector<1x16xf32> to vector<8x16xf32>
    %700 = arith.addf %696, %699 : vector<8x16xf32>
    %701 = arith.truncf %700 : vector<8x16xf32> to vector<8x16xbf16>
    %cst_217 = arith.constant dense<0.000000e+00> : vector<32x16xf32>
    %702 = tpu.matmul %512, %701, %cst_217 {dimension_numbers = #tpu.dot_dimension_numbers<[1], [0], [0], [1], [0, 0, 1, 1], [], []>} : vector<32x8xbf16>, vector<8x16xbf16>, vector<32x16xf32> -> vector<32x16xf32>
    %703 = vector.extract_strided_slice %702 {offsets = [0, 0], sizes = [8, 16], strides = [1, 1]} : vector<32x16xf32> to vector<8x16xf32>
    %c8 = arith.constant 8 : index
    %c0_218 = arith.constant 0 : index
    %c0_219 = arith.constant 0 : index
    %704 = vector.load %arg17[%c8, %c0_218, %c0_219] : memref<12x16x16xbf16, #tpu.memory_space<vmem>>, vector<1x16x16xbf16>
    %705 = vector.shape_cast %704 : vector<1x16x16xbf16> to vector<16x16xbf16>
    %706 = arith.truncf %703 : vector<8x16xf32> to vector<8x16xbf16>
    %cst_220 = arith.constant dense<0.000000e+00> : vector<8x16xf32>
    %707 = tpu.matmul %706, %705, %cst_220 {dimension_numbers = #tpu.dot_dimension_numbers<[1], [0], [0], [1], [0, 0, 1, 1], [], []>} : vector<8x16xbf16>, vector<16x16xbf16>, vector<8x16xf32> -> vector<8x16xf32>
    %708 = vector.extract_strided_slice %702 {offsets = [8, 0], sizes = [8, 16], strides = [1, 1]} : vector<32x16xf32> to vector<8x16xf32>
    %c9 = arith.constant 9 : index
    %c0_221 = arith.constant 0 : index
    %c0_222 = arith.constant 0 : index
    %709 = vector.load %arg17[%c9, %c0_221, %c0_222] : memref<12x16x16xbf16, #tpu.memory_space<vmem>>, vector<1x16x16xbf16>
    %710 = vector.shape_cast %709 : vector<1x16x16xbf16> to vector<16x16xbf16>
    %711 = arith.truncf %708 : vector<8x16xf32> to vector<8x16xbf16>
    %cst_223 = arith.constant dense<0.000000e+00> : vector<8x16xf32>
    %712 = tpu.matmul %711, %710, %cst_223 {dimension_numbers = #tpu.dot_dimension_numbers<[1], [0], [0], [1], [0, 0, 1, 1], [], []>} : vector<8x16xbf16>, vector<16x16xbf16>, vector<8x16xf32> -> vector<8x16xf32>
    %713 = arith.addf %707, %712 : vector<8x16xf32>
    %714 = vector.extract_strided_slice %702 {offsets = [16, 0], sizes = [8, 16], strides = [1, 1]} : vector<32x16xf32> to vector<8x16xf32>
    %c10 = arith.constant 10 : index
    %c0_224 = arith.constant 0 : index
    %c0_225 = arith.constant 0 : index
    %715 = vector.load %arg17[%c10, %c0_224, %c0_225] : memref<12x16x16xbf16, #tpu.memory_space<vmem>>, vector<1x16x16xbf16>
    %716 = vector.shape_cast %715 : vector<1x16x16xbf16> to vector<16x16xbf16>
    %717 = arith.truncf %714 : vector<8x16xf32> to vector<8x16xbf16>
    %cst_226 = arith.constant dense<0.000000e+00> : vector<8x16xf32>
    %718 = tpu.matmul %717, %716, %cst_226 {dimension_numbers = #tpu.dot_dimension_numbers<[1], [0], [0], [1], [0, 0, 1, 1], [], []>} : vector<8x16xbf16>, vector<16x16xbf16>, vector<8x16xf32> -> vector<8x16xf32>
    %719 = arith.addf %713, %718 : vector<8x16xf32>
    %720 = vector.extract_strided_slice %702 {offsets = [24, 0], sizes = [8, 16], strides = [1, 1]} : vector<32x16xf32> to vector<8x16xf32>
    %c11 = arith.constant 11 : index
    %c0_227 = arith.constant 0 : index
    %c0_228 = arith.constant 0 : index
    %721 = vector.load %arg17[%c11, %c0_227, %c0_228] : memref<12x16x16xbf16, #tpu.memory_space<vmem>>, vector<1x16x16xbf16>
    %722 = vector.shape_cast %721 : vector<1x16x16xbf16> to vector<16x16xbf16>
    %723 = arith.truncf %720 : vector<8x16xf32> to vector<8x16xbf16>
    %cst_229 = arith.constant dense<0.000000e+00> : vector<8x16xf32>
    %724 = tpu.matmul %723, %722, %cst_229 {dimension_numbers = #tpu.dot_dimension_numbers<[1], [0], [0], [1], [0, 0, 1, 1], [], []>} : vector<8x16xbf16>, vector<16x16xbf16>, vector<8x16xf32> -> vector<8x16xf32>
    %725 = arith.addf %719, %724 : vector<8x16xf32>
    %c2_230 = arith.constant 2 : index
    %c0_231 = arith.constant 0 : index
    %c0_232 = arith.constant 0 : index
    %726 = vector.load %arg18[%c2_230, %c0_231, %c0_232] : memref<3x1x16xf32, #tpu.memory_space<vmem>>, vector<1x1x16xf32>
    %727 = vector.shape_cast %726 : vector<1x1x16xf32> to vector<1x16xf32>
    %728 = vector.broadcast %727 : vector<1x16xf32> to vector<8x16xf32>
    %729 = arith.addf %725, %728 : vector<8x16xf32>
    %730 = arith.addf %729, %671 : vector<8x16xf32>
    %cst_233 = arith.constant 0.000000e+00 : f32
    %731 = vector.broadcast %cst_233 : f32 to vector<8x16xf32>
    %732 = arith.maximumf %730, %731 : vector<8x16xf32>
    %c0_234 = arith.constant 0 : index
    %c0_235 = arith.constant 0 : index
    %733 = vector.load %arg19[%c0_234, %c0_235] : memref<16x32xbf16, #tpu.memory_space<vmem>>, vector<16x32xbf16>
    %734 = arith.truncf %732 : vector<8x16xf32> to vector<8x16xbf16>
    %cst_236 = arith.constant dense<0.000000e+00> : vector<8x32xf32>
    %735 = tpu.matmul %734, %733, %cst_236 {dimension_numbers = #tpu.dot_dimension_numbers<[1], [0], [0], [1], [0, 0, 1, 1], [], []>} : vector<8x16xbf16>, vector<16x32xbf16>, vector<8x32xf32> -> vector<8x32xf32>
    %c0_237 = arith.constant 0 : index
    %c0_238 = arith.constant 0 : index
    %736 = vector.load %arg20[%c0_237, %c0_238] : memref<1x32xf32, #tpu.memory_space<vmem>>, vector<1x32xf32>
    %737 = vector.broadcast %736 : vector<1x32xf32> to vector<8x32xf32>
    %738 = arith.addf %735, %737 : vector<8x32xf32>
    %c0_239 = arith.constant 0 : index
    %c0_240 = arith.constant 0 : index
    %c0_241 = arith.constant 0 : index
    %739 = vector.load %arg21[%c0_239, %c0_240, %c0_241] : memref<1x8x32xf32, #tpu.memory_space<vmem>>, vector<1x8x32xf32>
    %740 = vector.shape_cast %739 : vector<1x8x32xf32> to vector<8x32xf32>
    %741 = vector.shape_cast %738 : vector<8x32xf32> to vector<1x8x32xf32>
    tpu.vector_store %arg21[%c0_239, %c0_240, %c0_241], %741 {strides = array<i32>} : memref<1x8x32xf32, #tpu.memory_space<vmem>>, vector<1x8x32xf32>,
    return
  }
  func.func @transform_0(%arg0: i32) -> (i32, i32, i32) {
    %c0_i32 = arith.constant 0 : i32
    %c0_i32_0 = arith.constant 0 : i32
    %c0_i32_1 = arith.constant 0 : i32
    return %arg0, %c0_i32, %c0_i32_0 : i32, i32, i32
  }
  func.func @transform_1(%arg0: i32) -> (i32, i32, i32) {
    %c0_i32 = arith.constant 0 : i32
    %c0_i32_0 = arith.constant 0 : i32
    %c0_i32_1 = arith.constant 0 : i32
    return %arg0, %c0_i32, %c0_i32_0 : i32, i32, i32
  }
  func.func @transform_2(%arg0: i32) -> (i32, i32) {
    %c0_i32 = arith.constant 0 : i32
    %c0_i32_0 = arith.constant 0 : i32
    %c0_i32_1 = arith.constant 0 : i32
    return %c0_i32, %c0_i32_0 : i32, i32
  }
  func.func @transform_3(%arg0: i32) -> (i32, i32) {
    %c0_i32 = arith.constant 0 : i32
    %c0_i32_0 = arith.constant 0 : i32
    %c0_i32_1 = arith.constant 0 : i32
    return %c0_i32, %c0_i32_0 : i32, i32
  }
  func.func @transform_4(%arg0: i32) -> (i32, i32, i32) {
    %c0_i32 = arith.constant 0 : i32
    %c0_i32_0 = arith.constant 0 : i32
    %c0_i32_1 = arith.constant 0 : i32
    %c0_i32_2 = arith.constant 0 : i32
    return %c0_i32, %c0_i32_0, %c0_i32_1 : i32, i32, i32
  }
  func.func @transform_5(%arg0: i32) -> (i32, i32, i32) {
    %c0_i32 = arith.constant 0 : i32
    %c0_i32_0 = arith.constant 0 : i32
    %c0_i32_1 = arith.constant 0 : i32
    %c0_i32_2 = arith.constant 0 : i32
    return %c0_i32, %c0_i32_0, %c0_i32_1 : i32, i32, i32
  }
  func.func @transform_6(%arg0: i32) -> (i32, i32, i32) {
    %c0_i32 = arith.constant 0 : i32
    %c0_i32_0 = arith.constant 0 : i32
    %c0_i32_1 = arith.constant 0 : i32
    %c0_i32_2 = arith.constant 0 : i32
    return %c0_i32, %c0_i32_0, %c0_i32_1 : i32, i32, i32
  }
  func.func @transform_7(%arg0: i32) -> (i32, i32) {
    %c0_i32 = arith.constant 0 : i32
    %c0_i32_0 = arith.constant 0 : i32
    %c0_i32_1 = arith.constant 0 : i32
    return %c0_i32, %c0_i32_0 : i32, i32
  }
  func.func @transform_8(%arg0: i32) -> (i32, i32) {
    %c0_i32 = arith.constant 0 : i32
    %c0_i32_0 = arith.constant 0 : i32
    %c0_i32_1 = arith.constant 0 : i32
    return %c0_i32, %c0_i32_0 : i32, i32
  }
  func.func @transform_9(%arg0: i32) -> (i32, i32) {
    %c0_i32 = arith.constant 0 : i32
    %c0_i32_0 = arith.constant 0 : i32
    %c0_i32_1 = arith.constant 0 : i32
    return %c0_i32, %c0_i32_0 : i32, i32
  }
  func.func @transform_10(%arg0: i32) -> (i32, i32, i32) {
    %c0_i32 = arith.constant 0 : i32
    %c0_i32_0 = arith.constant 0 : i32
    %c0_i32_1 = arith.constant 0 : i32
    %c0_i32_2 = arith.constant 0 : i32
    return %c0_i32, %c0_i32_0, %c0_i32_1 : i32, i32, i32
  }
  func.func @transform_11(%arg0: i32) -> (i32, i32) {
    %c0_i32 = arith.constant 0 : i32
    %c0_i32_0 = arith.constant 0 : i32
    %c0_i32_1 = arith.constant 0 : i32
    return %c0_i32, %c0_i32_0 : i32, i32
  }
  func.func @transform_12(%arg0: i32) -> (i32, i32, i32) {
    %c0_i32 = arith.constant 0 : i32
    %c0_i32_0 = arith.constant 0 : i32
    %c0_i32_1 = arith.constant 0 : i32
    %c0_i32_2 = arith.constant 0 : i32
    return %c0_i32, %c0_i32_0, %c0_i32_1 : i32, i32, i32
  }
  func.func @transform_13(%arg0: i32) -> (i32, i32, i32) {
    %c0_i32 = arith.constant 0 : i32
    %c0_i32_0 = arith.constant 0 : i32
    %c0_i32_1 = arith.constant 0 : i32
    %c0_i32_2 = arith.constant 0 : i32
    return %c0_i32, %c0_i32_0, %c0_i32_1 : i32, i32, i32
  }
  func.func @transform_14(%arg0: i32) -> (i32, i32, i32) {
    %c0_i32 = arith.constant 0 : i32
    %c0_i32_0 = arith.constant 0 : i32
    %c0_i32_1 = arith.constant 0 : i32
    %c0_i32_2 = arith.constant 0 : i32
    return %c0_i32, %c0_i32_0, %c0_i32_1 : i32, i32, i32
  }
  func.func @transform_15(%arg0: i32) -> (i32, i32, i32) {
    %c0_i32 = arith.constant 0 : i32
    %c0_i32_0 = arith.constant 0 : i32
    %c0_i32_1 = arith.constant 0 : i32
    %c0_i32_2 = arith.constant 0 : i32
    return %c0_i32, %c0_i32_0, %c0_i32_1 : i32, i32, i32
  }
  func.func @transform_16(%arg0: i32) -> (i32, i32, i32) {
    %c0_i32 = arith.constant 0 : i32
    %c0_i32_0 = arith.constant 0 : i32
    %c0_i32_1 = arith.constant 0 : i32
    %c0_i32_2 = arith.constant 0 : i32
    return %c0_i32, %c0_i32_0, %c0_i32_1 : i32, i32, i32
  }
  func.func @transform_17(%arg0: i32) -> (i32, i32, i32) {
    %c0_i32 = arith.constant 0 : i32
    %c0_i32_0 = arith.constant 0 : i32
    %c0_i32_1 = arith.constant 0 : i32
    %c0_i32_2 = arith.constant 0 : i32
    return %c0_i32, %c0_i32_0, %c0_i32_1 : i32, i32, i32
  }
  func.func @transform_18(%arg0: i32) -> (i32, i32) {
    %c0_i32 = arith.constant 0 : i32
    %c0_i32_0 = arith.constant 0 : i32
    %c0_i32_1 = arith.constant 0 : i32
    return %c0_i32, %c0_i32_0 : i32, i32
  }
  func.func @transform_19(%arg0: i32) -> (i32, i32) {
    %c0_i32 = arith.constant 0 : i32
    %c0_i32_0 = arith.constant 0 : i32
    %c0_i32_1 = arith.constant 0 : i32
    return %c0_i32, %c0_i32_0 : i32, i32
  }
  func.func @transform_20(%arg0: i32) -> (i32, i32, i32) {
    %c0_i32 = arith.constant 0 : i32
    %c0_i32_0 = arith.constant 0 : i32
    %c0_i32_1 = arith.constant 0 : i32
    return %arg0, %c0_i32, %c0_i32_0 : i32, i32, i32
  }
}

</mosaic_0001>

<bundles_post_ra>
// kernel: combined_forward.1
= control target key start
LH: loop header
LB: loop body
LE: loop exit
PB: predicated region body
PF: predicated region fallthrough
CT: control target
= control target key end

     0   :  { %s6159_s0 = inlined_call_operand.vmem [shape: bf16[2,8,128], index: 0, kind: input, shape index: {}]   ;;  %s6160_s1 = inlined_call_operand.vmem [shape: bf16[2,32,8], index: 1, kind: input, shape index: {}]   ;;  %s6161_s2 = inlined_call_operand.vmem [shape: bf16[128,192], index: 2, kind: input, shape index: {}]   ;;  %s6162_s3 = inlined_call_operand.vmem [shape: f32[1,192], index: 3, kind: input, shape index: {}]   ;;  %s6163_s4 = inlined_call_operand.vmem [shape: bf16[2,32,96], index: 4, kind: input, shape index: {}]   ;;  %s6164_s5 = inlined_call_operand.vmem [shape: f32[2,1,96], index: 5, kind: input, shape index: {}]   ;;  %s6165_s6 = inlined_call_operand.vmem [shape: bf16[2,32,32], index: 6, kind: input, shape index: {}]   ;;  %s6166_s7 = inlined_call_operand.vmem [shape: f32[1,32], index: 7, kind: input, shape index: {}]   ;;  %s6167_s8 = inlined_call_operand.vmem [shape: bf16[32,32], index: 8, kind: input, shape index: {}]   ;;  %s6168_s9 = inlined_call_operand.vmem [shape: f32[1,32], index: 9, kind: input, shape index: {}]   ;;  %s6169_s10 = inlined_call_operand.vmem [shape: bf16[4,32,16], index: 10, kind: input, shape index: {}]   ;;  %s6170_s11 = inlined_call_operand.vmem [shape: f32[1,16], index: 11, kind: input, shape index: {}]   ;;  %s6171_s12 = inlined_call_operand.vmem [shape: bf16[3,48,16], index: 12, kind: input, shape index: {}]   ;;  %s6172_s13 = inlined_call_operand.vmem [shape: f32[3,1,16], index: 13, kind: input, shape index: {}]   ;;  %s6173_s14 = inlined_call_operand.vmem [shape: bf16[3,16,16], index: 14, kind: input, shape index: {}]   ;;  %s6174_s15 = inlined_call_operand.vmem [shape: f32[3,1,16], index: 15, kind: input, shape index: {}]   ;;  %s6175_s16 = inlined_call_operand.vmem [shape: bf16[12,16,16], index: 16, kind: input, shape index: {}]   ;;  %s6176_s17 = inlined_call_operand.vmem [shape: f32[3,1,16], index: 17, kind: input, shape index: {}]   ;;  %s6177_s18 = inlined_call_operand.vmem [shape: bf16[16,32], index: 18, kind: input, shape index: {}]   ;;  %s6178_s19 = inlined_call_operand.vmem [shape: f32[1,32], index: 19, kind: input, shape index: {}]   ;;  %s6179_s20 = inlined_call_operand.hbm [shape: f32[2,8,32], index: 20, kind: output, shape index: {}]  }
   0x1   :  { %6192 = sst [smem:[#allocation13_spill]] %s6159_s0 }
   0x2   :  { %6193 = sst [smem:[#allocation14_spill]] %s6160_s1 }
   0x3   :  { %6194 = sst [smem:[#allocation15_spill]] %s6161_s2 }
   0x4   :  { %6195 = sst [smem:[#allocation16_spill]] %s6162_s3 }
   0x5   :  { %6196 = sst [smem:[#allocation17_spill]] %s6163_s4 }
   0x6   :  { %6197 = sst [smem:[#allocation18_spill]] %s6178_s19 }
   0x7   :  { %6198 = sst [smem:[#allocation19_spill]] %s6179_s20 }
   0x8   :  { %25 = vsyncpa [#allocation3], 0 }
   0x9   :  { %27 = vsyncpa [#allocation3 + $0x1], 0  ;;  %s5243_s1 = smov 0   ;;  %s5245_s22 = smov 0  }
   0xa   :  { %s5247_s23 = smov 0   ;;  %s5249_s24 = smov 0  }
   0xb LB: > { %6199 = sst [smem:[#allocation5_spill]] %s5116_s1  ;;  %s5264_s2 = sadd.s32 4294967295, %s5128_s24   ;;  %s5128_s24 = sphi %s5249_s24, %s6221_s24   ;;  %s5124_s23 = sphi %s5247_s23, %s6223_s23   ;;  %s5120_s22 = sphi %s5245_s22, %s6225_s22   ;;  %s5116_s1 = sphi %s5243_s1, %s6224_s1  }
   0xc   : > { %6200 = sst [smem:[#allocation6_spill]] %s5124_s23  ;;  %s4130_s25 = sadd.s32 4294967294, %s5128_s24  }
   0xd   : > { %6201 = sst [smem:[#allocation7_spill]] %s5128_s24  ;;  %s5268_s3 = sadd.s32 1, %s5128_s24  }
   0xe   : > { %6202 = sst [smem:[#allocation8_spill]] %s5264_s2  ;;  %s470_s26 = sadd.s32 1, %s5124_s23 }
   0xf   : > { %6203 = sst [smem:[#allocation9_spill]] %s5268_s3  ;;  %s467_s27 = ssub.s32 %s5128_s24, %s5268_s3 }
  0x10   : > { %p480_p0 = scmp.ne.s32.totalorder %s5124_s23, %s5120_s22  ;;  %p468_p1 = scmp.eq.s32.totalorder %s467_s27, 0 }
  0x11   : > { %p481_p2 = scmp.eq.s32.totalorder %s5264_s2, 1  ;;  %p486_p3 = scmp.ne.s32.totalorder %s5120_s22, %s5116_s1 }
  0x12   : > { %p487_p4 = scmp.eq.s32.totalorder %s4130_s25, 1  ;;  %p4133_p7 = scmp.ge.s32.totalorder %s5128_s24, 1 }
  0x13   : > { %s5279_s28 = scalar_select %p468_p1, %s5124_s23, %s470_s26  }
  0x14   : > { %p5281_p5 = por %p481_p2, %p480_p0  ;;  %p5285_p6 = por %p487_p4, %p486_p3 }
  0x15   : > { %6204 = sst [smem:[#allocation10_spill]] %s5279_s28  ;;  %p574_p8 = scmp.lt.s32.totalorder %s5128_s24, 3 }
  0x16   : > { %s6205_s4 = scalar_select %p5281_p5, 1, 0 }
  0x17   : > { %s6207_s29 = scalar_select %p5285_p6, 1, 0 }
  0x18   : > { %6206 = sst [smem:[#allocation11_spill]] %s6205_s4  ;;  %p575_p9 = pnand %p4133_p7, %p574_p8 }
  0x19   : > { %6208 = sst [smem:[#allocation12_spill]] %s6207_s29  ;;  %s6209_s21 = sld [smem:[#allocation15_spill]] (!%p575_p9)  ;;  %v5130_v1 = vmov (!%p575_p9), 0.0   ;;  %vm5131_vm0 = vmmov (!%p575_p9), 0   ;;  %v5132_v4 = vmov (!%p575_p9), 0   ;;  %v665_v29 = vlaneseq (!%p575_p9) }
  0x1a   : > { %578 = sbr.rel (%p575_p9) target bundleno = 9762 (0x2622), region = 100  ;;  %4479 = vmatprep.subr.bf16.mxu1 (!%p575_p9), %v5130_v1  ;;  %s6210_s27 = sld [smem:[#allocation17_spill]] (!%p575_p9)  ;;  %4483 = vmatprep.mubr.msk.bf16.mxu1 (!%p575_p9), %vm5131_vm0, %v5130_v1  ;;  %v5402_v23 = vld [vmem:[%s6164_s5] sm:$0x1] (!%p575_p9)  ;;  %v5421_v50 = vld [vmem:[%s6164_s5 + $0x1] sm:$0x1] (!%p575_p9) }
  0x1b   : > { %787 = vmatprep.mubr.bf16.mxu0 (!%p575_p9), %v5132_v4  ;;  %p636_p10 = scmp.lt.s32.totalorder (!%p575_p9), %s5264_s2, 1  ;;  %s6211_s0 = sld [smem:[#allocation14_spill]] (!%p575_p9)  ;;  %v5406_v34 = vshrl.u32 (!%p575_p9), %v665_v29, 7  ;;  %vm820_vm1 = vcmask (!%p575_p9), 261120   ;;  %vm2144_vm2 = vcmask (!%p575_p9), 1040384   ;;  %vm2146_vm3 = vcmask (!%p575_p9), 1041408  }
  0x1c   : > { %s6212_s4 = sld [smem:[#allocation13_spill]] (!%p575_p9)  ;;  %s5133_s28 = smov (!%p575_p9), 64   ;;  %vm2148_vm4 = vcmask (!%p575_p9), 1042432   ;;  %vm2150_vm5 = vcmask (!%p575_p9), 1043456   ;;  %vm2152_vm6 = vcmask (!%p575_p9), 1044480   ;;  %vm2154_vm7 = vcmask (!%p575_p9), 1045504  }
  0x1d   : > { %v671_v35 = vsub.s32 (!%p575_p9), 1, %v5406_v34  ;;  %s6213_s3 = sld [smem:[#allocation16_spill]] (!%p575_p9)  ;;  %v667_v43 = vsub.s32 (!%p575_p9), 0, %v5406_v34  ;;  %s5134_s23 = smov (!%p575_p9), 96   ;;  %vm2156_vm8 = vcmask (!%p575_p9), 1046528   ;;  %vm2379_vm9 = vcmask (!%p575_p9), 64512  }
  0x1e   : > { %s5135_s1 = smov (!%p575_p9), 32   ;;  %vm2697_vm10 = vcmp.eq.s32.totalorder (!%p575_p9), %v5406_v34, 7  ;;  %vm2694_vm11 = vcmp.eq.s32.totalorder (!%p575_p9), %v5406_v34, 0  ;;  %vm2708_vm12 = vcmask (!%p575_p9), 130048   ;;  %vm2743_vm13 = vcmask (!%p575_p9), 392192  }
  0x1f   : > { %v4863_v0 = vld [vmem:[%s6209_s21 + $0x4] ss:$8 sps:$4 sm:$0xff] (!%p575_p9)   ;;  %v4866_v3 = vld [vmem:[%s6209_s21] ss:$8 sps:$4 sm:$0xff] (!%p575_p9)   ;;  %v4867_v5 = vld [vmem:[%s6209_s21 + $0x14] ss:$8 sps:$4 sm:$0xff] (!%p575_p9)  }
  0x20   : > { %v5298_v2 = vld [vmem:[%s6210_s27] sm:$0xff] (!%p575_p9)   ;;  %755 = vmatprep.subr.bf16.mxu0 (!%p575_p9), %v4863_v0  ;;  %v5314_v6 = vld [vmem:[%s6210_s27 + $0x8] sm:$0xff] (!%p575_p9)   ;;  %v4870_v7 = vld [vmem:[%s6209_s21 + $0x10] ss:$8 sps:$4 sm:$0xff] (!%p575_p9)  }
  0x21   : > { %4480 = vmatpush3.bf16.msra.mxu1 %v5298_v2  ;;  %756 = vmatpush1.bf16.msra.mxu0 %v4866_v3  ;;  %v4871_v8 = vld [vmem:[%s6209_s21 + $0x24] ss:$8 sps:$4 sm:$0xff]   ;;  %s5324_s30 = scalar_select %p636_p10, %s5264_s2, 1  ;;  %v4873_v9 = vld [vmem:[%s6209_s21 + $0x20] ss:$8 sps:$4 sm:$0xff]   ;;  %v5353_v14 = vld [vmem:[%s6210_s27 + $0x10] sm:$0xff]  }
  0x22   : > { %4481 = vmatprep.subr.bf16.mxu1 %v5130_v1  ;;  %757 = vmatprep.subr.bf16.mxu0 %v4867_v5  ;;  %v4874_v10 = vld [vmem:[%s6209_s21 + $0x34] ss:$8 sps:$4 sm:$0xff]   ;;  %v4876_v11 = vld [vmem:[%s6209_s21 + $0x30] ss:$8 sps:$4 sm:$0xff]   ;;  %v4877_v12 = vld [vmem:[%s6209_s21 + $0x44] ss:$8 sps:$4 sm:$0xff]  }
  0x23   : > { %s4353_s29 = sshll.u32 %s5324_s30, 4  ;;  %v4879_v13 = vld [vmem:[%s6209_s21 + $0x40] ss:$8 sps:$4 sm:$0xff]   ;;  %v4880_v15 = vld [vmem:[%s6209_s21 + $0x54] ss:$8 sps:$4 sm:$0xff]   ;;  %s5136_s2 = smov 16  }
  0x24   : > { %s5342_s24 = scalar_lea.vmem %s6211_s0, %s4353_s29  ;;  %s4135_s29 = sshll.u32 %s5324_s30, 2  ;;  %v5363_v16 = vld [vmem:[%s6210_s27 + $0x18] sm:$0xff]   ;;  %v4883_v18 = vld [vmem:[%s6209_s21 + $0x64] ss:$8 sps:$4 sm:$0xff]   ;;  %v4885_v19 = vld [vmem:[%s6209_s21 + $0x60] ss:$8 sps:$4 sm:$0xff]  }
  0x25   : > { %4482 = vmatpush3.bf16.msra.mxu1 %v5314_v6  ;;  %758 = vmatpush1.bf16.msra.mxu0 %v4870_v7  ;;  %v4882_v17 = vld [vmem:[%s6209_s21 + $0x50] ss:$8 sps:$4 sm:$0xff]   ;;  %v4886_v20 = vld [vmem:[%s6209_s21 + $0x74] ss:$8 sps:$4 sm:$0xff]   ;;  %s639_s19 = scalar_lea.vmem %s6212_s4, %s4135_s29  ;;  %v663_v36 = vld [vmem:[%s6213_s3] sm:$0x3] }
  0x26   : > { %4487 = vmatprep.subr.bf16.mxu1 %v5130_v1  ;;  %759 = vmatprep.subr.bf16.mxu0 %v4871_v8  ;;  %v4888_v21 = vld [vmem:[%s6209_s21 + $0x70] ss:$8 sps:$4 sm:$0xff]   ;;  %v646_v22 = vld [vmem:[%s639_s19] sm:$0xf]  ;;  %v672_v37 = vrot.slane %v663_v36, %v671_v35  ;;  %v668_v44 = vrot.slane %v663_v36, %v667_v43  ;;  %s633_s29 = sand.u32 1, %s5120_s22   ;;  %s6215_s3 = sld [smem:[#allocation18_spill]] }
  0x27   : > { %v4315_v34 = vld [vmem:[%s6172_s13 + $0x2] ss:$0 sm:$0xff]  ;;  %s6217_s4 = sld [smem:[#allocation19_spill]]  ;;  %s5137_s30 = smov [#allocation2]  }
  0x28   : > { %4484 = vmatmul.mubr.bf16.vlgmr.msra.gmra.mrb[0].mxu1 %v5132_v4  ;;  %s5070_s0 = sshll.u32 %s5137_s30, 4  ;;  %s5071_s0 = int_to_ptr.vmem [resolvable:$false] %s5070_s0 }
  0x29   : > { %4491 = vmatprep.mubr.msk.bf16.mxu1 %vm5131_vm0, %v5130_v1  ;;  %760 = vmatpush1.bf16.msra.mxu0 %v4873_v9 }
  0x2a   : > { %761 = vmatprep.subr.bf16.mxu0 %v4874_v10  ;;  %4488 = vmatpush3.bf16.msra.mxu1 %v5353_v14 }
  0x2b   : > { %4489 = vmatprep.subr.bf16.mxu1 %v5130_v1 }
  0x2d   : > { %762 = vmatpush1.bf16.msra.mxu0 %v4876_v11 }
  0x2e   : > { %763 = vmatprep.subr.bf16.mxu0 %v4877_v12  ;;  %4490 = vmatpush3.bf16.msra.mxu1 %v5363_v16 }
  0x2f   : > { %4495 = vmatprep.subr.bf16.mxu1 %v5130_v1 }
  0x31   : > { %764 = vmatpush1.bf16.msra.mxu0 %v4879_v13  ;;  %4492 = vmatmul.mubr.bf16.vlgmr.msra.gmra.mrb[4].mxu1 %v5132_v4 }
  0x32   : > { %765 = vmatprep.subr.bf16.mxu0 %v4880_v15  ;;  %4496 = vmatpush3.bf16.msra.mxu1 %v5298_v2 }
  0x33   : > { %4497 = vmatprep.subr.bf16.mxu1 %v5130_v1  ;;  %4499 = vmatprep.mubr.msk.bf16.mxu1 %vm5131_vm0, %v5130_v1 }
  0x35   : > { %766 = vmatpush1.bf16.msra.mxu0 %v4882_v17 }
  0x36   : > { %767 = vmatprep.subr.bf16.mxu0 %v4883_v18  ;;  %4498 = vmatpush3.bf16.msra.mxu1 %v5314_v6 }
  0x37   : > { %4503 = vmatprep.subr.bf16.mxu1 %v5130_v1 }
  0x39   : > { %768 = vmatpush1.bf16.msra.mxu0 %v4885_v19 }
  0x3a   : > { %769 = vmatprep.subr.bf16.mxu0 %v4886_v20 }
  0x3d   : > { %770 = vmatpush1.bf16.msra.mxu0 %v4888_v21 }
  0x3e   : > { %4511 = vmatprep.subr.bf16.mxu0 %v5130_v1 }
  0x40   : > { %788 = vmatmul.mubr.bf16.vlgmr.msra.gmra.mrb[0].mxu0 %v646_v22 }
  0x41   : > { %4512 = vmatpush3.bf16.msra.mxu0 %v5298_v2  ;;  %4515 = vmatprep.mubr.msk.bf16.mxu0 %vm5131_vm0, %v5130_v1 }
  0x42   : > { %4513 = vmatprep.subr.bf16.mxu0 %v5130_v1 }
  0x45   : > { %4514 = vmatpush3.bf16.msra.mxu0 %v5314_v6 }
  0x46   : > { %4527 = vmatprep.subr.bf16.mxu0 %v5130_v1 }
  0xfb   : > { %v858_v24 = vpop.f32.mrb[0].mxu1 }
  0xfc   : > { %v859_v25 = vadd.f32 %v858_v24, %v5402_v23  ;;  %v4485_v26 = vpop.f32.mrb[1].mxu1 }
  0xfd   : > { %v861_v27 = vpop.f32.mrb[2].mxu1 }
  0xfe   : > { %872 = vrot.lane.b32.xlu0 %v859_v25, %s5133_s28  ;;  %v4486_v28 = vpop.f32.mrb[3].mxu1 }
 0x104   : > { %v936_v30 = vpop.f32.mrb[4].mxu1 }
 0x105   : > { %v4493_v31 = vpop.f32.mrb[5].mxu1  ;;  %v937_v51 = vadd.f32 %v5421_v50, %v936_v30 }
 0x106   : > { %v939_v32 = vpop.f32.mrb[6].mxu1 }
 0x107   : > { %v4494_v33 = vpop.f32.mrb[7].mxu1  ;;  %v943_v55 = vrot.slane %v937_v51, 1 }
 0x113   : > { %v789_v38 = vpop.f32.mrb[0].mxu0 }
 0x114   : > { %v791_v39 = vpop.f32.mrb[1].mxu0  ;;  %v5415_v45 = vadd.f32 %v789_v38, %v668_v44 }
 0x115   : > { %v5412_v40 = vadd.f32 %v791_v39, %v672_v37  ;;  %v793_v41 = vpop.f32.mrb[2].mxu0 }
 0x116   : > { %v794_v42 = vpop.f32.mrb[3].mxu0  ;;  %v864_v46 = vadd.f32 %v859_v25, %v5415_v45 }
 0x118   : > { %v4161_v47 = vmul.f32 -1.442695, %v864_v46 }
 0x11a   : > { %4932 = vpow2.f32 %v4161_v47 }
 0x124   : > { %v4933_v48 = vpop.eup %4932 }
 0x125   : > { %v868_v49 = vadd.f32 1.0, %v4933_v48 }
 0x127   : > { %4934 = vrcp.f32 %v868_v49 }
 0x131   : > { %v4935_v52 = vpop.eup %4934 }
 0x132   : > { %v882_v59 = vsub.f32 1.0, %v4935_v52  ;;  %v888_v61 = vmul.f32 0.0, %v4935_v52 }
 0x170   : > { %v873_v53 = vpop.permute.xlu0 %872 }
 0x171   : > { %v875_v54 = vmul.f32 %v4935_v52, %v873_v53 }
 0x173   : > { %877 = vrot.lane.b32.xlu0 %v875_v54, %s5133_s28 }
 0x177   : > { %944 = vrot.lane.b32.xlu0 %v943_v55, %s5134_s23 }
 0x1e5   : > { %v878_v56 = vpop.permute.xlu0 %877 }
 0x1e6   : > { %v880_v57 = vadd.f32 %v878_v56, %v5415_v45 }
 0x1e8   : > { %4936 = vtanh.f32 %v880_v57 }
 0x1e9   : > { %v945_v3 = vpop.permute.xlu0 %944 }
 0x1ea   : > { %v947_v4 = vadd.f32 %v945_v3, %v5415_v45  ;;  %v954_v18 = vadd.f32 %v945_v3, %v5412_v40 }
 0x1ec   : > { %v4164_v5 = vmul.f32 -1.442695, %v947_v4  ;;  %v4165_v22 = vmul.f32 -1.442695, %v954_v18 }
 0x1ee   : > { %4938 = vpow2.f32 %v4164_v5 }
 0x1f2   : > { %v4937_v58 = vpop.eup %4936 }
 0x1f3   : > { %884 = vrot.lane.b32.xlu1 %v4937_v58, %s5134_s23 }
 0x1f8   : > { %v4939_v7 = vpop.eup %4938 }
 0x1f9   : > { %v951_v8 = vadd.f32 1.0, %v4939_v7 }
 0x1fb   : > { %4940 = vrcp.f32 %v951_v8 }
 0x205   : > { %v4941_v10 = vpop.eup %4940 }
 0x265   : > { %v885_v60 = vpop.permute.xlu1 %884 }
 0x266   : > { %v887_v62 = vmul.f32 %v885_v60, %v882_v59 }
 0x268   : > { %v5428_v63 = vadd.f32 %v888_v61, %v887_v62 }
 0x26a   : > { %v979_v0 = vpack.c.bf16 %v5428_v63, %v5428_v63  ;;  %v1053_v59 = vrot.slane %v5428_v63, 7 }
 0x26c   : > { %981 = vrot.lane.b32.xlu1 %v979_v0, %s5134_s23 }
 0x270   : > { %961 = vrot.lane.b32.xlu1 %v943_v55, %s5135_s1 }
 0x2de   : > { %v982_v9 = vpop.permute.xlu1 %981 }
 0x2df   : > { %4500 = vmatmul.mubr.msk.bf16.vlgmr.msra.gmra.mrb[8].mxu1 %vm820_vm1, %v982_v9 }
 0x2e0   : > { %4504 = vmatpush3.bf16.msra.mxu1 %v5353_v14  ;;  %4507 = vmatprep.mubr.msk.bf16.mxu1 %vm5131_vm0, %v5130_v1 }
 0x2e1   : > { %4505 = vmatprep.subr.bf16.mxu1 %v5130_v1 }
 0x2e2   : > { %v962_v11 = vpop.permute.xlu1 %961 }
 0x2e3   : > { %v964_v12 = vmul.f32 %v4941_v10, %v962_v11 }
 0x2e4   : > { %4506 = vmatpush3.bf16.msra.mxu1 %v5363_v16 }
 0x2e5   : > { %966 = vrot.lane.b32.xlu0 %v964_v12, %s5133_s28  ;;  %4519 = vmatprep.subr.bf16.mxu1 %v5130_v1 }
 0x357   : > { %v967_v13 = vpop.permute.xlu0 %966 }
 0x358   : > { %v969_v15 = vadd.f32 %v967_v13, %v5412_v40 }
 0x35a   : > { %4942 = vtanh.f32 %v969_v15 }
 0x35b   : > { %4944 = vpow2.f32 %v4165_v22 }
 0x364   : > { %v4943_v17 = vpop.eup %4942 }
 0x365   : > { %973 = vrot.lane.b32.xlu1 %v4943_v17, %s5134_s23  ;;  %v4945_v27 = vpop.eup %4944 }
 0x366   : > { %v958_v28 = vadd.f32 1.0, %v4945_v27 }
 0x368   : > { %4946 = vrcp.f32 %v958_v28 }
 0x372   : > { %v4947_v29 = vpop.eup %4946 }
 0x373   : > { %v971_v30 = vsub.f32 1.0, %v4947_v29  ;;  %v977_v32 = vmul.f32 0.0, %v4947_v29 }
 0x3b2   : > { %v1020_v19 = vpop.f32.mrb[8].mxu1 }
 0x3b3   : > { %v1021_v20 = vadd.f32 %v1020_v19, %v5402_v23  ;;  %v4501_v21 = vpop.f32.mrb[9].mxu1 }
 0x3b4   : > { %v1023_v24 = vpop.f32.mrb[10].mxu1 }
 0x3b5   : > { %v1027_v25 = vrot.slane %v1021_v20, 7  ;;  %v4502_v26 = vpop.f32.mrb[11].mxu1 }
 0x3b7   : > { %1036 = vrot.lane.b32.xlu0 %v1027_v25, %s5133_s28  ;;  %v1029_v39 = vadd.f32 %v1027_v25, %v5415_v45 }
 0x3b9   : > { %v4167_v41 = vmul.f32 -1.442695, %v1029_v39 }
 0x3bb   : > { %4948 = vpow2.f32 %v4167_v41 }
 0x3c5   : > { %v4949_v42 = vpop.eup %4948 }
 0x3c6   : > { %v1033_v43 = vadd.f32 1.0, %v4949_v42 }
 0x3c8   : > { %4950 = vrcp.f32 %v1033_v43 }
 0x3d2   : > { %v4951_v44 = vpop.eup %4950 }
 0x3d3   : > { %v1046_v58 = vsub.f32 1.0, %v4951_v44  ;;  %v1055_v61 = vmul.f32 %v4951_v44, %v1053_v59 }
 0x3d7   : > { %v974_v31 = vpop.permute.xlu1 %973 }
 0x3d8   : > { %v976_v33 = vmul.f32 %v974_v31, %v971_v30 }
 0x3da   : > { %v5448_v35 = vadd.f32 %v977_v32, %v976_v33 }
 0x3dc   : > { %v1057_v36 = vpack.c.bf16 %v5448_v35, %v5448_v35  ;;  %v1141_v33 = vrot.slane %v5448_v35, 1 }
 0x3de   : > { %v1059_v37 = vshrl.u32 %v1057_v36, 16 }
 0x3e0   : > { %v1061_v38 = vrot.slane %v1059_v37, 3 }
 0x3e2   : > { %4508 = vmatmul.mubr.msk.bf16.vlgmr.msra.gmra.mrb[12].mxu1 %vm820_vm1, %v1061_v38 }
 0x3e3   : > { %4520 = vmatpush3.bf16.msra.mxu1 %v5353_v14  ;;  %4523 = vmatprep.mubr.msk.bf16.mxu1 %vm5131_vm0, %v5130_v1 }
 0x3e4   : > { %4521 = vmatprep.subr.bf16.mxu1 %v5130_v1 }
 0x3e7   : > { %4522 = vmatpush3.bf16.msra.mxu1 %v5363_v16 }
 0x3e8   : > { %4535 = vmatprep.subr.bf16.mxu1 %v5130_v1 }
 0x429   : > { %v1037_v46 = vpop.permute.xlu0 %1036 }
 0x42a   : > { %v1039_v47 = vmul.f32 %v4951_v44, %v1037_v46 }
 0x42c   : > { %1041 = vrot.lane.b32.xlu1 %v1039_v47, %s5133_s28 }
 0x49e   : > { %v1042_v48 = vpop.permute.xlu1 %1041 }
 0x49f   : > { %v1044_v49 = vadd.f32 %v1042_v48, %v5415_v45 }
 0x4a1   : > { %4952 = vtanh.f32 %v1044_v49 }
 0x4ab   : > { %v4953_v51 = vpop.eup %4952 }
 0x4ac   : > { %1048 = vrot.lane.b32.xlu0 %v4953_v51, %s5134_s23 }
 0x4b5   : > { %v1099_v52 = vpop.f32.mrb[12].mxu1 }
 0x4b6   : > { %v1100_v53 = vadd.f32 %v5421_v50, %v1099_v52  ;;  %v4509_v54 = vpop.f32.mrb[13].mxu1 }
 0x4b7   : > { %v1102_v55 = vpop.f32.mrb[14].mxu1 }
 0x4b8   : > { %v1106_v56 = vrot.slane %v1100_v53, 2  ;;  %v4510_v57 = vpop.f32.mrb[15].mxu1 }
 0x4ba   : > { %1107 = vrot.lane.b32.xlu0 %v1106_v56, %s5134_s23 }
 0x51e   : > { %v1049_v60 = vpop.permute.xlu0 %1048 }
 0x51f   : > { %v1051_v62 = vmul.f32 %v1049_v60, %v1046_v58 }
 0x521   : > { %v5466_v0 = vadd.f32 %v1055_v61, %v1051_v62 }
 0x523   : > { %v1145_v3 = vpack.c.bf16 %v5466_v0, %v5466_v0  ;;  %v1221_v62 = vrot.slane %v5466_v0, 7 }
 0x525   : > { %v1147_v4 = vshrl.u32 %v1145_v3, 16 }
 0x527   : > { %1149 = vrot.lane.b32.xlu1 %v1147_v4, %s5134_s23 }
 0x52b   : > { %1124 = vrot.lane.b32.xlu1 %v1106_v56, %s5135_s1 }
 0x52c   : > { %v1108_v5 = vpop.permute.xlu0 %1107 }
 0x52d   : > { %v1110_v7 = vadd.f32 %v1108_v5, %v5415_v45  ;;  %v1117_v20 = vadd.f32 %v1108_v5, %v5412_v40 }
 0x52f   : > { %v4169_v8 = vmul.f32 -1.442695, %v1110_v7  ;;  %v4170_v25 = vmul.f32 -1.442695, %v1117_v20 }
 0x531   : > { %4954 = vpow2.f32 %v4169_v8  ;;  %v2145_v8 = vsel %vm2144_vm2, %v5428_v63, %v5466_v0 }
 0x53b   : > { %v4955_v9 = vpop.eup %4954 }
 0x53c   : > { %v1114_v10 = vadd.f32 1.0, %v4955_v9 }
 0x53e   : > { %4956 = vrcp.f32 %v1114_v10 }
 0x548   : > { %v4957_v12 = vpop.eup %4956 }
 0x599   : > { %v1150_v11 = vpop.permute.xlu1 %1149 }
 0x59a   : > { %4516 = vmatmul.mubr.msk.bf16.vlgmr.msra.gmra.mrb[4].mxu0 %vm820_vm1, %v1150_v11 }
 0x59b   : > { %4528 = vmatpush3.bf16.msra.mxu0 %v5298_v2  ;;  %4531 = vmatprep.mubr.msk.bf16.mxu0 %vm5131_vm0, %v5130_v1 }
 0x59c   : > { %4529 = vmatprep.subr.bf16.mxu0 %v5130_v1 }
 0x59d   : > { %v1125_v13 = vpop.permute.xlu1 %1124 }
 0x59e   : > { %v1127_v15 = vmul.f32 %v4957_v12, %v1125_v13 }
 0x59f   : > { %4530 = vmatpush3.bf16.msra.mxu0 %v5314_v6 }
 0x5a0   : > { %1129 = vrot.lane.b32.xlu0 %v1127_v15, %s5133_s28  ;;  %4543 = vmatprep.subr.bf16.mxu0 %v5130_v1 }
 0x612   : > { %v1130_v17 = vpop.permute.xlu0 %1129 }
 0x613   : > { %v1132_v18 = vadd.f32 %v1130_v17, %v5412_v40 }
 0x615   : > { %4958 = vtanh.f32 %v1132_v18 }
 0x616   : > { %4960 = vpow2.f32 %v4170_v25 }
 0x61f   : > { %v4959_v19 = vpop.eup %4958 }
 0x620   : > { %1136 = vrot.lane.b32.xlu1 %v4959_v19, %s5134_s23  ;;  %v4961_v29 = vpop.eup %4960 }
 0x621   : > { %v1121_v30 = vadd.f32 1.0, %v4961_v29 }
 0x623   : > { %4962 = vrcp.f32 %v1121_v30 }
 0x62d   : > { %v4963_v31 = vpop.eup %4962 }
 0x62e   : > { %v1134_v32 = vsub.f32 1.0, %v4963_v31  ;;  %v1143_v37 = vmul.f32 %v4963_v31, %v1141_v33 }
 0x66d   : > { %v1188_v21 = vpop.f32.mrb[4].mxu0 }
 0x66e   : > { %v1189_v22 = vadd.f32 %v1188_v21, %v5402_v23  ;;  %v4517_v24 = vpop.f32.mrb[5].mxu0 }
 0x66f   : > { %v1191_v26 = vpop.f32.mrb[6].mxu0 }
 0x670   : > { %v1195_v27 = vrot.slane %v1189_v22, 6  ;;  %v4518_v28 = vpop.f32.mrb[7].mxu0 }
 0x672   : > { %1204 = vrot.lane.b32.xlu0 %v1195_v27, %s5133_s28  ;;  %v1197_v43 = vadd.f32 %v1195_v27, %v5415_v45 }
 0x674   : > { %v4172_v44 = vmul.f32 -1.442695, %v1197_v43 }
 0x676   : > { %4964 = vpow2.f32 %v4172_v44 }
 0x680   : > { %v4965_v46 = vpop.eup %4964 }
 0x681   : > { %v1201_v47 = vadd.f32 1.0, %v4965_v46 }
 0x683   : > { %4966 = vrcp.f32 %v1201_v47 }
 0x68d   : > { %v4967_v48 = vpop.eup %4966 }
 0x68e   : > { %v1214_v61 = vsub.f32 1.0, %v4967_v48  ;;  %v1223_v4 = vmul.f32 %v4967_v48, %v1221_v62 }
 0x692   : > { %v1137_v36 = vpop.permute.xlu1 %1136 }
 0x693   : > { %v1139_v38 = vmul.f32 %v1137_v36, %v1134_v32 }
 0x695   : > { %v5487_v39 = vadd.f32 %v1143_v37, %v1139_v38 }
 0x697   : > { %v1225_v41 = vpack.c.bf16 %v5487_v39, %v5487_v39  ;;  %v1307_v31 = vrot.slane %v5487_v39, 1 }
 0x699   : > { %v1227_v42 = vrot.slane %v1225_v41, 3 }
 0x69b   : > { %4524 = vmatmul.mubr.msk.bf16.vlgmr.msra.gmra.mrb[16].mxu1 %vm820_vm1, %v1227_v42 }
 0x69c   : > { %4536 = vmatpush3.bf16.msra.mxu1 %v5353_v14  ;;  %4539 = vmatprep.mubr.msk.bf16.mxu1 %vm5131_vm0, %v5130_v1 }
 0x69d   : > { %4537 = vmatprep.subr.bf16.mxu1 %v5130_v1 }
 0x6a0   : > { %4538 = vmatpush3.bf16.msra.mxu1 %v5363_v16 }
 0x6a1   : > { %4551 = vmatprep.subr.bf16.mxu1 %v5130_v1 }
 0x6e4   : > { %v1205_v49 = vpop.permute.xlu0 %1204 }
 0x6e5   : > { %v1207_v51 = vmul.f32 %v4967_v48, %v1205_v49 }
 0x6e7   : > { %1209 = vrot.lane.b32.xlu1 %v1207_v51, %s5133_s28 }
 0x759   : > { %v1210_v52 = vpop.permute.xlu1 %1209 }
 0x75a   : > { %v1212_v53 = vadd.f32 %v1210_v52, %v5415_v45 }
 0x75c   : > { %4968 = vtanh.f32 %v1212_v53 }
 0x766   : > { %v4969_v54 = vpop.eup %4968 }
 0x767   : > { %1216 = vrot.lane.b32.xlu0 %v4969_v54, %s5134_s23 }
 0x76e   : > { %v1265_v55 = vpop.f32.mrb[16].mxu1 }
 0x76f   : > { %v1266_v56 = vadd.f32 %v5421_v50, %v1265_v55  ;;  %v4525_v57 = vpop.f32.mrb[17].mxu1 }
 0x770   : > { %v1268_v58 = vpop.f32.mrb[18].mxu1 }
 0x771   : > { %v1272_v59 = vrot.slane %v1266_v56, 3  ;;  %v4526_v60 = vpop.f32.mrb[19].mxu1 }
 0x773   : > { %1273 = vrot.lane.b32.xlu1 %v1272_v59, %s5134_s23 }
 0x777   : > { %1290 = vrot.lane.b32.xlu1 %v1272_v59, %s5135_s1 }
 0x7d9   : > { %v1217_v3 = vpop.permute.xlu0 %1216 }
 0x7da   : > { %v1219_v5 = vmul.f32 %v1217_v3, %v1214_v61 }
 0x7dc   : > { %v5506_v7 = vadd.f32 %v1223_v4, %v1219_v5 }
 0x7de   : > { %v5513_v9 = vsel %vm2146_vm3, %v2145_v8, %v5506_v7  ;;  %v1311_v10 = vpack.c.bf16 %v5506_v7, %v5506_v7 }
 0x7e0   : > { %v1313_v11 = vrot.slane %v1311_v10, 1 }
 0x7e2   : > { %1314 = vrot.lane.b32.xlu0 %v1313_v11, %s5134_s23 }
 0x7e5   : > { %v1274_v12 = vpop.permute.xlu1 %1273 }
 0x7e6   : > { %v1276_v13 = vadd.f32 %v1274_v12, %v5415_v45  ;;  %v1283_v25 = vadd.f32 %v1274_v12, %v5412_v40 }
 0x7e8   : > { %v4174_v15 = vmul.f32 -1.442695, %v1276_v13  ;;  %v4175_v26 = vmul.f32 -1.442695, %v1283_v25 }
 0x7e9   : > { %v1291_v63 = vpop.permute.xlu1 %1290 }
 0x7ea   : > { %4970 = vpow2.f32 %v4174_v15 }
 0x7f4   : > { %v4971_v17 = vpop.eup %4970 }
 0x7f5   : > { %v1280_v18 = vadd.f32 1.0, %v4971_v17 }
 0x7f7   : > { %4972 = vrcp.f32 %v1280_v18  ;;  %v1386_v18 = vrot.slane %v5506_v7, 7 }
 0x801   : > { %v4973_v19 = vpop.eup %4972 }
 0x802   : > { %v1293_v0 = vmul.f32 %v4973_v19, %v1291_v63 }
 0x804   : > { %1295 = vrot.lane.b32.xlu0 %v1293_v0, %s5133_s28 }
 0x854   : > { %v1315_v20 = vpop.permute.xlu0 %1314 }
 0x855   : > { %4532 = vmatmul.mubr.msk.bf16.vlgmr.msra.gmra.mrb[8].mxu0 %vm820_vm1, %v1315_v20 }
 0x856   : > { %4544 = vmatpush3.bf16.msra.mxu0 %v5298_v2  ;;  %4547 = vmatprep.mubr.msk.bf16.mxu0 %vm5131_vm0, %v5130_v1 }
 0x857   : > { %4545 = vmatprep.subr.bf16.mxu0 %v5130_v1 }
 0x85a   : > { %4546 = vmatpush3.bf16.msra.mxu0 %v5314_v6 }
 0x85b   : > { %4559 = vmatprep.subr.bf16.mxu0 %v5130_v1 }
 0x876   : > { %v1296_v21 = vpop.permute.xlu0 %1295 }
 0x877   : > { %v1298_v22 = vadd.f32 %v1296_v21, %v5412_v40 }
 0x879   : > { %4974 = vtanh.f32 %v1298_v22 }
 0x87a   : > { %4976 = vpow2.f32 %v4175_v26 }
 0x883   : > { %v4975_v24 = vpop.eup %4974 }
 0x884   : > { %1302 = vrot.lane.b32.xlu1 %v4975_v24, %s5134_s23  ;;  %v4977_v27 = vpop.eup %4976 }
 0x885   : > { %v1287_v28 = vadd.f32 1.0, %v4977_v27 }
 0x887   : > { %4978 = vrcp.f32 %v1287_v28 }
 0x891   : > { %v4979_v29 = vpop.eup %4978 }
 0x892   : > { %v1300_v30 = vsub.f32 1.0, %v4979_v29  ;;  %v1309_v33 = vmul.f32 %v4979_v29, %v1307_v31 }
 0x8f6   : > { %v1303_v32 = vpop.permute.xlu1 %1302 }
 0x8f7   : > { %v1305_v36 = vmul.f32 %v1303_v32, %v1300_v30 }
 0x8f9   : > { %v5531_v37 = vadd.f32 %v1309_v33, %v1305_v36 }
 0x8fb   : > { %v1390_v38 = vpack.c.bf16 %v5531_v37, %v5531_v37 }
 0x8fd   : > { %v1392_v41 = vshrl.u32 %v1390_v38, 16 }
 0x8ff   : > { %v1394_v42 = vrot.slane %v1392_v41, 2  ;;  %v1474_v41 = vrot.slane %v5531_v37, 1 }
 0x901   : > { %4540 = vmatmul.mubr.msk.bf16.vlgmr.msra.gmra.mrb[20].mxu1 %vm820_vm1, %v1394_v42 }
 0x902   : > { %4552 = vmatpush3.bf16.msra.mxu1 %v5353_v14  ;;  %4555 = vmatprep.mubr.msk.bf16.mxu1 %vm5131_vm0, %v5130_v1 }
 0x903   : > { %4553 = vmatprep.subr.bf16.mxu1 %v5130_v1 }
 0x906   : > { %4554 = vmatpush3.bf16.msra.mxu1 %v5363_v16 }
 0x907   : > { %4567 = vmatprep.subr.bf16.mxu1 %v5130_v1 }
 0x928   : > { %v1353_v43 = vpop.f32.mrb[8].mxu0 }
 0x929   : > { %v1354_v44 = vadd.f32 %v1353_v43, %v5402_v23  ;;  %v4533_v46 = vpop.f32.mrb[9].mxu0 }
 0x92a   : > { %v1356_v47 = vpop.f32.mrb[10].mxu0 }
 0x92b   : > { %v1360_v48 = vrot.slane %v1354_v44, 5  ;;  %v4534_v49 = vpop.f32.mrb[11].mxu0 }
 0x92d   : > { %1369 = vrot.lane.b32.xlu0 %v1360_v48, %s5133_s28  ;;  %v1362_v51 = vadd.f32 %v1360_v48, %v5415_v45 }
 0x92f   : > { %v4177_v52 = vmul.f32 -1.442695, %v1362_v51 }
 0x931   : > { %4980 = vpow2.f32 %v4177_v52 }
 0x93b   : > { %v4981_v53 = vpop.eup %4980 }
 0x93c   : > { %v1366_v54 = vadd.f32 1.0, %v4981_v53 }
 0x93e   : > { %4982 = vrcp.f32 %v1366_v54 }
 0x948   : > { %v4983_v55 = vpop.eup %4982 }
 0x949   : > { %v1379_v17 = vsub.f32 1.0, %v4983_v55  ;;  %v1388_v63 = vmul.f32 %v4983_v55, %v1386_v18 }
 0x99f   : > { %v1370_v56 = vpop.permute.xlu0 %1369 }
 0x9a0   : > { %v1372_v57 = vmul.f32 %v4983_v55, %v1370_v56 }
 0x9a2   : > { %1374 = vrot.lane.b32.xlu1 %v1372_v57, %s5133_s28 }
 0x9d4   : > { %v1432_v58 = vpop.f32.mrb[20].mxu1 }
 0x9d5   : > { %v1433_v59 = vadd.f32 %v5421_v50, %v1432_v58  ;;  %v4541_v60 = vpop.f32.mrb[21].mxu1 }
 0x9d6   : > { %v1435_v61 = vpop.f32.mrb[22].mxu1 }
 0x9d7   : > { %v1439_v62 = vrot.slane %v1433_v59, 4  ;;  %v4542_v3 = vpop.f32.mrb[23].mxu1 }
 0x9d9   : > { %1440 = vrot.lane.b32.xlu1 %v1439_v62, %s5134_s23 }
 0xa14   : > { %v1375_v4 = vpop.permute.xlu1 %1374 }
 0xa15   : > { %v1377_v5 = vadd.f32 %v1375_v4, %v5415_v45 }
 0xa17   : > { %4984 = vtanh.f32 %v1377_v5 }
 0xa21   : > { %v4985_v8 = vpop.eup %4984 }
 0xa22   : > { %1381 = vrot.lane.b32.xlu0 %v4985_v8, %s5134_s23 }
 0xa26   : > { %1457 = vrot.lane.b32.xlu0 %v1439_v62, %s5135_s1 }
 0xa4b   : > { %v1441_v10 = vpop.permute.xlu1 %1440 }
 0xa4c   : > { %v1443_v11 = vadd.f32 %v1441_v10, %v5415_v45  ;;  %v1450_v31 = vadd.f32 %v1441_v10, %v5412_v40 }
 0xa4e   : > { %v4179_v12 = vmul.f32 -1.442695, %v1443_v11  ;;  %v4180_v32 = vmul.f32 -1.442695, %v1450_v31 }
 0xa50   : > { %4986 = vpow2.f32 %v4179_v12 }
 0xa5a   : > { %v4987_v13 = vpop.eup %4986 }
 0xa5b   : > { %v1447_v15 = vadd.f32 1.0, %v4987_v13 }
 0xa5d   : > { %4988 = vrcp.f32 %v1447_v15 }
 0xa67   : > { %v4989_v21 = vpop.eup %4988 }
 0xa94   : > { %v1382_v19 = vpop.permute.xlu0 %1381 }
 0xa95   : > { %v1384_v0 = vmul.f32 %v1382_v19, %v1379_v17 }
 0xa97   : > { %v5553_v20 = vadd.f32 %v1388_v63, %v1384_v0 }
 0xa98   : > { %v1458_v22 = vpop.permute.xlu0 %1457 }
 0xa99   : > { %v5558_v24 = vsel %vm2148_vm4, %v5513_v9, %v5553_v20  ;;  %v1460_v25 = vmul.f32 %v4989_v21, %v1458_v22  ;;  %v1478_v26 = vpack.c.bf16 %v5553_v20, %v5553_v20  ;;  %v1555_v22 = vrot.slane %v5553_v20, 7 }
 0xa9b   : > { %1462 = vrot.lane.b32.xlu0 %v1460_v25, %s5133_s28  ;;  %v1480_v7 = vshrl.u32 %v1478_v26, 16 }
 0xa9d   : > { %v1482_v27 = vrot.slane %v1480_v7, 1 }
 0xa9f   : > { %1483 = vrot.lane.b32.xlu1 %v1482_v27, %s5134_s23 }
 0xb0d   : > { %v1463_v28 = vpop.permute.xlu0 %1462 }
 0xb0e   : > { %v1465_v29 = vadd.f32 %v1463_v28, %v5412_v40 }
 0xb10   : > { %4990 = vtanh.f32 %v1465_v29 }
 0xb11   : > { %v1484_v30 = vpop.permute.xlu1 %1483  ;;  %4992 = vpow2.f32 %v4180_v32 }
 0xb12   : > { %4548 = vmatmul.mubr.msk.bf16.vlgmr.msra.gmra.mrb[12].mxu0 %vm820_vm1, %v1484_v30 }
 0xb13   : > { %4560 = vmatpush3.bf16.msra.mxu0 %v5298_v2  ;;  %4563 = vmatprep.mubr.msk.bf16.mxu0 %vm5131_vm0, %v5130_v1 }
 0xb14   : > { %4561 = vmatprep.subr.bf16.mxu0 %v5130_v1 }
 0xb17   : > { %4562 = vmatpush3.bf16.msra.mxu0 %v5314_v6 }
 0xb18   : > { %4575 = vmatprep.subr.bf16.mxu0 %v5130_v1 }
 0xb1a   : > { %v4991_v9 = vpop.eup %4990 }
 0xb1b   : > { %1469 = vrot.lane.b32.xlu1 %v4991_v9, %s5134_s23  ;;  %v4993_v33 = vpop.eup %4992 }
 0xb1c   : > { %v1454_v36 = vadd.f32 1.0, %v4993_v33 }
 0xb1e   : > { %4994 = vrcp.f32 %v1454_v36  ;;  %v5615_v36 = vld [vmem:[%s6210_s27] sm:$0xff]  }
 0xb28   : > { %v4995_v2 = vpop.eup %4994 }
 0xb29   : > { %v1467_v38 = vsub.f32 1.0, %v4995_v2  ;;  %v1476_v43 = vmul.f32 %v4995_v2, %v1474_v41  ;;  %v5624_v2 = vld [vmem:[%s6210_s27 + $0x8] sm:$0xff]  }
 0xb8d   : > { %v1470_v42 = vpop.permute.xlu1 %1469 }
 0xb8e   : > { %v1472_v44 = vmul.f32 %v1470_v42, %v1467_v38 }
 0xb90   : > { %v5575_v6 = vadd.f32 %v1476_v43, %v1472_v44 }
 0xb92   : > { %v1559_v46 = vpack.c.bf16 %v5575_v6, %v5575_v6  ;;  %v1641_v44 = vrot.slane %v5575_v6, 1 }
 0xb94   : > { %v1561_v47 = vrot.slane %v1559_v46, 2 }
 0xb96   : > { %4556 = vmatmul.mubr.msk.bf16.vlgmr.msra.gmra.mrb[24].mxu1 %vm820_vm1, %v1561_v47 }
 0xb97   : > { %4568 = vmatpush3.bf16.msra.mxu1 %v5353_v14  ;;  %4571 = vmatprep.mubr.msk.bf16.mxu1 %vm5131_vm0, %v5130_v1 }
 0xb98   : > { %4569 = vmatprep.subr.bf16.mxu1 %v5130_v1 }
 0xb9b   : > { %4570 = vmatpush3.bf16.msra.mxu1 %v5363_v16 }
 0xb9c   : > { %4583 = vmatprep.subr.bf16.mxu1 %v5130_v1 }
 0xbe5   : > { %v1522_v48 = vpop.f32.mrb[12].mxu0 }
 0xbe6   : > { %v1523_v49 = vadd.f32 %v1522_v48, %v5402_v23  ;;  %v4549_v51 = vpop.f32.mrb[13].mxu0 }
 0xbe7   : > { %v1525_v52 = vpop.f32.mrb[14].mxu0 }
 0xbe8   : > { %v1529_v53 = vrot.slane %v1523_v49, 4  ;;  %v4550_v54 = vpop.f32.mrb[15].mxu0 }
 0xbe9   : > { %v5637_v54 = vld [vmem:[%s6210_s27 + $0x10] sm:$0xff]  }
 0xbea   : > { %1538 = vrot.lane.b32.xlu0 %v1529_v53, %s5133_s28  ;;  %v1531_v14 = vadd.f32 %v1529_v53, %v5415_v45 }
 0xbec   : > { %v4182_v55 = vmul.f32 -1.442695, %v1531_v14  ;;  %v5646_v14 = vld [vmem:[%s6210_s27 + $0x18] sm:$0xff]  }
 0xbee   : > { %4996 = vpow2.f32 %v4182_v55 }
 0xbf8   : > { %v4997_v56 = vpop.eup %4996 }
 0xbf9   : > { %v1535_v57 = vadd.f32 1.0, %v4997_v56 }
 0xbfb   : > { %4998 = vrcp.f32 %v1535_v57 }
 0xc05   : > { %v4999_v58 = vpop.eup %4998 }
 0xc06   : > { %v1548_v21 = vsub.f32 1.0, %v4999_v58  ;;  %v1557_v26 = vmul.f32 %v4999_v58, %v1555_v22 }
 0xc5c   : > { %v1539_v16 = vpop.permute.xlu0 %1538 }
 0xc5d   : > { %v1541_v59 = vmul.f32 %v4999_v58, %v1539_v16 }
 0xc5f   : > { %1543 = vrot.lane.b32.xlu1 %v1541_v59, %s5133_s28 }
 0xc69   : > { %v1599_v60 = vpop.f32.mrb[24].mxu1 }
 0xc6a   : > { %v1600_v61 = vadd.f32 %v5421_v50, %v1599_v60  ;;  %v4557_v62 = vpop.f32.mrb[25].mxu1 }
 0xc6b   : > { %v1602_v3 = vpop.f32.mrb[26].mxu1 }
 0xc6c   : > { %v1606_v4 = vrot.slane %v1600_v61, 5  ;;  %v4558_v5 = vpop.f32.mrb[27].mxu1 }
 0xc6e   : > { %1607 = vrot.lane.b32.xlu0 %v1606_v4, %s5134_s23 }
 0xc72   : > { %1624 = vrot.lane.b32.xlu0 %v1606_v4, %s5135_s1 }
 0xcd1   : > { %v1544_v8 = vpop.permute.xlu1 %1543 }
 0xcd2   : > { %v1546_v10 = vadd.f32 %v1544_v8, %v5415_v45 }
 0xcd4   : > { %5000 = vtanh.f32 %v1546_v10 }
 0xcde   : > { %v5001_v11 = vpop.eup %5000 }
 0xcdf   : > { %1550 = vrot.lane.b32.xlu1 %v5001_v11, %s5134_s23 }
 0xce0   : > { %v1608_v12 = vpop.permute.xlu0 %1607 }
 0xce1   : > { %v1610_v13 = vadd.f32 %v1608_v12, %v5415_v45  ;;  %v1617_v32 = vadd.f32 %v1608_v12, %v5412_v40 }
 0xce3   : > { %v4184_v15 = vmul.f32 -1.442695, %v1610_v13 }
 0xce4   : > { %v1625_v63 = vpop.permute.xlu0 %1624 }
 0xce5   : > { %5002 = vpow2.f32 %v4184_v15 }
 0xcef   : > { %v5003_v17 = vpop.eup %5002 }
 0xcf0   : > { %v1614_v18 = vadd.f32 1.0, %v5003_v17 }
 0xcf2   : > { %5004 = vrcp.f32 %v1614_v18 }
 0xcfc   : > { %v5005_v19 = vpop.eup %5004 }
 0xcfd   : > { %v1627_v0 = vmul.f32 %v5005_v19, %v1625_v63 }
 0xcff   : > { %1629 = vrot.lane.b32.xlu0 %v1627_v0, %s5133_s28 }
 0xd51   : > { %v1551_v25 = vpop.permute.xlu1 %1550 }
 0xd52   : > { %v1553_v7 = vmul.f32 %v1551_v25, %v1548_v21 }
 0xd54   : > { %v5598_v27 = vadd.f32 %v1557_v26, %v1553_v7 }
 0xd56   : > { %v5603_v28 = vsel %vm2150_vm5, %v5558_v24, %v5598_v27  ;;  %v1645_v29 = vpack.c.bf16 %v5598_v27, %v5598_v27  ;;  %v4185_v24 = vmul.f32 -1.442695, %v1617_v32 }
 0xd58   : > { %v1647_v30 = vrot.slane %v1645_v29, 2 }
 0xd5a   : > { %1648 = vrot.lane.b32.xlu1 %v1647_v30, %s5134_s23 }
 0xd71   : > { %v1630_v9 = vpop.permute.xlu0 %1629 }
 0xd72   : > { %v1632_v20 = vadd.f32 %v1630_v9, %v5412_v40 }
 0xd74   : > { %5006 = vtanh.f32 %v1632_v20 }
 0xd75   : > { %5008 = vpow2.f32 %v4185_v24 }
 0xd7e   : > { %v5007_v31 = vpop.eup %5006 }
 0xd7f   : > { %1636 = vrot.lane.b32.xlu1 %v5007_v31, %s5134_s23  ;;  %v5009_v38 = vpop.eup %5008  ;;  %v1720_v31 = vrot.slane %v5598_v27, 7 }
 0xd80   : > { %v1621_v41 = vadd.f32 1.0, %v5009_v38 }
 0xd82   : > { %5010 = vrcp.f32 %v1621_v41 }
 0xd8c   : > { %v5011_v42 = vpop.eup %5010 }
 0xd8d   : > { %v1634_v43 = vsub.f32 1.0, %v5011_v42  ;;  %v1643_v47 = vmul.f32 %v5011_v42, %v1641_v44 }
 0xdcc   : > { %v1649_v33 = vpop.permute.xlu1 %1648 }
 0xdcd   : > { %4564 = vmatmul.mubr.msk.bf16.vlgmr.msra.gmra.mrb[16].mxu0 %vm820_vm1, %v1649_v33 }
 0xdce   : > { %4576 = vmatpush3.bf16.msra.mxu0 %v5615_v36  ;;  %4579 = vmatprep.mubr.msk.bf16.mxu0 %vm5131_vm0, %v5130_v1 }
 0xdcf   : > { %4577 = vmatprep.subr.bf16.mxu0 %v5130_v1 }
 0xdd2   : > { %4578 = vmatpush3.bf16.msra.mxu0 %v5624_v2 }
 0xdd3   : > { %4591 = vmatprep.subr.bf16.mxu0 %v5130_v1 }
 0xdf1   : > { %v1637_v46 = vpop.permute.xlu1 %1636 }
 0xdf2   : > { %v1639_v48 = vmul.f32 %v1637_v46, %v1634_v43 }
 0xdf4   : > { %v5629_v49 = vadd.f32 %v1643_v47, %v1639_v48 }
 0xdf6   : > { %v1724_v51 = vpack.c.bf16 %v5629_v49, %v5629_v49 }
 0xdf8   : > { %v1726_v52 = vshrl.u32 %v1724_v51, 16 }
 0xdfa   : > { %v1728_v53 = vrot.slane %v1726_v52, 1 }
 0xdfc   : > { %4572 = vmatmul.mubr.msk.bf16.vlgmr.msra.gmra.mrb[28].mxu1 %vm820_vm1, %v1728_v53  ;;  %v1808_v53 = vrot.slane %v5629_v49, 1 }
 0xdfd   : > { %4584 = vmatpush3.bf16.msra.mxu1 %v5637_v54  ;;  %4587 = vmatprep.mubr.msk.bf16.mxu1 %vm5131_vm0, %v5130_v1 }
 0xdfe   : > { %4585 = vmatprep.subr.bf16.mxu1 %v5130_v1 }
 0xe01   : > { %4586 = vmatpush3.bf16.msra.mxu1 %v5646_v14 }
 0xe02   : > { %4599 = vmatprep.subr.bf16.mxu1 %v5130_v1 }
 0xea0   : > { %v1687_v55 = vpop.f32.mrb[16].mxu0 }
 0xea1   : > { %v1688_v56 = vadd.f32 %v1687_v55, %v5402_v23  ;;  %v4565_v57 = vpop.f32.mrb[17].mxu0 }
 0xea2   : > { %v1690_v58 = vpop.f32.mrb[18].mxu0 }
 0xea3   : > { %v1694_v16 = vrot.slane %v1688_v56, 3  ;;  %v4566_v59 = vpop.f32.mrb[19].mxu0 }
 0xea5   : > { %1703 = vrot.lane.b32.xlu0 %v1694_v16, %s5133_s28  ;;  %v1696_v8 = vadd.f32 %v1694_v16, %v5415_v45 }
 0xea7   : > { %v4187_v10 = vmul.f32 -1.442695, %v1696_v8 }
 0xea9   : > { %5012 = vpow2.f32 %v4187_v10 }
 0xeb3   : > { %v5013_v23 = vpop.eup %5012 }
 0xeb4   : > { %v1700_v11 = vadd.f32 1.0, %v5013_v23 }
 0xeb6   : > { %5014 = vrcp.f32 %v1700_v11 }
 0xec0   : > { %v5015_v12 = vpop.eup %5014 }
 0xec1   : > { %v1713_v20 = vsub.f32 1.0, %v5015_v12  ;;  %v1722_v33 = vmul.f32 %v5015_v12, %v1720_v31 }
 0xecf   : > { %v1766_v60 = vpop.f32.mrb[28].mxu1 }
 0xed0   : > { %v1767_v61 = vadd.f32 %v5421_v50, %v1766_v60  ;;  %v4573_v62 = vpop.f32.mrb[29].mxu1 }
 0xed1   : > { %v1769_v3 = vpop.f32.mrb[30].mxu1 }
 0xed2   : > { %v1773_v4 = vrot.slane %v1767_v61, 6  ;;  %v4574_v5 = vpop.f32.mrb[31].mxu1  ;;  %v5697_v61 = vld [vmem:[%s6164_s5] sm:$0x1] }
 0xed4   : > { %1774 = vrot.lane.b32.xlu0 %v1773_v4, %s5134_s23 }
 0xf17   : > { %v1704_v13 = vpop.permute.xlu0 %1703 }
 0xf18   : > { %v1706_v15 = vmul.f32 %v5015_v12, %v1704_v13 }
 0xf1a   : > { %1708 = vrot.lane.b32.xlu1 %v1706_v15, %s5133_s28 }
 0xf1e   : > { %1791 = vrot.lane.b32.xlu1 %v1773_v4, %s5135_s1 }
 0xf46   : > { %v1775_v17 = vpop.permute.xlu0 %1774 }
 0xf47   : > { %v1777_v18 = vadd.f32 %v1775_v17, %v5415_v45  ;;  %v1784_v27 = vadd.f32 %v1775_v17, %v5412_v40 }
 0xf49   : > { %v4189_v19 = vmul.f32 -1.442695, %v1777_v18  ;;  %v4190_v47 = vmul.f32 -1.442695, %v1784_v27 }
 0xf4b   : > { %5016 = vpow2.f32 %v4189_v19 }
 0xf55   : > { %v5017_v63 = vpop.eup %5016 }
 0xf56   : > { %v1781_v0 = vadd.f32 1.0, %v5017_v63 }
 0xf58   : > { %5018 = vrcp.f32 %v1781_v0 }
 0xf62   : > { %v5019_v25 = vpop.eup %5018 }
 0xf8c   : > { %v1709_v21 = vpop.permute.xlu1 %1708 }
 0xf8d   : > { %v1711_v22 = vadd.f32 %v1709_v21, %v5415_v45 }
 0xf8f   : > { %5020 = vtanh.f32 %v1711_v22 }
 0xf90   : > { %v1792_v26 = vpop.permute.xlu1 %1791 }
 0xf91   : > { %v1794_v7 = vmul.f32 %v5019_v25, %v1792_v26 }
 0xf93   : > { %1796 = vrot.lane.b32.xlu1 %v1794_v7, %s5133_s28 }
 0xf99   : > { %v5021_v29 = vpop.eup %5020 }
 0xf9a   : > { %1715 = vrot.lane.b32.xlu0 %v5021_v29, %s5134_s23 }
0x1005   : > { %v1797_v30 = vpop.permute.xlu1 %1796 }
0x1006   : > { %v1799_v9 = vadd.f32 %v1797_v30, %v5412_v40 }
0x1008   : > { %5022 = vtanh.f32 %v1799_v9 }
0x1009   : > { %5024 = vpow2.f32 %v4190_v47 }
0x100c   : > { %v1716_v32 = vpop.permute.xlu0 %1715 }
0x100d   : > { %v1718_v24 = vmul.f32 %v1716_v32, %v1713_v20 }
0x100f   : > { %v5663_v38 = vadd.f32 %v1722_v33, %v1718_v24 }
0x1011   : > { %v5668_v41 = vsel %vm2152_vm6, %v5603_v28, %v5663_v38  ;;  %v1812_v42 = vpack.c.bf16 %v5663_v38, %v5663_v38 }
0x1012   : > { %v5023_v43 = vpop.eup %5022 }
0x1013   : > { %1803 = vrot.lane.b32.xlu1 %v5023_v43, %s5134_s23  ;;  %v1814_v44 = vshrl.u32 %v1812_v42, 16  ;;  %v5025_v48 = vpop.eup %5024 }
0x1014   : > { %v1788_v51 = vadd.f32 1.0, %v5025_v48 }
0x1015   : > { %v1816_v46 = vrot.slane %v1814_v44, 2  ;;  %v1889_v44 = vrot.slane %v5663_v38, 7 }
0x1016   : > { %5026 = vrcp.f32 %v1788_v51 }
0x1017   : > { %1817 = vrot.lane.b32.xlu0 %v1816_v46, %s5134_s23 }
0x1020   : > { %v5027_v52 = vpop.eup %5026 }
0x1021   : > { %v1801_v28 = vsub.f32 1.0, %v5027_v52  ;;  %v1810_v56 = vmul.f32 %v5027_v52, %v1808_v53 }
0x1085   : > { %v1804_v55 = vpop.permute.xlu1 %1803 }
0x1086   : > { %v1806_v57 = vmul.f32 %v1804_v55, %v1801_v28 }
0x1088   : > { %v5676_v58 = vadd.f32 %v1810_v56, %v1806_v57 }
0x1089   : > { %v1818_v16 = vpop.permute.xlu0 %1817 }
0x108a   : > { %v1893_v59 = vpack.c.bf16 %v5676_v58, %v5676_v58  ;;  %4580 = vmatmul.mubr.msk.bf16.vlgmr.msra.gmra.mrb[20].mxu0 %vm820_vm1, %v1818_v16  ;;  %v1975_v57 = vrot.slane %v5676_v58, 1 }
0x108b   : > { %4592 = vmatpush3.bf16.msra.mxu0 %v5615_v36  ;;  %4595 = vmatprep.mubr.msk.bf16.mxu0 %vm5131_vm0, %v5130_v1 }
0x108c   : > { %v1895_v60 = vrot.slane %v1893_v59, 1  ;;  %4593 = vmatprep.subr.bf16.mxu0 %v5130_v1 }
0x108e   : > { %4588 = vmatmul.mubr.msk.bf16.vlgmr.msra.gmra.mrb[32].mxu1 %vm820_vm1, %v1895_v60 }
0x108f   : > { %4600 = vmatpush3.bf16.msra.mxu1 %v5637_v54  ;;  %4603 = vmatprep.mubr.msk.bf16.mxu1 %vm5131_vm0, %v5130_v1 }
0x1090   : > { %4601 = vmatprep.subr.bf16.mxu1 %v5130_v1  ;;  %4594 = vmatpush3.bf16.msra.mxu0 %v5624_v2 }
0x1091   : > { %4607 = vmatprep.subr.bf16.mxu0 %v5130_v1 }
0x1093   : > { %4602 = vmatpush3.bf16.msra.mxu1 %v5646_v14 }
0x1094   : > { %4615 = vmatprep.subr.bf16.mxu1 %v5130_v1 }
0x115d   : > { %v1856_v36 = vpop.f32.mrb[20].mxu0 }
0x115e   : > { %v1857_v54 = vadd.f32 %v5697_v61, %v1856_v36  ;;  %v4581_v62 = vpop.f32.mrb[21].mxu0 }
0x115f   : > { %v1859_v3 = vpop.f32.mrb[22].mxu0 }
0x1160   : > { %v1863_v4 = vrot.slane %v1857_v54, 2  ;;  %v4582_v5 = vpop.f32.mrb[23].mxu0 }
0x1161   : > { %v1933_v8 = vpop.f32.mrb[32].mxu1 }
0x1162   : > { %v1934_v2 = vadd.f32 %v5421_v50, %v1933_v8  ;;  %1872 = vrot.lane.b32.xlu0 %v1863_v4, %s5133_s28  ;;  %v4589_v14 = vpop.f32.mrb[33].mxu1  ;;  %v1865_v12 = vadd.f32 %v1863_v4, %v5415_v45  ;;  %v5065_v4 = vld [vmem:[%s6164_s5 + $0x1] sm:$0x1] }
0x1163   : > { %v1936_v10 = vpop.f32.mrb[34].mxu1 }
0x1164   : > { %v1940_v23 = vrot.slane %v1934_v2, 7  ;;  %v4590_v11 = vpop.f32.mrb[35].mxu1  ;;  %v4192_v13 = vmul.f32 -1.442695, %v1865_v12 }
0x1166   : > { %1941 = vrot.lane.b32.xlu1 %v1940_v23, %s5134_s23  ;;  %5028 = vpow2.f32 %v4192_v13 }
0x116a   : > { %1958 = vrot.lane.b32.xlu1 %v1940_v23, %s5135_s1 }
0x1170   : > { %v5029_v15 = vpop.eup %5028 }
0x1171   : > { %v1869_v17 = vadd.f32 1.0, %v5029_v15 }
0x1173   : > { %5030 = vrcp.f32 %v1869_v17 }
0x117d   : > { %v5031_v18 = vpop.eup %5030 }
0x117e   : > { %v1882_v43 = vsub.f32 1.0, %v5031_v18  ;;  %v1891_v27 = vmul.f32 %v5031_v18, %v1889_v44  ;;  %v4894_v44 = vld [vmem:[%s6165_s6] sm:$0xff]  }
0x11d4   : > { %v1873_v19 = vpop.permute.xlu0 %1872 }
0x11d5   : > { %v1875_v50 = vmul.f32 %v5031_v18, %v1873_v19 }
0x11d7   : > { %1877 = vrot.lane.b32.xlu0 %v1875_v50, %s5133_s28 }
0x11d8   : > { %v1942_v63 = vpop.permute.xlu1 %1941 }
0x11d9   : > { %v1944_v0 = vadd.f32 %v1942_v63, %v5415_v45  ;;  %v1951_v24 = vadd.f32 %v1942_v63, %v5412_v40 }
0x11db   : > { %v4194_v21 = vmul.f32 -1.442695, %v1944_v0  ;;  %v4195_v42 = vmul.f32 -1.442695, %v1951_v24  ;;  %v4892_v24 = vld [vmem:[%s6165_s6 + $0x10] sm:$0xff]  }
0x11dc   : > { %v1959_v7 = vpop.permute.xlu1 %1958 }
0x11dd   : > { %5032 = vpow2.f32 %v4194_v21 }
0x11e7   : > { %v5033_v22 = vpop.eup %5032 }
0x11e8   : > { %v1948_v25 = vadd.f32 1.0, %v5033_v22 }
0x11ea   : > { %5034 = vrcp.f32 %v1948_v25 }
0x11f4   : > { %v5035_v26 = vpop.eup %5034 }
0x11f5   : > { %v1961_v29 = vmul.f32 %v5035_v26, %v1959_v7 }
0x11f7   : > { %1963 = vrot.lane.b32.xlu1 %v1961_v29, %s5133_s28 }
0x1249   : > { %v1878_v30 = vpop.permute.xlu0 %1877 }
0x124a   : > { %v1880_v9 = vadd.f32 %v1878_v30, %v5415_v45 }
0x124c   : > { %5036 = vtanh.f32 %v1880_v9 }
0x1256   : > { %v5037_v20 = vpop.eup %5036 }
0x1257   : > { %1884 = vrot.lane.b32.xlu0 %v5037_v20, %s5134_s23 }
0x1269   : > { %v1964_v31 = vpop.permute.xlu1 %1963 }
0x126a   : > { %v1966_v32 = vadd.f32 %v1964_v31, %v5412_v40 }
0x126c   : > { %5038 = vtanh.f32 %v1966_v32 }
0x126d   : > { %5040 = vpow2.f32 %v4195_v42 }
0x1276   : > { %v5039_v33 = vpop.eup %5038 }
0x1277   : > { %1970 = vrot.lane.b32.xlu1 %v5039_v33, %s5134_s23  ;;  %v5041_v53 = vpop.eup %5040 }
0x1278   : > { %v1955_v38 = vadd.f32 1.0, %v5041_v53 }
0x127a   : > { %5042 = vrcp.f32 %v1955_v38 }
0x1284   : > { %v5043_v55 = vpop.eup %5042 }
0x1285   : > { %v1968_v56 = vsub.f32 1.0, %v5043_v55  ;;  %v1977_v59 = vmul.f32 %v5043_v55, %v1975_v57 }
0x12c9   : > { %v1885_v46 = vpop.permute.xlu0 %1884 }
0x12ca   : > { %v1887_v47 = vmul.f32 %v1885_v46, %v1882_v43  ;;  %v4893_v43 = vld [vmem:[%s6165_s6 + $0x18] sm:$0xff]   ;;  %v4895_v46 = vld [vmem:[%s6165_s6 + $0x8] sm:$0xff]  }
0x12cc   : > { %v5714_v48 = vadd.f32 %v1891_v27, %v1887_v47 }
0x12ce   : > { %v1979_v51 = vpack.c.bf16 %v5714_v48, %v5714_v48  ;;  %v5721_v52 = vsel %vm2154_vm7, %v5668_v41, %v5714_v48  ;;  %v2054_v38 = vrot.slane %v5714_v48, 7 }
0x12d0   : > { %v1981_v28 = vrot.slane %v1979_v51, 3 }
0x12d2   : > { %1982 = vrot.lane.b32.xlu0 %v1981_v28, %s5134_s23 }
0x12e9   : > { %v1971_v16 = vpop.permute.xlu1 %1970 }
0x12ea   : > { %v1973_v60 = vmul.f32 %v1971_v16, %v1968_v56 }
0x12ec   : > { %v5725_v36 = vadd.f32 %v1977_v59, %v1973_v60 }
0x12ee   : > { %v2058_v54 = vpack.c.bf16 %v5725_v36, %v5725_v36 }
0x12f0   : > { %v2060_v41 = vshrl.u32 %v2058_v54, 16  ;;  %v2140_v54 = vrot.slane %v5725_v36, 1 }
0x12f2   : > { %4604 = vmatmul.mubr.msk.bf16.vlgmr.msra.gmra.mrb[36].mxu1 %vm820_vm1, %v2060_v41 }
0x12f3   : > { %4619 = vmatprep.mubr.msk.bf16.mxu1 %vm5131_vm0, %v5130_v1  ;;  %4616 = vmatpush3.bf16.msra.mxu1 %v4894_v44 }
0x12f4   : > { %4617 = vmatprep.subr.bf16.mxu1 %v5130_v1 }
0x12f7   : > { %4618 = vmatpush3.bf16.msra.mxu1 %v4895_v46 }
0x1344   : > { %v1983_v62 = vpop.permute.xlu0 %1982 }
0x1345   : > { %4596 = vmatmul.mubr.msk.bf16.vlgmr.msra.gmra.mrb[24].mxu0 %vm820_vm1, %v1983_v62 }
0x1346   : > { %4611 = vmatprep.mubr.msk.bf16.mxu0 %vm5131_vm0, %v5130_v1  ;;  %4608 = vmatpush3.bf16.msra.mxu0 %v4892_v24 }
0x1347   : > { %4609 = vmatprep.subr.bf16.mxu0 %v5130_v1 }
0x134a   : > { %4610 = vmatpush3.bf16.msra.mxu0 %v4893_v43  ;;  %v4903_v43 = vld [vmem:[%s6169_s10 + $0x30] sm:$0xff]  }
0x134b   : > { %4623 = vmatprep.subr.bf16.mxu0 %v5130_v1 }
0x13c5   : > { %v2099_v3 = vpop.f32.mrb[36].mxu1 }
0x13c6   : > { %v2100_v5 = vadd.f32 %v5065_v4, %v2099_v3  ;;  %v4605_v8 = vpop.f32.mrb[37].mxu1 }
0x13c7   : > { %v2102_v2 = vpop.f32.mrb[38].mxu1 }
0x13c8   : > { %2106 = vrot.lane.b32.xlu1 %v2100_v5, %s5134_s23  ;;  %v4606_v14 = vpop.f32.mrb[39].mxu1 }
0x1418   : > { %v2021_v10 = vpop.f32.mrb[24].mxu0 }
0x1419   : > { %v2022_v23 = vadd.f32 %v5697_v61, %v2021_v10  ;;  %v4597_v11 = vpop.f32.mrb[25].mxu0 }
0x141a   : > { %v2024_v12 = vpop.f32.mrb[26].mxu0 }
0x141b   : > { %v2028_v13 = vrot.slane %v2022_v23, 1  ;;  %v4598_v15 = vpop.f32.mrb[27].mxu0 }
0x141d   : > { %2037 = vrot.lane.b32.xlu0 %v2028_v13, %s5133_s28  ;;  %v2030_v17 = vadd.f32 %v2028_v13, %v5415_v45  ;;  %v4211_v13 = vld [vmem:[%s6166_s7] ss:$0 sm:$0xff] }
0x141f   : > { %v4197_v19 = vmul.f32 -1.442695, %v2030_v17 }
0x1421   : > { %2123 = vrot.lane.b32.xlu0 %v2100_v5, %s5135_s1  ;;  %5044 = vpow2.f32 %v4197_v19 }
0x142b   : > { %v5045_v0 = vpop.eup %5044 }
0x142c   : > { %v2034_v21 = vadd.f32 1.0, %v5045_v0  ;;  %v5804_v0 = vld [vmem:[%s5342_s24] sm:$0xff]  }
0x143a   : > { %v2107_v18 = vpop.permute.xlu1 %2106 }
0x143b   : > { %v2109_v50 = vadd.f32 %v2107_v18, %v5415_v45  ;;  %v2116_v27 = vadd.f32 %v2107_v18, %v5412_v40 }
0x143d   : > { %v4199_v63 = vmul.f32 -1.442695, %v2109_v50  ;;  %v4200_v47 = vmul.f32 -1.442695, %v2116_v27  ;;  %v4904_v27 = vld [vmem:[%s6169_s10 + $0x20] sm:$0xff]  }
0x143f   : > { %5046 = vpow2.f32 %v4199_v63 }
0x1440   : > { %5048 = vrcp.f32 %v2034_v21  ;;  %v4900_v21 = vld [vmem:[%s6169_s10 + $0x10] sm:$0xff]  }
0x1449   : > { %v5047_v61 = vpop.eup %5046 }
0x144a   : > { %v2113_v22 = vadd.f32 1.0, %v5047_v61  ;;  %v5049_v25 = vpop.eup %5048  ;;  %v4212_v61 = vld [vmem:[%s6168_s9] ss:$0 sm:$0xff] }
0x144b   : > { %v2047_v53 = vsub.f32 1.0, %v5049_v25  ;;  %v2056_v57 = vmul.f32 %v5049_v25, %v2054_v38 }
0x144c   : > { %5050 = vrcp.f32 %v2113_v22 }
0x1456   : > { %v5051_v29 = vpop.eup %5050 }
0x148f   : > { %v2038_v26 = vpop.permute.xlu0 %2037 }
0x1490   : > { %v2040_v7 = vmul.f32 %v5049_v25, %v2038_v26 }
0x1492   : > { %2042 = vrot.lane.b32.xlu1 %v2040_v7, %s5133_s28 }
0x1493   : > { %v2124_v30 = vpop.permute.xlu0 %2123 }
0x1494   : > { %v2126_v9 = vmul.f32 %v5051_v29, %v2124_v30 }
0x1496   : > { %2128 = vrot.lane.b32.xlu0 %v2126_v9, %s5133_s28  ;;  %v5816_v9 = vld [vmem:[%s5342_s24 + $0x8] sm:$0xff]   ;;  %s4134_s28 = sshll.u32 %s633_s29, 3 }
0x1504   : > { %v2043_v20 = vpop.permute.xlu1 %2042 }
0x1505   : > { %v2045_v31 = vadd.f32 %v2043_v20, %v5415_v45 }
0x1507   : > { %5052 = vtanh.f32 %v2045_v31  ;;  %v4899_v31 = vld [vmem:[%s6169_s10] sm:$0xff]  }
0x1508   : > { %v2129_v32 = vpop.permute.xlu0 %2128 }
0x1509   : > { %v2131_v33 = vadd.f32 %v2129_v32, %v5412_v40  ;;  %v4901_v32 = vld [vmem:[%s6169_s10 + $0x8] sm:$0xff]  }
0x150b   : > { %5054 = vtanh.f32 %v2131_v33  ;;  %v4902_v33 = vld [vmem:[%s6169_s10 + $0x18] sm:$0xff]  }
0x150c   : > { %5056 = vpow2.f32 %v4200_v47 }
0x1511   : > { %v5053_v42 = vpop.eup %5052 }
0x1512   : > { %2049 = vrot.lane.b32.xlu1 %v5053_v42, %s5134_s23 }
0x1515   : > { %v5055_v45 = vpop.eup %5054 }
0x1516   : > { %2135 = vrot.lane.b32.xlu0 %v5055_v45, %s5134_s23  ;;  %v5057_v51 = vpop.eup %5056 }
0x1517   : > { %v2120_v28 = vadd.f32 1.0, %v5057_v51  ;;  %v4905_v51 = vld [vmem:[%s6169_s10 + $0x38] sm:$0xff]  }
0x1519   : > { %5058 = vrcp.f32 %v2120_v28  ;;  %v4906_v28 = vld [vmem:[%s6169_s10 + $0x28] sm:$0xff]  }
0x1523   : > { %v5059_v55 = vpop.eup %5058 }
0x1524   : > { %v2133_v60 = vsub.f32 1.0, %v5059_v55  ;;  %v2142_v62 = vmul.f32 %v5059_v55, %v2140_v54  ;;  %v4907_v55 = vld [vmem:[%s6171_s12] sm:$0xff]  }
0x1584   : > { %v2050_v56 = vpop.permute.xlu1 %2049 }
0x1585   : > { %v2052_v16 = vmul.f32 %v2050_v56, %v2047_v53  ;;  %v4908_v56 = vld [vmem:[%s6171_s12 + $0x8] sm:$0xff]  }
0x1587   : > { %v2057_v59 = vadd.f32 %v2056_v57, %v2052_v16 }
0x1588   : > { %v2136_v41 = vpop.permute.xlu0 %2135 }
0x1589   : > { %v2138_v40 = vmul.f32 %v2136_v41, %v2133_v60  ;;  %v2157_v3 = vsel %vm2156_vm8, %v5721_v52, %v2057_v59 }
0x158a   : > { %v2169_v4 = vpack.c.bf16 %v2157_v3, %v2157_v3 }
0x158b   : > { %v2143_v5 = vadd.f32 %v2142_v62, %v2138_v40 }
0x158c   : > { %2232 = vrot.lane.b32.xlu1 %v2169_v4, %s5134_s23  ;;  %s635_s23 = scalar_lea.vmem [#allocation2], %s4134_s28 }
0x158d   : > { %v2158_v48 = vsel %vm2144_vm2, %v2143_v5, %v5725_v36  ;;  %v4909_v5 = vld [vmem:[%s6171_s12 + $0x10] sm:$0xff]   ;;  %s4059_s26 = sshll.u32 %s635_s23, 4  ;;  %s6118_s26 = int_to_ptr.vmem [resolvable:$true] %s4059_s26 }
0x158e   : > { %v2159_v8 = vsel %vm2146_vm3, %v2158_v48, %v5676_v58  ;;  %s5066_s28 = scalar_lea.vmem %s6118_s26, 128  ;;  %p5073_p0 = scmp.lt.s32.totalorder %s6118_s26, %s5071_s0 }
0x158f   : > { %v2160_v2 = vsel %vm2148_vm4, %v2159_v8, %v5629_v49  ;;  %p5067_p11 = scmp.ne.s32.totalorder %s6118_s26, %s5066_s28 }
0x1590   : > { %v2161_v14 = vsel %vm2150_vm5, %v2160_v2, %v5575_v6  ;;  %v4896_v6 = vld [vmem:[%s6167_s8] sm:$0xff]  }
0x1591   : > { %v2162_v10 = vsel %vm2152_vm6, %v2161_v14, %v5531_v37  ;;  %p5068_p12 = pnand %p5067_p11, %p5281_p5 }
0x1592   : > { %v2163_v52 = vsel %vm2154_vm7, %v2162_v10, %v5487_v39 }
0x1593   : > { %v2164_v23 = vsel %vm2156_vm8, %v2163_v52, %v5448_v35  ;;  %v4897_v35 = vld [vmem:[%s6167_s8 + $0x8] sm:$0xff]   ;;  %p5069_p13 = pneg %p5068_p12 }
0x1594   : > { %v2175_v11 = vpack.c.bf16 %v2164_v23, %v2164_v23  ;;  %v4244_v23 = vld [vmem:[%s6170_s11] ss:$0 sm:$0xff] }
0x1596   : > { %4612 = vmatmul.mubr.msk.bf16.vlgmr.msra.gmra.mrb[28].mxu0 %vm820_vm1, %v2175_v11 }
0x1597   : > { %4627 = vmatprep.mubr.msk.bf16.mxu0 %vm5131_vm0, %v5130_v1  ;;  %4624 = vmatpush3.bf16.msra.mxu0 %v4896_v6 }
0x1598   : > { %4625 = vmatprep.subr.bf16.mxu0 %v5130_v1 }
0x159b   : > { %4626 = vmatpush3.bf16.msra.mxu0 %v4897_v35 }
0x159c   : > { %4637 = vmatprep.subr.bf16.mxu0 %v5130_v1 }
0x15fe   : > { %v2233_v58 = vpop.permute.xlu1 %2232 }
0x15ff   : > { %4620 = vmatmul.mubr.msk.bf16.vlgmr.msra.gmra.mrb[40].mxu1 %vm820_vm1, %v2233_v58 }
0x1600   : > { %4633 = vmatprep.mubr.msk.bf16.mxu1 %vm2379_vm9, %v5804_v0 }
0x1669   : > { %v2225_v39 = vpop.f32.mrb[28].mxu0 }
0x166a   : > { %v4613_v37 = vpop.f32.mrb[29].mxu0 }
0x166b   : > { %v2228_v49 = vpop.f32.mrb[30].mxu0 }
0x166c   : > { %v4614_v36 = vpop.f32.mrb[31].mxu0 }
0x16d2   : > { %v2283_v12 = vpop.f32.mrb[40].mxu1 }
0x16d3   : > { %v2284_v15 = vadd.f32 %v2283_v12, %v2225_v39  ;;  %v4621_v17 = vpop.f32.mrb[41].mxu1 }
0x16d4   : > { %v2286_v18 = vpop.f32.mrb[42].mxu1 }
0x16d5   : > { %v2296_v19 = vadd.f32 %v4211_v13, %v2284_v15  ;;  %v4622_v50 = vpop.f32.mrb[43].mxu1 }
0x16d6   : > { %v4910_v50 = vld [vmem:[%s6173_s14] sm:$0xff]  }
0x16d7   : > { %v2305_v63 = vpack.c.bf16 %v2296_v19, %v2296_v19 }
0x16d9   : > { %4628 = vmatmul.mubr.msk.bf16.vlgmr.msra.gmra.mrb[32].mxu0 %vm820_vm1, %v2305_v63  ;;  %v4245_v63 = vld [vmem:[%s6172_s13] ss:$0 sm:$0xff] }
0x16da   : > { %4641 = vmatprep.mubr.msk.bf16.mxu0 %vm5131_vm0, %v5130_v1  ;;  %4638 = vmatpush3.bf16.msra.mxu0 %v4900_v21 }
0x16db   : > { %4639 = vmatprep.subr.bf16.mxu0 %v5130_v1 }
0x16de   : > { %4640 = vmatpush3.bf16.msra.mxu0 %v4902_v33 }
0x16df   : > { %4653 = vmatprep.subr.bf16.mxu0 %v5130_v1 }
0x17ac   : > { %v2362_v22 = vpop.f32.mrb[32].mxu0 }
0x17ad   : > { %v2363_v25 = vadd.f32 %v4212_v61, %v2362_v22  ;;  %v4629_v26 = vpop.f32.mrb[33].mxu0 }
0x17ae   : > { %v2365_v7 = vpop.f32.mrb[34].mxu0 }
0x17af   : > { %v2368_v29 = vpack.c.bf16 %v2363_v25, %v2363_v25  ;;  %v4630_v30 = vpop.f32.mrb[35].mxu0 }
0x17b0   : > { %v4250_v30 = vld [vmem:[%s6174_s15] ss:$0 sm:$0xff] }
0x17b1   : > { %v2387_v20 = vsel %vm2150_vm5, %v2368_v29, 0  ;;  %4813 = vmatprep.subr.msk.bf16.mxu1 %vm2150_vm5, %v2368_v29 }
0x17b2   : > { %4632 = vmatpush3.bf16.msra.mxu1 %v2387_v20 }
0x17b3   : > { %4645 = vmatprep.subr.bf16.mxu1 %v5130_v1 }
0x17b5   : > { %4634 = vmatmul.mubr.msk.bf16.vlgmr.msra.gmra.mrb[44].mxu1 %vm2379_vm9, %v5816_v9 }
0x17b6   : > { %4646 = vmatpush3.bf16.msra.mxu1 %v4899_v31  ;;  %4649 = vmatprep.mubr.msk.bf16.mxu1 %vm5131_vm0, %v5130_v1 }
0x17b7   : > { %4647 = vmatprep.subr.bf16.mxu1 %v5130_v1 }
0x17ba   : > { %4648 = vmatpush3.bf16.msra.mxu1 %v4901_v32 }
0x17bb   : > { %4661 = vmatprep.subr.bf16.mxu1 %v5130_v1 }
0x1888   : > { %v4635_v24 = vpop.f32.mrb[44].mxu1 }
0x1889   : > { %v2423_v42 = vpop.f32.mrb[45].mxu1  ;;  %v2564_v38 = vpack.c.bf16 %v4635_v24, %v4635_v24 }
0x188a   : > { %v2442_v45 = vpack.c.bf16 %v2423_v42, %v2423_v42  ;;  %v4636_v44 = vpop.f32.mrb[46].mxu1 }
0x188b   : > { %v2426_v46 = vpop.f32.mrb[47].mxu1  ;;  %v2626_v53 = vpack.c.bf16 %v4636_v44, %v4636_v44  ;;  %v4912_v44 = vld [vmem:[%s6175_s16 + $0x8] sm:$0xff]  }
0x188c   : > { %v2448_v47 = vpack.c.bf16 %v2426_v46, %v2426_v46  ;;  %4650 = vmatmul.mubr.msk.bf16.vlgmr.msra.gmra.mrb[48].mxu1 %vm820_vm1, %v2442_v45  ;;  %v4911_v45 = vld [vmem:[%s6175_s16] sm:$0xff]  }
0x188d   : > { %4662 = vmatpush3.bf16.msra.mxu1 %v4903_v43  ;;  %4665 = vmatprep.mubr.msk.bf16.mxu1 %vm5131_vm0, %v5130_v1 }
0x188e   : > { %4642 = vmatmul.mubr.msk.bf16.vlgmr.msra.gmra.mrb[36].mxu0 %vm820_vm1, %v2448_v47  ;;  %4663 = vmatprep.subr.bf16.mxu1 %v5130_v1  ;;  %v4913_v47 = vld [vmem:[%s6175_s16 + $0x18] sm:$0xff]  }
0x188f   : > { %4654 = vmatpush3.bf16.msra.mxu0 %v4904_v27  ;;  %4657 = vmatprep.mubr.msk.bf16.mxu0 %vm5131_vm0, %v5130_v1 }
0x1890   : > { %4655 = vmatprep.subr.bf16.mxu0 %v5130_v1 }
0x1891   : > { %4664 = vmatpush3.bf16.msra.mxu1 %v4905_v51 }
0x1892   : > { %4679 = vmatprep.subr.bf16.mxu1 %v5130_v1 }
0x1893   : > { %4656 = vmatpush3.bf16.msra.mxu0 %v4906_v28 }
0x1894   : > { %4666 = vmatmul.mubr.msk.bf16.vlgmr.msra.gmra.mrb[52].mxu1 %vm820_vm1, %v2626_v53  ;;  %4669 = vmatprep.subr.bf16.mxu0 %v5130_v1 }
0x1895   : > { %4681 = vmatprep.mubr.msk.bf16.mxu1 %vm5131_vm0, %v5130_v1  ;;  %4680 = vmatpush3.bf16.msra.mxu1 %v4910_v50 }
0x1896   : > { %4658 = vmatmul.mubr.msk.bf16.vlgmr.msra.gmra.mrb[40].mxu0 %vm820_vm1, %v2564_v38  ;;  %v4914_v38 = vld [vmem:[%s6175_s16 + $0x10] sm:$0xff]  }
0x1897   : > { %4675 = vmatprep.mubr.msk.bf16.mxu0 %vm5131_vm0, %v5130_v1  ;;  %4670 = vmatpush3.bf16.msra.mxu0 %v4907_v55 }
0x1898   : > { %4671 = vmatprep.subr.bf16.mxu0 %v5130_v1 }
0x189b   : > { %4672 = vmatpush3.bf16.msra.mxu0 %v4908_v56 }
0x189c   : > { %4673 = vmatprep.subr.bf16.mxu0 %v5130_v1 }
0x189f   : > { %4674 = vmatpush3.bf16.msra.mxu0 %v4909_v5 }
0x18a0   : > { %4691 = vmatprep.subr.bf16.mxu0 %v5130_v1 }
0x195f   : > { %v2553_v57 = vpop.f32.mrb[48].mxu1 }
0x1960   : > { %v4651_v16 = vpop.f32.mrb[49].mxu1 }
0x1961   : > { %v2498_v59 = vpop.f32.mrb[36].mxu0  ;;  %v2556_v60 = vpop.f32.mrb[50].mxu1  ;;  %v4915_v16 = vld [vmem:[%s6171_s12 + $0x18] sm:$0xff]  }
0x1962   : > { %v2554_v54 = vadd.f32 %v2553_v57, %v2498_v59  ;;  %v4643_v41 = vpop.f32.mrb[37].mxu0  ;;  %v4652_v62 = vpop.f32.mrb[51].mxu1  ;;  %v4916_v59 = vld [vmem:[%s6171_s12 + $0x20] sm:$0xff]  }
0x1963   : > { %v2501_v40 = vpop.f32.mrb[38].mxu0 }
0x1964   : > { %v4644_v3 = vpop.f32.mrb[39].mxu0 }
0x1967   : > { %v2676_v4 = vpop.f32.mrb[52].mxu1 }
0x1968   : > { %v4667_v48 = vpop.f32.mrb[53].mxu1 }
0x1969   : > { %v2614_v8 = vpop.f32.mrb[40].mxu0  ;;  %v2679_v2 = vpop.f32.mrb[54].mxu1 }
0x196a   : > { %v2620_v14 = vadd.f32 %v2614_v8, %v2554_v54  ;;  %v4659_v10 = vpop.f32.mrb[41].mxu0  ;;  %v4668_v52 = vpop.f32.mrb[55].mxu1 }
0x196b   : > { %v2617_v11 = vpop.f32.mrb[42].mxu0  ;;  %v4917_v52 = vld [vmem:[%s6171_s12 + $0x28] sm:$0xff]  }
0x196c   : > { %v2682_v58 = vadd.f32 %v2676_v4, %v2620_v14  ;;  %v4660_v6 = vpop.f32.mrb[43].mxu0 }
0x196d   : > { %v4269_v6 = vld [vmem:[%s6176_s17] ss:$0 sm:$0xff] }
0x196e   : > { %v2690_v35 = vadd.f32 %v4244_v23, %v2682_v58 }
0x1970   : > { %v5880_v39 = vmax.f32 %v2690_v35, 0.0 }
0x1972   : > { %2701 = vrot.lane.b32.xlu0 %v5880_v39, %s5136_s2  ;;  %v2698_v37 = vrot.slane %v5880_v39, 1  ;;  %v2695_v36 = vrot.slane %v5880_v39, 7 }
0x1974   : > { %v2699_v49 = vsel %vm2697_vm10, 0.0, %v2698_v37  ;;  %v2696_v13 = vsel %vm2694_vm11, 0.0, %v2695_v36 }
0x1975   : > { %2705 = vrot.lane.b32.xlu1 %v2699_v49, %s5135_s1 }
0x19e4   : > { %v2702_v12 = vpop.permute.xlu0 %2701 }
0x19e5   : > { %v2709_v15 = vsel %vm2708_vm12, %v2696_v13, %v2702_v12 }
0x19e7   : > { %v2706_v17 = vpop.permute.xlu1 %2705 }
0x19e8   : > { %v2710_v18 = vsel %vm820_vm1, %v2709_v15, %v2706_v17 }
0x19e9   : > { %v2717_v19 = vpack.c.bf16 %v2710_v18, %v2710_v18 }
0x19eb   : > { %4676 = vmatmul.mubr.msk.bf16.vlgmr.msra.gmra.mrb[44].mxu0 %vm2743_vm13, %v2717_v19 }
0x19ec   : > { %4693 = vmatprep.mubr.msk.bf16.mxu0 %vm5131_vm0, %v5130_v1  ;;  %4692 = vmatpush3.bf16.msra.mxu0 %v4912_v44 }
0x19ed   : > { %4703 = vmatprep.subr.bf16.mxu0 %v5130_v1 }
0x1abe   : > { %v2781_v21 = vpop.f32.mrb[44].mxu0 }
0x1abf   : > { %v2782_v61 = vadd.f32 %v4245_v63, %v2781_v21  ;;  %v4677_v22 = vpop.f32.mrb[45].mxu0 }
0x1ac0   : > { %v2784_v25 = vpop.f32.mrb[46].mxu0  ;;  %v4918_v22 = vld [vmem:[%s6173_s14 + $0x8] sm:$0xff]  }
0x1ac1   : > { %v2787_v26 = vmax.f32 %v2782_v61, 0.0  ;;  %v4678_v7 = vpop.f32.mrb[47].mxu0  ;;  %v4277_v25 = vld [vmem:[%s6172_s13 + $0x1] ss:$0 sm:$0xff] }
0x1ac3   : > { %v2790_v29 = vpack.c.bf16 %v2787_v26, %v2787_v26 }
0x1ac5   : > { %4682 = vmatmul.mubr.msk.bf16.vlgmr.msra.gmra.mrb[56].mxu1 %vm2708_vm12, %v2790_v29 }
0x1ac6   : > { %4687 = vmatprep.mubr.msk.bf16.mxu1 %vm2379_vm9, %v5804_v0 }
0x1b98   : > { %v2841_v20 = vpop.f32.mrb[56].mxu1 }
0x1b99   : > { %v2842_v31 = vadd.f32 %v4250_v30, %v2841_v20  ;;  %v4683_v32 = vpop.f32.mrb[57].mxu1 }
0x1b9a   : > { %v2844_v33 = vpop.f32.mrb[58].mxu1 }
0x1b9b   : > { %v2847_v24 = vpack.c.bf16 %v2842_v31, %v2842_v31  ;;  %v4684_v42 = vpop.f32.mrb[59].mxu1  ;;  %v4285_v33 = vld [vmem:[%s6174_s15 + $0x1] ss:$0 sm:$0xff] }
0x1b9d   : > { %v2849_v43 = vsel %vm2150_vm5, %v2847_v24, 0  ;;  %4814 = vmatprep.subr.msk.bf16.mxu1 %vm2150_vm5, %v2847_v24 }
0x1b9e   : > { %4686 = vmatpush3.bf16.msra.mxu1 %v2849_v43 }
0x1b9f   : > { %4697 = vmatprep.subr.bf16.mxu1 %v5130_v1 }
0x1ba1   : > { %4688 = vmatmul.mubr.msk.bf16.vlgmr.msra.gmra.mrb[60].mxu1 %vm2379_vm9, %v5816_v9 }
0x1ba2   : > { %4699 = vmatprep.mubr.msk.bf16.mxu1 %vm5131_vm0, %v5130_v1  ;;  %4698 = vmatpush3.bf16.msra.mxu1 %v4911_v45 }
0x1ba3   : > { %4709 = vmatprep.subr.bf16.mxu1 %v5130_v1 }
0x1c74   : > { %v4689_v46 = vpop.f32.mrb[60].mxu1 }
0x1c75   : > { %v2885_v27 = vpop.f32.mrb[61].mxu1  ;;  %v3008_v57 = vpack.c.bf16 %v4689_v46, %v4689_v46 }
0x1c76   : > { %v2902_v51 = vpack.c.bf16 %v2885_v27, %v2885_v27  ;;  %v4690_v28 = vpop.f32.mrb[62].mxu1 }
0x1c77   : > { %v2888_v53 = vpop.f32.mrb[63].mxu1  ;;  %v3062_v56 = vpack.c.bf16 %v4690_v28, %v4690_v28 }
0x1c78   : > { %v2906_v55 = vpack.c.bf16 %v2888_v53, %v2888_v53  ;;  %4700 = vmatmul.mubr.msk.bf16.vlgmr.msra.gmra.mrb[64].mxu1 %vm2708_vm12, %v2902_v51  ;;  %v4920_v51 = vld [vmem:[%s6175_s16 + $0x28] sm:$0xff]  }
0x1c79   : > { %4710 = vmatpush3.bf16.msra.mxu1 %v4913_v47  ;;  %4711 = vmatprep.mubr.msk.bf16.mxu1 %vm5131_vm0, %v5130_v1  ;;  %v4919_v47 = vld [vmem:[%s6175_s16 + $0x20] sm:$0xff]  }
0x1c7a   : > { %4694 = vmatmul.mubr.msk.bf16.vlgmr.msra.gmra.mrb[48].mxu0 %vm2708_vm12, %v2906_v55  ;;  %4725 = vmatprep.subr.bf16.mxu1 %v5130_v1 }
0x1c7b   : > { %4704 = vmatpush3.bf16.msra.mxu0 %v4914_v38  ;;  %4705 = vmatprep.mubr.msk.bf16.mxu0 %vm5131_vm0, %v5130_v1  ;;  %v4921_v38 = vld [vmem:[%s6175_s16 + $0x38] sm:$0xff]  }
0x1c7c   : > { %4715 = vmatprep.subr.bf16.mxu0 %v5130_v1 }
0x1c80   : > { %4712 = vmatmul.mubr.msk.bf16.vlgmr.msra.gmra.mrb[68].mxu1 %vm2708_vm12, %v3062_v56 }
0x1c81   : > { %4727 = vmatprep.mubr.msk.bf16.mxu1 %vm5131_vm0, %v5130_v1  ;;  %4726 = vmatpush3.bf16.msra.mxu1 %v4918_v22 }
0x1c82   : > { %4706 = vmatmul.mubr.msk.bf16.vlgmr.msra.gmra.mrb[52].mxu0 %vm2708_vm12, %v3008_v57  ;;  %4737 = vmatprep.subr.bf16.mxu1 %v5130_v1 }
0x1c83   : > { %4721 = vmatprep.mubr.msk.bf16.mxu0 %vm5131_vm0, %v5130_v1  ;;  %4716 = vmatpush3.bf16.msra.mxu0 %v4915_v16  ;;  %v4922_v16 = vld [vmem:[%s6175_s16 + $0x30] sm:$0xff]  }
0x1c84   : > { %4717 = vmatprep.subr.bf16.mxu0 %v5130_v1 }
0x1c87   : > { %4718 = vmatpush3.bf16.msra.mxu0 %v4916_v59 }
0x1c88   : > { %4719 = vmatprep.subr.bf16.mxu0 %v5130_v1 }
0x1c8b   : > { %4720 = vmatpush3.bf16.msra.mxu0 %v4917_v52 }
0x1d4b   : > { %v2999_v60 = vpop.f32.mrb[64].mxu1 }
0x1d4c   : > { %v4701_v54 = vpop.f32.mrb[65].mxu1 }
0x1d4d   : > { %v2950_v41 = vpop.f32.mrb[48].mxu0  ;;  %v3002_v62 = vpop.f32.mrb[66].mxu1 }
0x1d4e   : > { %v3000_v40 = vadd.f32 %v2999_v60, %v2950_v41  ;;  %v4695_v3 = vpop.f32.mrb[49].mxu0  ;;  %v4702_v4 = vpop.f32.mrb[67].mxu1  ;;  %v4923_v41 = vld [vmem:[%s6171_s12 + $0x30] sm:$0xff]   ;;  %v4924_v62 = vld [vmem:[%s6171_s12 + $0x38] sm:$0xff]  }
0x1d4f   : > { %v2953_v5 = vpop.f32.mrb[50].mxu0 }
0x1d50   : > { %v4696_v48 = vpop.f32.mrb[51].mxu0 }
0x1d53   : > { %v3106_v8 = vpop.f32.mrb[68].mxu1 }
0x1d54   : > { %v4713_v2 = vpop.f32.mrb[69].mxu1 }
0x1d55   : > { %v3052_v14 = vpop.f32.mrb[52].mxu0  ;;  %v3109_v10 = vpop.f32.mrb[70].mxu1 }
0x1d56   : > { %v3058_v23 = vadd.f32 %v3052_v14, %v3000_v40  ;;  %v4707_v11 = vpop.f32.mrb[53].mxu0  ;;  %v4714_v58 = vpop.f32.mrb[71].mxu1 }
0x1d57   : > { %v3055_v35 = vpop.f32.mrb[54].mxu0 }
0x1d58   : > { %v3112_v37 = vadd.f32 %v3106_v8, %v3058_v23  ;;  %v4708_v49 = vpop.f32.mrb[55].mxu0 }
0x1d5a   : > { %v3120_v36 = vadd.f32 %v4269_v6, %v3112_v37  ;;  %v4925_v6 = vld [vmem:[%s6171_s12 + $0x40] sm:$0xff]  }
0x1d5c   : > { %v3121_v12 = vadd.f32 %v3120_v36, %v5880_v39  ;;  %v4307_v36 = vld [vmem:[%s6176_s17 + $0x1] ss:$0 sm:$0xff] }
0x1d5e   : > { %v5960_v13 = vmax.f32 %v3121_v12, 0.0 }
0x1d60   : > { %3128 = vrot.lane.b32.xlu0 %v5960_v13, %s5136_s2  ;;  %v3125_v15 = vrot.slane %v5960_v13, 1  ;;  %v3123_v18 = vrot.slane %v5960_v13, 7 }
0x1d62   : > { %v3126_v17 = vsel %vm2697_vm10, 0.0, %v3125_v15  ;;  %v3124_v50 = vsel %vm2694_vm11, 0.0, %v3123_v18 }
0x1d63   : > { %3132 = vrot.lane.b32.xlu1 %v3126_v17, %s5135_s1 }
0x1dd2   : > { %v3129_v19 = vpop.permute.xlu0 %3128 }
0x1dd3   : > { %v3135_v39 = vsel %vm2708_vm12, %v3124_v50, %v3129_v19 }
0x1dd5   : > { %v3133_v63 = vpop.permute.xlu1 %3132 }
0x1dd6   : > { %v3136_v21 = vsel %vm820_vm1, %v3135_v39, %v3133_v63 }
0x1dd7   : > { %v3144_v61 = vpack.c.bf16 %v3136_v21, %v3136_v21 }
0x1dd9   : > { %4722 = vmatmul.mubr.msk.bf16.vlgmr.msra.gmra.mrb[56].mxu0 %vm2743_vm13, %v3144_v61 }
0x1dda   : > { %4733 = vmatprep.mubr.msk.bf16.mxu0 %vm2379_vm9, %v5804_v0 }
0x1eac   : > { %v3208_v26 = vpop.f32.mrb[56].mxu0 }
0x1ead   : > { %v3209_v7 = vadd.f32 %v4277_v25, %v3208_v26  ;;  %v4723_v29 = vpop.f32.mrb[57].mxu0 }
0x1eae   : > { %v3211_v30 = vpop.f32.mrb[58].mxu0  ;;  %v4926_v29 = vld [vmem:[%s6173_s14 + $0x10] sm:$0xff]  }
0x1eaf   : > { %v3214_v20 = vmax.f32 %v3209_v7, 0.0  ;;  %v4724_v31 = vpop.f32.mrb[59].mxu0 }
0x1eb1   : > { %v3218_v32 = vpack.c.bf16 %v3214_v20, %v3214_v20 }
0x1eb3   : > { %4728 = vmatmul.mubr.msk.bf16.vlgmr.msra.gmra.mrb[72].mxu1 %vm2708_vm12, %v3218_v32 }
0x1eb4   : > { %4739 = vmatprep.mubr.msk.bf16.mxu1 %vm5131_vm0, %v5130_v1  ;;  %4738 = vmatpush3.bf16.msra.mxu1 %v4920_v51 }
0x1eb5   : > { %4749 = vmatprep.subr.bf16.mxu1 %v5130_v1 }
0x1f86   : > { %v3270_v24 = vpop.f32.mrb[72].mxu1 }
0x1f87   : > { %v3271_v42 = vadd.f32 %v4285_v33, %v3270_v24  ;;  %v4729_v43 = vpop.f32.mrb[73].mxu1 }
0x1f88   : > { %v3273_v45 = vpop.f32.mrb[74].mxu1 }
0x1f89   : > { %v3276_v44 = vpack.c.bf16 %v3271_v42, %v3271_v42  ;;  %v4730_v46 = vpop.f32.mrb[75].mxu1 }
0x1f8b   : > { %v3278_v27 = vsel %vm2150_vm5, %v3276_v44, 0  ;;  %4815 = vmatprep.subr.msk.bf16.mxu0 %vm2150_vm5, %v3276_v44 }
0x1f8c   : > { %4732 = vmatpush3.bf16.msra.mxu0 %v3278_v27 }
0x1f8d   : > { %4743 = vmatprep.subr.bf16.mxu0 %v5130_v1 }
0x1f8f   : > { %4734 = vmatmul.mubr.msk.bf16.vlgmr.msra.gmra.mrb[60].mxu0 %vm2379_vm9, %v5816_v9 }
0x1f90   : > { %4745 = vmatprep.mubr.msk.bf16.mxu0 %vm5131_vm0, %v5130_v1  ;;  %4744 = vmatpush3.bf16.msra.mxu0 %v4919_v47 }
0x1f91   : > { %4755 = vmatprep.subr.bf16.mxu0 %v5130_v1 }
0x2062   : > { %v4735_v28 = vpop.f32.mrb[60].mxu0 }
0x2063   : > { %v3314_v53 = vpop.f32.mrb[61].mxu0  ;;  %v3438_v54 = vpack.c.bf16 %v4735_v28, %v4735_v28  ;;  %v4927_v28 = vld [vmem:[%s6175_s16 + $0x40] sm:$0xff]  }
0x2064   : > { %v3332_v55 = vpack.c.bf16 %v3314_v53, %v3314_v53  ;;  %v4736_v56 = vpop.f32.mrb[62].mxu0  ;;  %v4928_v53 = vld [vmem:[%s6175_s16 + $0x48] sm:$0xff]  }
0x2065   : > { %v3317_v57 = vpop.f32.mrb[63].mxu0  ;;  %v3492_v60 = vpack.c.bf16 %v4736_v56, %v4736_v56 }
0x2066   : > { %v3336_v59 = vpack.c.bf16 %v3317_v57, %v3317_v57  ;;  %4746 = vmatmul.mubr.msk.bf16.vlgmr.msra.gmra.mrb[64].mxu0 %vm2708_vm12, %v3332_v55 }
0x2067   : > { %4756 = vmatpush3.bf16.msra.mxu0 %v4921_v38  ;;  %4757 = vmatprep.mubr.msk.bf16.mxu0 %vm5131_vm0, %v5130_v1 }
0x2068   : > { %4740 = vmatmul.mubr.msk.bf16.vlgmr.msra.gmra.mrb[76].mxu1 %vm2708_vm12, %v3336_v59  ;;  %4771 = vmatprep.subr.bf16.mxu0 %v5130_v1  ;;  %v4930_v59 = vld [vmem:[%s6175_s16 + $0x50] sm:$0xff]  }
0x2069   : > { %4750 = vmatpush3.bf16.msra.mxu1 %v4922_v16  ;;  %4751 = vmatprep.mubr.msk.bf16.mxu1 %vm5131_vm0, %v5130_v1 }
0x206a   : > { %4761 = vmatprep.subr.bf16.mxu1 %v5130_v1 }
0x206e   : > { %4758 = vmatmul.mubr.msk.bf16.vlgmr.msra.gmra.mrb[68].mxu0 %vm2708_vm12, %v3492_v60 }
0x206f   : > { %4773 = vmatprep.mubr.msk.bf16.mxu0 %vm5131_vm0, %v5130_v1  ;;  %4772 = vmatpush3.bf16.msra.mxu0 %v4926_v29 }
0x2070   : > { %4752 = vmatmul.mubr.msk.bf16.vlgmr.msra.gmra.mrb[80].mxu1 %vm2708_vm12, %v3438_v54  ;;  %4783 = vmatprep.subr.bf16.mxu0 %v5130_v1 }
0x2071   : > { %4767 = vmatprep.mubr.msk.bf16.mxu1 %vm5131_vm0, %v5130_v1  ;;  %4762 = vmatpush3.bf16.msra.mxu1 %v4923_v41 }
0x2072   : > { %4763 = vmatprep.subr.bf16.mxu1 %v5130_v1 }
0x2075   : > { %4764 = vmatpush3.bf16.msra.mxu1 %v4924_v62  ;;  %v4931_v62 = vld [vmem:[%s6177_s18] sm:$0xff]  }
0x2076   : > { %4765 = vmatprep.subr.bf16.mxu1 %v5130_v1 }
0x2079   : > { %4766 = vmatpush3.bf16.msra.mxu1 %v4925_v6 }
0x2139   : > { %v3429_v40 = vpop.f32.mrb[64].mxu0 }
0x213a   : > { %v4747_v3 = vpop.f32.mrb[65].mxu0 }
0x213b   : > { %v3380_v4 = vpop.f32.mrb[76].mxu1  ;;  %v3432_v5 = vpop.f32.mrb[66].mxu0 }
0x213c   : > { %v3430_v48 = vadd.f32 %v3429_v40, %v3380_v4  ;;  %v4741_v8 = vpop.f32.mrb[77].mxu1  ;;  %v4748_v2 = vpop.f32.mrb[67].mxu0 }
0x213d   : > { %v3383_v14 = vpop.f32.mrb[78].mxu1 }
0x213e   : > { %v4742_v10 = vpop.f32.mrb[79].mxu1 }
0x2141   : > { %v3536_v52 = vpop.f32.mrb[68].mxu0 }
0x2142   : > { %v4759_v23 = vpop.f32.mrb[69].mxu0 }
0x2143   : > { %v3482_v11 = vpop.f32.mrb[80].mxu1  ;;  %v3539_v58 = vpop.f32.mrb[70].mxu0 }
0x2144   : > { %v3488_v35 = vadd.f32 %v3482_v11, %v3430_v48  ;;  %v4753_v37 = vpop.f32.mrb[81].mxu1  ;;  %v4760_v49 = vpop.f32.mrb[71].mxu0 }
0x2145   : > { %v3485_v12 = vpop.f32.mrb[82].mxu1  ;;  %v4345_v37 = vld [vmem:[%s6176_s17 + $0x2] ss:$0 sm:$0xff] }
0x2146   : > { %v3542_v15 = vadd.f32 %v3536_v52, %v3488_v35  ;;  %v4754_v17 = vpop.f32.mrb[83].mxu1 }
0x2148   : > { %v3551_v18 = vadd.f32 %v4307_v36, %v3542_v15 }
0x214a   : > { %v3552_v19 = vadd.f32 %v3551_v18, %v5960_v13 }
0x214c   : > { %v6039_v50 = vmax.f32 %v3552_v19, 0.0 }
0x214e   : > { %3559 = vrot.lane.b32.xlu0 %v6039_v50, %s5136_s2  ;;  %v3556_v39 = vrot.slane %v6039_v50, 1  ;;  %v3554_v21 = vrot.slane %v6039_v50, 7 }
0x2150   : > { %v3557_v63 = vsel %vm2697_vm10, 0.0, %v3556_v39  ;;  %v3555_v22 = vsel %vm2694_vm11, 0.0, %v3554_v21  ;;  %v4346_v39 = vld [vmem:[%s6215_s3] ss:$0 sm:$0xff]  ;;  %s5072_s3 = scalar_lea.vmem %s5071_s0, 256 }
0x2151   : > { %3563 = vrot.lane.b32.xlu1 %v3557_v63, %s5135_s1  ;;  %s6214_s1 = sld [smem:[#allocation8_spill]]  ;;  %p5074_p1 = scmp.lt.s32.totalorder %s5072_s3, %s5066_s28 }
0x2153   : > { %p5075_p2 = por %p5074_p1, %p5073_p0 }
0x2155   : > { %p5076_p3 = pnand %p5075_p2, %p5069_p13 }
0x2157   : > { %s4350_s24 = sshll.u32 %s6214_s1, 7  ;;  %s4046_s1 = scalar_lea.sflag [#allocation3], %s633_s29 }
0x2158   : > { %s6116_s19 = scalar_lea.hbm %s6217_s4, %s4350_s24 }
0x21c0   : > { %v3560_v61 = vpop.permute.xlu0 %3559 }
0x21c1   : > { %v3566_v13 = vsel %vm2708_vm12, %v3555_v22, %v3560_v61 }
0x21c3   : > { %v3564_v25 = vpop.permute.xlu1 %3563 }
0x21c4   : > { %v3567_v26 = vsel %vm820_vm1, %v3566_v13, %v3564_v25 }
0x21c5   : > { %v3575_v7 = vpack.c.bf16 %v3567_v26, %v3567_v26 }
0x21c7   : > { %4768 = vmatmul.mubr.msk.bf16.vlgmr.msra.gmra.mrb[84].mxu1 %vm2743_vm13, %v3575_v7 }
0x21c8   : > { %4779 = vmatprep.mubr.msk.bf16.mxu1 %vm2379_vm9, %v5804_v0  ;;  %v4323_v0 = vld [vmem:[%s6174_s15 + $0x2] ss:$0 sm:$0xff] }
0x229a   : > { %v3639_v30 = vpop.f32.mrb[84].mxu1 }
0x229b   : > { %v3640_v20 = vadd.f32 %v4315_v34, %v3639_v30  ;;  %v4769_v31 = vpop.f32.mrb[85].mxu1 }
0x229c   : > { %v3642_v32 = vpop.f32.mrb[86].mxu1 }
0x229d   : > { %v3645_v33 = vmax.f32 %v3640_v20, 0.0  ;;  %v4770_v24 = vpop.f32.mrb[87].mxu1 }
0x229f   : > { %v3649_v42 = vpack.c.bf16 %v3645_v33, %v3645_v33 }
0x22a1   : > { %4774 = vmatmul.mubr.msk.bf16.vlgmr.msra.gmra.mrb[72].mxu0 %vm2708_vm12, %v3649_v42 }
0x22a2   : > { %4785 = vmatprep.mubr.msk.bf16.mxu0 %vm5131_vm0, %v5130_v1  ;;  %4784 = vmatpush3.bf16.msra.mxu0 %v4928_v53 }
0x22a3   : > { %4795 = vmatprep.subr.bf16.mxu0 %v5130_v1 }
0x2374   : > { %v3701_v43 = vpop.f32.mrb[72].mxu0 }
0x2375   : > { %v3702_v45 = vadd.f32 %v4323_v0, %v3701_v43  ;;  %v4775_v44 = vpop.f32.mrb[73].mxu0 }
0x2376   : > { %v3704_v46 = vpop.f32.mrb[74].mxu0 }
0x2377   : > { %v3707_v27 = vpack.c.bf16 %v3702_v45, %v3702_v45  ;;  %v4776_v47 = vpop.f32.mrb[75].mxu0 }
0x2379   : > { %v3709_v51 = vsel %vm2150_vm5, %v3707_v27, 0  ;;  %4816 = vmatprep.subr.msk.bf16.mxu1 %vm2150_vm5, %v3707_v27 }
0x237a   : > { %4778 = vmatpush3.bf16.msra.mxu1 %v3709_v51 }
0x237b   : > { %4789 = vmatprep.subr.bf16.mxu1 %v5130_v1 }
0x237d   : > { %4780 = vmatmul.mubr.msk.bf16.vlgmr.msra.gmra.mrb[88].mxu1 %vm2379_vm9, %v5816_v9  ;;  %v4929_v9 = vld [vmem:[%s6175_s16 + $0x58] sm:$0xff]  }
0x237e   : > { %4791 = vmatprep.mubr.msk.bf16.mxu1 %vm5131_vm0, %v5130_v1  ;;  %4790 = vmatpush3.bf16.msra.mxu1 %v4927_v28 }
0x237f   : > { %4801 = vmatprep.subr.bf16.mxu1 %v5130_v1 }
0x2450   : > { %v4781_v38 = vpop.f32.mrb[88].mxu1 }
0x2451   : > { %v3745_v55 = vpop.f32.mrb[89].mxu1  ;;  %v3869_v41 = vpack.c.bf16 %v4781_v38, %v4781_v38 }
0x2452   : > { %v3763_v56 = vpack.c.bf16 %v3745_v55, %v3745_v55  ;;  %v4782_v57 = vpop.f32.mrb[90].mxu1 }
0x2453   : > { %v3748_v16 = vpop.f32.mrb[91].mxu1  ;;  %v3923_v54 = vpack.c.bf16 %v4782_v57, %v4782_v57 }
0x2454   : > { %v3767_v60 = vpack.c.bf16 %v3748_v16, %v3748_v16  ;;  %4792 = vmatmul.mubr.msk.bf16.vlgmr.msra.gmra.mrb[92].mxu1 %vm2708_vm12, %v3763_v56 }
0x2455   : > { %4802 = vmatpush3.bf16.msra.mxu1 %v4929_v9  ;;  %4803 = vmatprep.mubr.msk.bf16.mxu1 %vm5131_vm0, %v5130_v1 }
0x2456   : > { %4786 = vmatmul.mubr.msk.bf16.vlgmr.msra.gmra.mrb[76].mxu0 %vm2708_vm12, %v3767_v60 }
0x2457   : > { %4796 = vmatpush3.bf16.msra.mxu0 %v4930_v59  ;;  %4797 = vmatprep.mubr.msk.bf16.mxu0 %vm5131_vm0, %v5130_v1 }
0x2458   : > { %4807 = vmatprep.subr.bf16.mxu0 %v5130_v1 }
0x245c   : > { %4804 = vmatmul.mubr.msk.bf16.vlgmr.msra.gmra.mrb[96].mxu1 %vm2708_vm12, %v3923_v54 }
0x245e   : > { %4798 = vmatmul.mubr.msk.bf16.vlgmr.msra.gmra.mrb[80].mxu0 %vm2708_vm12, %v3869_v41 }
0x245f   : > { %4809 = vmatprep.mubr.msk.bf16.mxu0 %vm5131_vm0, %v5130_v1  ;;  %4808 = vmatpush3.bf16.msra.mxu0 %v4931_v62 }
0x2527   : > { %v3860_v40 = vpop.f32.mrb[92].mxu1 }
0x2528   : > { %v4793_v3 = vpop.f32.mrb[93].mxu1 }
0x2529   : > { %v3811_v4 = vpop.f32.mrb[76].mxu0  ;;  %v3863_v5 = vpop.f32.mrb[94].mxu1 }
0x252a   : > { %v3861_v48 = vadd.f32 %v3860_v40, %v3811_v4  ;;  %v4787_v8 = vpop.f32.mrb[77].mxu0  ;;  %v4794_v2 = vpop.f32.mrb[95].mxu1 }
0x252b   : > { %v3814_v14 = vpop.f32.mrb[78].mxu0 }
0x252c   : > { %v4788_v10 = vpop.f32.mrb[79].mxu0 }
0x252f   : > { %v3967_v52 = vpop.f32.mrb[96].mxu1 }
0x2530   : > { %v4805_v23 = vpop.f32.mrb[97].mxu1 }
0x2531   : > { %v3913_v11 = vpop.f32.mrb[80].mxu0  ;;  %v3970_v58 = vpop.f32.mrb[98].mxu1 }
0x2532   : > { %v3919_v1 = vadd.f32 %v3913_v11, %v3861_v48  ;;  %v4799_v6 = vpop.f32.mrb[81].mxu0  ;;  %v4806_v35 = vpop.f32.mrb[99].mxu1 }
0x2533   : > { %v3916_v49 = vpop.f32.mrb[82].mxu0 }
0x2534   : > { %v3973_v36 = vadd.f32 %v3967_v52, %v3919_v1  ;;  %v4800_v12 = vpop.f32.mrb[83].mxu0 }
0x2536   : > { %v3982_v15 = vadd.f32 %v4345_v37, %v3973_v36 }
0x2538   : > { %v3983_v17 = vadd.f32 %v3982_v15, %v6039_v50 }
0x253a   : > { %v3984_v18 = vmax.f32 %v3983_v17, 0.0 }
0x253c   : > { %v3987_v19 = vpack.c.bf16 %v3984_v18, %v3984_v18 }
0x253e   : > { %4810 = vmatmul.mubr.msk.bf16.vlgmr.msra.gmra.mrb[84].mxu0 %vm2708_vm12, %v3987_v19 }
0x2611   : > { %v4038_v63 = vpop.f32.mrb[84].mxu0 }
0x2612   : > { %v4039_v21 = vadd.f32 %v4346_v39, %v4038_v63  ;;  %v4811_v61 = vpop.f32.mrb[85].mxu0 }
0x2613   : > { %v4041_v50 = vpop.f32.mrb[86].mxu0 }
0x2614   : > { %v4812_v22 = vpop.f32.mrb[87].mxu0  ;;  %4044 = vst.msk [vmem:[%s635_s23] sm:$0xff] %vm820_vm1, %v4039_v21 }
0x2615   : > { %5079 = shalt.err (!%p5076_p3)
}
0x2616   : > { %s5080_s29 = scalar_lea.hbm %s6116_s19, 128  ;;  %s5084_s2 = scalar_lea.hbm %s6217_s4, 256 }
0x2617   : > { %p5081_p4 = scmp.ne.s32.totalorder %s6116_s19, %s5080_s29  ;;  %p5085_p9 = scmp.lt.u32.totalorder %s6116_s19, %s6217_s4 }
0x2618   : > { %p5086_p10 = scmp.lt.u32.totalorder %s5084_s2, %s5080_s29  ;;  %p5088_p12 = scmp.lt.u32.totalorder %s5080_s29, %s6116_s19 }
0x2619   : > { %p5082_p7 = pnand %p5081_p4, %p5281_p5 }
0x261a   : > { %p5087_p11 = por %p5086_p10, %p5085_p9 }
0x261b   : > { %p5083_p8 = pneg %p5082_p7 }
0x261c   : > { %p5089_p13 = por %p5088_p12, %p5087_p11 }
0x261e   : > { %p5090_p0 = pnand %p5089_p13, %p5083_p8 }
0x2620   : > { %5093 = shalt.err (!%p5090_p0)
}
0x2621   : > { %4817 = dma.vmem_to_hbm [thread:$0]  (%p5281_p5), %s6118_s26, 128, %s6116_s19, %s4046_s1  }
0x2622 PF: > { %s6218_s28 = sld [smem:[#allocation7_spill]]  ;;  %s6219_s0 = sld [smem:[#allocation5_spill]] }
0x2628   : > { %p4823_p1 = scmp.ge.s32.totalorder %s6218_s28, 2  ;;  %s4071_s24 = sand.u32 1, %s6219_s0  }
0x2629   : > { %s4072_s23 = scalar_lea.sflag [#allocation3], %s4071_s24 }
0x262a   : > { %p4820_p2 = pnand %p4823_p1, %p5285_p6 }
0x262c   : > { %5111 = dma.done.wait (!%p4820_p2), %s4072_s23, 128  }
0x262d   : > { %5113 = vsyncadd (!%p4820_p2), %s4072_s23, 4294967168  ;;  %s6221_s24 = sld [smem:[#allocation9_spill]]  ;;  %s6222_s29 = sld [smem:[#allocation6_spill]] }
0x262e   : > { %s6223_s23 = sld [smem:[#allocation10_spill]]  ;;  %s6224_s1 = smov %s5120_s22 }
0x2633   : > { %p30_p3 = scmp.ge.s32.totalorder %s6221_s24, 4   ;;  %s6225_s22 = smov %s6222_s29 }
0x2635   :  { %32 = sbr.rel (!%p30_p3) target bundleno = 11 (0xb), region = 165 }
0x263c   :  { %4077 = vsyncpa [#allocation3], 1 }
0x263d   :  { %4079 = vsyncpa [#allocation3 + $0x1], 1 }

</bundles_post_ra>
